<compile_context>
chip_gen: v7x
topology: tpu7x:2x2x1
jax: 0.10.0
libtpu: 0.0.40
codegen_flags: <defaults>
</compile_context>

<pallas_src>
import jax
import jax.numpy as jnp
import numpy as np
from jax.experimental import pallas as pl
from jax.experimental.pallas import tpu as pltpu

KH, KW = 4, 4          # pooling window (H, W); depth window is 1 (identity)
SH, SW = 4, 4          # strides (== window here)
PAD_H, PAD_W = 1, 1    # zero padding on H, W (depth padding is 0)
GROUP = 8              # samples packed per kernel row -> 128-lane output block


def _pool_selection_matrix(H, W, H_out, W_out, group):
    """Block-diagonal 0/1 matrix of shape (group*H*W, group*H_out*W_out).

    Column (g, oh, ow) sums the pixels of packed sample g that fall inside the
    4x4 window of output (oh, ow).  The (0,1,1) zero padding is folded in: a
    padded pixel simply has no matching input row (contributes 0), while the
    divisor stays KH*KW (count_include_pad=True).  Rows past the window
    coverage (the un-sliced "glue" region) match no output column.
    """
    h = np.arange(H)
    w = np.arange(W)
    sel_h = ((h[:, None] + PAD_H) // SH) == np.arange(H_out)[None, :]    # (H, H_out)
    sel_w = ((w[:, None] + PAD_W) // SW) == np.arange(W_out)[None, :]    # (W, W_out)
    per = (sel_h[:, None, :, None] & sel_w[None, :, None, :]).reshape(
        H * W, H_out * W_out).astype(np.float32)                         # (HW, HoWo)
    big = np.kron(np.eye(group, dtype=np.float32), per)                  # block diagonal
    return jnp.asarray(big)


def _choose_row_tile(n_rows, max_rows=128):
    """Largest row tile dividing n_rows, a multiple of 8 (sublane) or the full
    extent, <= max_rows, preferring a grid of >=2 blocks (v7x dual TensorCore)."""
    single = None
    for cand in range(min(n_rows, max_rows), 0, -1):
        if n_rows % cand:
            continue
        if cand % 8 != 0 and cand != n_rows:
            continue
        if n_rows // cand >= 2:
            return cand
        if single is None:
            single = cand
    return single if single is not None else min(n_rows, max_rows)


def _avgpool_relu_kernel(x_ref, p_ref, o_ref):
    # x_ref: (TBg, G*H*W)   p_ref: (G*H*W, G*Ho*Wo)   o_ref: (TBg, G*Ho*Wo)
    y = jnp.dot(x_ref[...], p_ref[...],
                precision=jax.lax.Precision.HIGHEST,
                preferred_element_type=jnp.float32)
    o_ref[...] = jnp.maximum(y * (1.0 / (KH * KW)), 0.0).astype(o_ref.dtype)


def avgpool_relu(x, *, group=GROUP, max_row_tile=128):
    """x: (N, C, D, H, W) float32 -> relu(AvgPool3d((1,4,4),pad=(0,1,1),stride=(1,4,4)))."""
    N, C, D, H, W = x.shape
    H_out = (H + 2 * PAD_H - KH) // SH + 1
    W_out = (W + 2 * PAD_W - KW) // SW + 1
    HW, HOWO = H * W, H_out * W_out

    B = N * C * D
    x_flat = x.reshape(B, HW)                       # contiguous reshape: no HBM copy

    # Pack `group` samples per kernel row.  Pad the batch dim with zero rows only
    # when B is not already a multiple of group / the row tile (cheap, rare path;
    # not taken in the demo below).
    if B % group:
        x_flat = jnp.concatenate(
            [x_flat, jnp.zeros((group - B % group, HW), x_flat.dtype)], axis=0)
    Bg = x_flat.shape[0] // group

    tbg = _choose_row_tile(Bg, max_row_tile)
    n_blocks = pl.cdiv(Bg, tbg)
    if n_blocks * tbg != Bg:
        x_flat = jnp.concatenate(
            [x_flat, jnp.zeros(((n_blocks * tbg - Bg) * group, HW), x_flat.dtype)],
            axis=0)
        Bg = n_blocks * tbg

    xg = x_flat.reshape(Bg, group * HW)
    p = _pool_selection_matrix(H, W, H_out, W_out, group)   # (group*HW, group*HOWO)

    out = pl.pallas_call(
        _avgpool_relu_kernel,
        out_shape=jax.ShapeDtypeStruct((Bg, group * HOWO), x.dtype),
        grid=(n_blocks,),
        in_specs=[
            pl.BlockSpec((tbg, group * HW), lambda i: (i, 0)),
            # constant block index -> selection matrix stays resident in VMEM
            pl.BlockSpec((group * HW, group * HOWO), lambda i: (0, 0)),
        ],
        out_specs=pl.BlockSpec((tbg, group * HOWO), lambda i: (i, 0)),
        compiler_params=pltpu.CompilerParams(
            dimension_semantics=("parallel",)),
    )(xg, p)

    out = out.reshape(Bg * group, HOWO)[:B]
    return out.reshape(N, C, D, H_out, W_out)


def _reference(x):
    # pure-JAX reference of AvgPool3d((1,4,4), pad=(0,1,1), stride=(1,4,4)) + relu
    N, C, D, H, W = x.shape
    H_out = (H + 2 * PAD_H - KH) // SH + 1
    W_out = (W + 2 * PAD_W - KW) // SW + 1
    xp = jnp.pad(x, ((0, 0), (0, 0), (0, 0), (PAD_H, PAD_H), (PAD_W, PAD_W)))
    xp = xp[..., :H_out * KH, :W_out * KW]
    xr = xp.reshape(N, C, D, H_out, KH, W_out, KW)
    pooled = xr.sum(axis=(4, 6)) / (KH * KW)        # count_include_pad=True divisor
    return jnp.maximum(pooled, 0.0)


if __name__ == "__main__":
    key = jax.random.PRNGKey(0)
    # small NCDHW input: batch=2, channels=4, depth=16, spatial=16x16
    # (B = N*C*D = 128 samples -> 16 packed kernel rows -> 2 parallel grid blocks)
    x = jax.random.normal(key, (2, 4, 16, 16, 16), dtype=jnp.float32)

    out = jax.block_until_ready(avgpool_relu(x))
    ref = jax.block_until_ready(_reference(x))
    assert out.shape == ref.shape == (2, 4, 16, 4, 4)
    np.testing.assert_allclose(np.asarray(out), np.asarray(ref), rtol=1e-5, atol=1e-5)

    print("KERNEL_OK")
</pallas_src>

<mosaic_0001>
module attributes {stable_mosaic.version = 11 : i64} {
  func.func @_avgpool_relu_kernel(%arg0: i32, %arg1: memref<8x2048xf32, #tpu.memory_space<vmem>>, %arg2: memref<2048x128xf32, #tpu.memory_space<vmem>>, %arg3: memref<8x128xf32, #tpu.memory_space<vmem>>) attributes {dimension_semantics = [#tpu.dimension_semantics<parallel>], iteration_bounds = array<i64: 2>, scalar_prefetch = 0 : i64, scratch_operands = 0 : i64, tpu.core_type = #tpu.core_type<tc>, window_params = [{transform_indices = @transform_0, window_bounds = array<i64: 8, 2048>}, {pipeline_mode = #tpu.pipeline_mode<synchronous>, transform_indices = @transform_1, window_bounds = array<i64: 2048, 128>}, {transform_indices = @transform_2, window_bounds = array<i64: 8, 128>}]} {
    %c0 = arith.constant 0 : index
    %c0_0 = arith.constant 0 : index
    %0 = vector.load %arg1[%c0, %c0_0] : memref<8x2048xf32, #tpu.memory_space<vmem>>, vector<8x2048xf32>
    %c0_1 = arith.constant 0 : index
    %c0_2 = arith.constant 0 : index
    %1 = vector.load %arg2[%c0_1, %c0_2] : memref<2048x128xf32, #tpu.memory_space<vmem>>, vector<2048x128xf32>
    %cst = arith.constant dense<0.000000e+00> : vector<8x128xf32>
    %2 = tpu.matmul %0, %1, %cst {dimension_numbers = #tpu.dot_dimension_numbers<[1], [0], [0], [1], [0, 0, 1, 1], [], []>, precision = #tpu.contract_precision<fp32>} : vector<8x2048xf32>, vector<2048x128xf32>, vector<8x128xf32> -> vector<8x128xf32>
    %cst_3 = arith.constant 6.250000e-02 : f32
    %3 = vector.broadcast %cst_3 : f32 to vector<8x128xf32>
    %4 = arith.mulf %2, %3 : vector<8x128xf32>
    %cst_4 = arith.constant 0.000000e+00 : f32
    %5 = vector.broadcast %cst_4 : f32 to vector<8x128xf32>
    %6 = arith.maximumf %4, %5 : vector<8x128xf32>
    %c0_5 = arith.constant 0 : index
    %c0_6 = arith.constant 0 : index
    %7 = vector.load %arg3[%c0_5, %c0_6] : memref<8x128xf32, #tpu.memory_space<vmem>>, vector<8x128xf32>
    tpu.vector_store %arg3[%c0_5, %c0_6], %6 {strides = array<i32>} : memref<8x128xf32, #tpu.memory_space<vmem>>, vector<8x128xf32>,
    return
  }
  func.func @transform_0(%arg0: i32) -> (i32, i32) {
    %c0_i32 = arith.constant 0 : i32
    %c0_i32_0 = arith.constant 0 : i32
    return %arg0, %c0_i32 : i32, i32
  }
  func.func @transform_1(%arg0: i32) -> (i32, i32) {
    %c0_i32 = arith.constant 0 : i32
    %c0_i32_0 = arith.constant 0 : i32
    %c0_i32_1 = arith.constant 0 : i32
    return %c0_i32, %c0_i32_0 : i32, i32
  }
  func.func @transform_2(%arg0: i32) -> (i32, i32) {
    %c0_i32 = arith.constant 0 : i32
    %c0_i32_0 = arith.constant 0 : i32
    return %arg0, %c0_i32 : i32, i32
  }
}

</mosaic_0001>

<bundles_post_ra>
// kernel: tpu_custom_call.1
= control target key start
LH: loop header
LB: loop body
LE: loop exit
PB: predicated region body
PF: predicated region fallthrough
CT: control target
= control target key end

     0   :  { %7 = vsyncpa [#allocation3], 0  ;;  %s14856_s0 = inlined_call_operand.hbm [shape: f32[16,2048], index: 0, kind: input, shape index: {}]   ;;  %s14857_s1 = inlined_call_operand.hbm [shape: f32[2048,128], index: 1, kind: input, shape index: {}]   ;;  %s14858_s2 = inlined_call_operand.hbm [shape: f32[16,128], index: 2, kind: output, shape index: {}]  }
   0x1   :  { %9 = vsyncpa [#allocation3 + $0x1], 0 }
   0x2   :  { %10 = vsyncpa [#allocation6], 0 }
   0x3   :  { %11 = vsyncpa [#allocation4], 0 }
   0x4   :  { %13 = vsyncpa [#allocation4 + $0x1], 0  ;;  %s10881_s9 = smov 0   ;;  %s10883_s10 = smov 0  }
   0x5   :  { %s10885_s11 = smov 0   ;;  %s10887_s12 = smov 0  }
   0x6 LB: > { %s10902_s13 = sadd.s32 4294967295, %s10859_s12   ;;  %s7440_s14 = sadd.s32 4294967294, %s10859_s12   ;;  %s10859_s12 = sphi %s10887_s12, %s15846_s12   ;;  %s10855_s11 = sphi %s10885_s11, %s15845_s11   ;;  %s10851_s10 = sphi %s10883_s10, %s15844_s10   ;;  %s10847_s9 = sphi %s10881_s9, %s15843_s9  }
   0x7   : > { %p39_p0 = scmp.ne.s32.totalorder %s10851_s10, %s10847_s9  ;;  %p14859_p1 = scmp.eq.s32.totalorder %s10902_s13, 0 }
   0x8   : > { %p90_p3 = scmp.eq.s32.totalorder %s7440_s14, 1  ;;  %p7441_p5 = scmp.ge.s32.totalorder %s10859_s12, 1 }
   0x9   : > { %p10911_p4 = por %p14859_p1, %p39_p0  ;;  %p97_p7 = scmp.lt.s32.totalorder %s10859_s12, 3 }
   0xa   : > { %p10916_p6 = por %p90_p3, %p39_p0  ;;  %s10861_s18 = smov [#allocation5]  }
   0xb   : > { %s15256_s15 = scalar_select %p10911_p4, 1, 0 }
   0xc   : > { %s15257_s16 = scalar_select %p10916_p6, 1, 0 }
   0xd   : > { %p10921_p8 = pnand %p7441_p5, %p97_p7  ;;  %s109_s19 = sshll.u32 %s10861_s18, 4  ;;  %s10925_s19 = int_to_ptr.vmem [resolvable:$true] %s109_s19 }
   0xe   : > { %s10937_s21 = sadd.s32 1, %s10859_s12   ;;  %s26_s22 = sadd.s32 1, %s10855_s11 }
   0xf   : > { %s15258_s17 = scalar_select %p10921_p8, 1, 0 }
  0x10   : > { %p10680_p9 = pneg %p10921_p8  ;;  %s23_s23 = ssub.s32 %s10859_s12, %s10937_s21 }
  0x11   : > { %s10731_s26 = scalar_lea.hbm %s14857_s1, 32768 }
  0x12   : > { %p10932_p11 = pnand %p10680_p9, %p14859_p1  ;;  %p10732_p12 = scmp.ne.s32.totalorder %s14857_s1, %s10731_s26 }
  0x13   : > { %p10738_p5 = scmp.lt.u32.totalorder %s10731_s26, %s14857_s1 }
  0x14   : > { %p10733_p13 = pneg %p10932_p11 }
  0x16   : > { %p10734_p0 = pnand %p10733_p13, %p10732_p12 }
  0x18   : > { %p10735_p3 = pneg %p10734_p0 }
  0x1a   : > { %p10740_p7 = pnand %p10738_p5, %p10735_p3 }
  0x1c   : > { %10743 = shalt.err (!%p10740_p7)
}
  0x1d   : > { %s10744_s3 = scalar_lea.vmem %s10925_s19, 32768  ;;  %p10752_p2 = scmp.lt.s32.totalorder %s10925_s19, %s10925_s19 }
  0x1e   : > { %p10745_p9 = scmp.ne.s32.totalorder %s10925_s19, %s10744_s3  ;;  %p10753_p6 = scmp.lt.s32.totalorder %s10744_s3, %s10744_s3 }
  0x20   : > { %p10747_p10 = pnand %p10745_p9, %p10733_p13  ;;  %p10754_p4 = por %p10753_p6, %p10752_p2 }
  0x22   : > { %p10748_p1 = pneg %p10747_p10 }
  0x24   : > { %p10755_p8 = pnand %p10754_p4, %p10748_p1 }
  0x26   : > { %10758 = shalt.err (!%p10755_p8)
}
  0x27   : > { %s10862_s4 = smov 128   ;;  %s10863_s5 = smov 8  }
  0x28   : > { %10683 = dma.hbm_to_vmem [thread:$0]  (!%p10932_p11), %s14857_s1, 32768, %s10925_s19, [#allocation6], %s10862_s4, %s10862_s4, %s10863_s5  }
  0x29   : > { %p24_p2 = scmp.eq.s32.totalorder %s23_s23, 0  ;;  %p33_p1 = scmp.ne.s32.totalorder %s10855_s11, %s10851_s10 }
  0x2a   : > { %p34_p4 = scmp.eq.s32.totalorder %s10859_s12, 0  ;;  %p10693_p6 = scmp.lt.s32.totalorder %s10859_s12, 2 }
  0x2b   : > { %s10968_s8 = scalar_select %p24_p2, %s10855_s11, %s26_s22  }
  0x2c   : > { %p35_p8 = por %p34_p4, %p33_p1  ;;  %p15260_p10 = scmp.eq.s32.totalorder %s10902_s13, 1 }
  0x2d   : > { %s123_s18 = sand.u32 1, %s10855_s11   ;;  %s7455_s24 = sshll.u32 %s10859_s12, 11 }
  0x2e   : > { %p10972_p12 = por %p15260_p10, %p33_p1  ;;  %s7444_s25 = sshll.u32 %s123_s18, 7 }
  0x2f   : > { %s10981_s27 = scalar_lea.hbm %s14856_s0, %s7455_s24  ;;  %s127_s19 = scalar_lea.vmem [#allocation2], %s7444_s25 }
  0x30   : > { %s135_s22 = sshll.u32 %s127_s19, 4  ;;  %p10983_p11 = pnand %p10693_p6, %p35_p8  ;;  %s10987_s22 = int_to_ptr.vmem [resolvable:$true] %s135_s22 }
  0x31   : > { %s124_s28 = scalar_lea.sflag [#allocation3], %s123_s18  ;;  %s10759_s29 = scalar_lea.hbm %s10981_s27, 2048 }
  0x32   : > { %p10760_p13 = scmp.ne.s32.totalorder %s10981_s27, %s10759_s29  ;;  %p10761_p0 = pneg %p10983_p11 }
  0x33   : > { %s10764_s4 = scalar_lea.hbm %s14856_s0, 4096  ;;  %p10765_p7 = scmp.lt.u32.totalorder %s10981_s27, %s14856_s0 }
  0x34   : > { %p10762_p3 = pnand %p10761_p0, %p10760_p13  ;;  %p10766_p9 = scmp.lt.u32.totalorder %s10764_s4, %s10759_s29 }
  0x35   : > { %p10768_p1 = scmp.lt.u32.totalorder %s10759_s29, %s10981_s27 }
  0x36   : > { %p10763_p5 = pneg %p10762_p3  ;;  %p10767_p2 = por %p10766_p9, %p10765_p7 }
  0x38   : > { %p10769_p4 = por %p10768_p1, %p10767_p2 }
  0x3a   : > { %p10770_p6 = pnand %p10769_p4, %p10763_p5 }
  0x3c   : > { %10773 = shalt.err (!%p10770_p6)
}
  0x3d   : > { %s10774_s7 = scalar_lea.vmem %s10987_s22, 2048  ;;  %s10864_s18 = smov [#allocation2]  }
  0x3e   : > { %p10775_p8 = scmp.ne.s32.totalorder %s10987_s22, %s10774_s7  ;;  %s10779_s24 = sshll.u32 %s10864_s18, 4  ;;  %s10780_s24 = int_to_ptr.vmem [resolvable:$false] %s10779_s24 }
  0x3f   : > { %s10781_s25 = scalar_lea.vmem %s10780_s24, 4096  ;;  %p10782_p3 = scmp.lt.s32.totalorder %s10987_s22, %s10780_s24 }
  0x40   : > { %p10777_p10 = pnand %p10775_p8, %p10761_p0  ;;  %p10783_p7 = scmp.lt.s32.totalorder %s10781_s25, %s10774_s7 }
  0x42   : > { %p10778_p13 = pneg %p10777_p10  ;;  %p10784_p9 = por %p10783_p7, %p10782_p3 }
  0x44   : > { %p10785_p2 = pnand %p10784_p9, %p10778_p13 }
  0x46   : > { %10788 = shalt.err (!%p10785_p2)
}
  0x47   : > { %10687 = dma.hbm_to_vmem [thread:$0]  (!%p10983_p11), %s10981_s27, 2048, %s10987_s22, %s124_s28  }
  0x48   : > { %p15263_p5 = scmp.ne.s32.totalorder %s15258_s17, 0 }
  0x4a   : > { %144 = sbr.rel (%p15263_p5) target bundleno = 1120 (0x460), region = 28 }
  0x51   : > { %s11017_s20 = sand.u32 1, %s10851_s10   ;;  %p15264_p0 = scmp.ne.s32.totalorder %s15256_s15, 0 }
  0x52   : > { %s7448_s26 = sshll.u32 %s11017_s20, 7  ;;  %s147_s19 = scalar_lea.sflag [#allocation3], %s11017_s20 }
  0x53   : > { %s11021_s29 = scalar_lea.vmem [#allocation2], %s7448_s26 }
  0x54   : > { %10834 = dma.done.wait (%p15264_p0), %s147_s19, 2048  }
  0x55   : > { %10836 = vsyncadd (%p15264_p0), %s147_s19, 4294965248  ;;  %p15265_p11 = scmp.eq.s32.totalorder %s10902_s13, 0 }
  0x57   : > { %10838 = dma.done.wait (%p15265_p11), [#allocation6], 32768   ;;  %p15266_p1 = pmov %p15265_p11 }
  0x58   : > { %v207_v0 = vld [vmem:[#allocation5 + $0x80] sm:$0xff]  ;;  %v208_v1 = vld [vmem:[#allocation5 + $0x88] sm:$0xff]  ;;  %v209_v7 = vld [vmem:[#allocation5 + $0x90] sm:$0xff]  ;;  %s7450_s15 = sshll.u32 %s11017_s20, 3  ;;  %s7452_s17 = sshll.u32 %s10902_s13, 7 }
  0x59   : > { %10840 = vsyncadd (%p15266_p1), [#allocation6], 4294934528  ;;  %v191_v2 = vld [vmem:[#allocation5] sm:$0xff]  ;;  %v496_v3 = vand.u32 4294901760, %v207_v0  ;;  %v499_v4 = vand.u32 4294901760, %v208_v1  ;;  %v192_v5 = vld [vmem:[#allocation5 + $0x8] sm:$0xff]  ;;  %s14812_s30 = scalar_lea.hbm %s14858_s2, %s7452_s17 }
  0x5a   : > { %v448_v6 = vand.u32 4294901760, %v191_v2  ;;  %v210_v8 = vld [vmem:[#allocation5 + $0x98] sm:$0xff]  ;;  %v451_v9 = vand.u32 4294901760, %v192_v5  ;;  %v502_v10 = vand.u32 4294901760, %v209_v7  ;;  %v193_v12 = vld [vmem:[#allocation5 + $0x10] sm:$0xff]  ;;  %v211_v18 = vld [vmem:[#allocation5 + $0xa0] sm:$0xff] }
  0x5b   : > { %v505_v11 = vand.u32 4294901760, %v210_v8  ;;  %v194_v13 = vld [vmem:[#allocation5 + $0x18] sm:$0xff]  ;;  %v11031_v14 = vpack.c.bf16 %v499_v4, %v496_v3  ;;  %v454_v16 = vand.u32 4294901760, %v193_v12  ;;  %v212_v19 = vld [vmem:[#allocation5 + $0xa8] sm:$0xff]  ;;  %v195_v23 = vld [vmem:[#allocation5 + $0x20] sm:$0xff]  ;;  %v508_v29 = vand.u32 4294901760, %v211_v18 }
  0x5c   : > { %v11033_v15 = vsub.f32 %v191_v2, %v448_v6  ;;  %v457_v17 = vand.u32 4294901760, %v194_v13  ;;  %v11035_v20 = vpack.c.bf16 %v451_v9, %v448_v6  ;;  %v11037_v21 = vsub.f32 %v192_v5, %v451_v9  ;;  %v196_v24 = vld [vmem:[#allocation5 + $0x28] sm:$0xff]  ;;  %v213_v37 = vld [vmem:[#allocation5 + $0xb0] sm:$0xff]  ;;  %v214_v42 = vld [vmem:[#allocation5 + $0xb8] sm:$0xff]  ;;  %s174_s27 = scalar_lea.vmem [#allocation7], %s7450_s15  ;;  %s7347_s3 = scalar_lea.sflag [#allocation4], %s11017_s20 }
  0x5d   : > { %v11039_v22 = vpack.c.bf16 %v505_v11, %v502_v10  ;;  %9137 = vmatprep.subr.bf16.mxu0 %v11031_v14  ;;  %v11042_v25 = vsub.f32 %v209_v7, %v502_v10  ;;  %v11044_v26 = vsub.f32 %v210_v8, %v505_v11  ;;  %v11048_v28 = vsub.f32 %v193_v12, %v454_v16  ;;  %v197_v55 = vld [vmem:[#allocation5 + $0x30] sm:$0xff]  ;;  %v198_v56 = vld [vmem:[#allocation5 + $0x38] sm:$0xff]  ;;  %v215_v5 = vld [vmem:[#allocation5 + $0xc0] sm:$0xff]  ;;  %s7360_s22 = sshll.u32 %s174_s27, 4  ;;  %s10865_s13 = smov [#allocation7]   ;;  %s14814_s22 = int_to_ptr.vmem [resolvable:$true] %s7360_s22 }
  0x5e   : > { %v11046_v27 = vpack.c.bf16 %v457_v17, %v454_v16  ;;  %9139 = vmatpush3.bf16.msra.mxu0 %v11035_v20  ;;  %v511_v30 = vand.u32 4294901760, %v212_v19  ;;  %v11051_v31 = vsub.f32 %v207_v0, %v496_v3  ;;  %v11053_v32 = vsub.f32 %v208_v1, %v499_v4  ;;  %v216_v6 = vld [vmem:[#allocation5 + $0xc8] sm:$0xff]  ;;  %v199_v11 = vld [vmem:[#allocation5 + $0x40] sm:$0xff]  ;;  %s10789_s4 = scalar_lea.vmem %s14814_s22, 128  ;;  %s10793_s5 = sshll.u32 %s10865_s13, 4  ;;  %s10794_s5 = int_to_ptr.vmem [resolvable:$false] %s10793_s5 }
  0x5f   : > { %9141 = vmatprep.subr.bf16.mxu0 %v11039_v22  ;;  %v460_v33 = vand.u32 4294901760, %v195_v23  ;;  %v463_v34 = vand.u32 4294901760, %v196_v24  ;;  %v14878_v35 = vand.u32 4294901760, %v11033_v15  ;;  %v14876_v36 = vand.u32 4294901760, %v11037_v21  ;;  %p10790_p4 = scmp.ne.s32.totalorder %s14814_s22, %s10789_s4  ;;  %s10795_s6 = scalar_lea.vmem %s10794_s5, 256 }
  0x60   : > { %v11058_v38 = vsub.f32 %v194_v13, %v457_v17  ;;  %v11060_v39 = vpack.c.bf16 %v511_v30, %v508_v29  ;;  %v11062_v40 = vsub.f32 %v211_v18, %v508_v29  ;;  %v14881_v41 = vand.u32 4294901760, %v11051_v31  ;;  %v200_v29 = vld [vmem:[#allocation5 + $0x48] sm:$0xff]  ;;  %p10796_p10 = scmp.lt.s32.totalorder %s14814_s22, %s10794_s5  ;;  %p10797_p13 = scmp.lt.s32.totalorder %s10795_s6, %s10789_s4 }
  0x61   : > { %v11065_v43 = vsub.f32 %v212_v19, %v511_v30  ;;  %v14880_v44 = vand.u32 4294901760, %v11053_v32  ;;  %v11068_v45 = vpack.c.bf16 %v463_v34, %v460_v33  ;;  %v11070_v46 = vsub.f32 %v195_v23, %v460_v33  ;;  %p10791_p6 = pnand %p10790_p4, %p10972_p12 }
  0x62   : > { %9143 = vmatpush3.bf16.msra.mxu0 %v11046_v27  ;;  %v675_v47 = vsub.f32 %v11051_v31, %v14881_v41  ;;  %v563_v48 = vsub.f32 %v11033_v15, %v14878_v35  ;;  %v570_v49 = vsub.f32 %v11037_v21, %v14876_v36  ;;  %v514_v50 = vand.u32 4294901760, %v213_v37  ;;  %v176_v41 = vld [vmem:[%s11021_s29 + $0x8] sm:$0xff]  ;;  %p10798_p3 = por %p10797_p13, %p10796_p10 }
  0x63   : > { %9145 = vmatprep.subr.bf16.mxu0 %v11060_v39  ;;  %v682_v51 = vsub.f32 %v11053_v32, %v14880_v44  ;;  %v517_v52 = vand.u32 4294901760, %v214_v42  ;;  %v14874_v53 = vand.u32 4294901760, %v11042_v25  ;;  %v14872_v54 = vand.u32 4294901760, %v11044_v26  ;;  %p10792_p8 = pneg %p10791_p6 }
  0x64   : > { %v676_v57 = vand.u32 4294901760, %v675_v47  ;;  %v11088_v58 = vsub.f32 %v196_v24, %v463_v34  ;;  %v564_v59 = vand.u32 4294901760, %v563_v48  ;;  %v571_v60 = vand.u32 4294901760, %v570_v49 }
  0x65   : > { %v683_v61 = vand.u32 4294901760, %v682_v51  ;;  %v11090_v62 = vpack.c.bf16 %v517_v52, %v514_v50  ;;  %v11092_v63 = vsub.f32 %v213_v37, %v514_v50  ;;  %v689_v0 = vsub.f32 %v11042_v25, %v14874_v53  ;;  %p10799_p7 = pnand %p10798_p3, %p10792_p8 }
  0x66   : > { %9147 = vmatpush3.bf16.msra.mxu0 %v11068_v45  ;;  %v9170_v1 = vpack.c.bf16 %v571_v60, %v564_v59  ;;  %v696_v2 = vsub.f32 %v11044_v26, %v14872_v54  ;;  %v466_v3 = vand.u32 4294901760, %v197_v55  ;;  %v469_v4 = vand.u32 4294901760, %v198_v56  ;;  %v218_v59 = vld [vmem:[#allocation5 + $0xd8] sm:$0xff] }
  0x67   : > { %v9168_v7 = vpack.c.bf16 %v683_v61, %v676_v57  ;;  %9149 = vmatprep.subr.bf16.mxu0 %v11090_v62  ;;  %v690_v8 = vand.u32 4294901760, %v689_v0  ;;  %v14871_v9 = vand.u32 4294901760, %v11048_v28  ;;  %v14869_v10 = vand.u32 4294901760, %v11058_v38  ;;  %v217_v57 = vld [vmem:[#allocation5 + $0xd0] sm:$0xff]  ;;  %v222_v54 = vld [vmem:[#allocation5 + $0xf8] sm:$0xff] }
  0x68   : > { %v11104_v12 = vsub.f32 %v214_v42, %v517_v52  ;;  %v697_v13 = vand.u32 4294901760, %v696_v2  ;;  %v11106_v16 = vpack.c.bf16 %v469_v4, %v466_v3  ;;  %v11108_v17 = vsub.f32 %v197_v55, %v466_v3 }
  0x69   : > { %9169 = vmatprep.subr.bf16.mxu1 %v9168_v7  ;;  %v577_v18 = vsub.f32 %v11048_v28, %v14871_v9  ;;  %v584_v19 = vsub.f32 %v11058_v38, %v14869_v10  ;;  %v520_v23 = vand.u32 4294901760, %v215_v5  ;;  %v523_v24 = vand.u32 4294901760, %v216_v6  ;;  %v221_v9 = vld [vmem:[#allocation5 + $0xf0] sm:$0xff] }
  0x6a   : > { %9171 = vmatpush3.bf16.msra.mxu1 %v9170_v1  ;;  %v9172_v30 = vpack.c.bf16 %v697_v13, %v690_v8  ;;  %9151 = vmatpush3.bf16.msra.mxu0 %v11106_v16  ;;  %v14867_v33 = vand.u32 4294901760, %v11062_v40  ;;  %v14866_v34 = vand.u32 4294901760, %v11065_v43  ;;  %v472_v37 = vand.u32 4294901760, %v199_v11  ;;  %v201_v1 = vld [vmem:[#allocation5 + $0x50] sm:$0xff] }
  0x6b   : > { %v11119_v42 = vsub.f32 %v198_v56, %v469_v4  ;;  %v578_v47 = vand.u32 4294901760, %v577_v18  ;;  %v585_v48 = vand.u32 4294901760, %v584_v19  ;;  %v11121_v49 = vpack.c.bf16 %v523_v24, %v520_v23  ;;  %v202_v18 = vld [vmem:[#allocation5 + $0x58] sm:$0xff] }
  0x6c   : > { %9173 = vmatprep.subr.bf16.mxu1 %v9172_v30  ;;  %v11123_v50 = vsub.f32 %v215_v5, %v520_v23  ;;  %v703_v51 = vsub.f32 %v11062_v40, %v14867_v33  ;;  %v710_v52 = vsub.f32 %v11065_v43, %v14866_v34  ;;  %v475_v55 = vand.u32 4294901760, %v200_v29 }
  0x6d   : > { %v9174_v56 = vpack.c.bf16 %v585_v48, %v578_v47  ;;  %9153 = vmatprep.subr.bf16.mxu0 %v11121_v49  ;;  %v11132_v60 = vsub.f32 %v216_v6, %v523_v24  ;;  %v14864_v61 = vand.u32 4294901760, %v11070_v46  ;;  %v14862_v0 = vand.u32 4294901760, %v11088_v58 }
  0x6e   : > { %v704_v2 = vand.u32 4294901760, %v703_v51  ;;  %v711_v3 = vand.u32 4294901760, %v710_v52  ;;  %v11136_v4 = vpack.c.bf16 %v475_v55, %v472_v37  ;;  %v11138_v5 = vsub.f32 %v199_v11, %v472_v37 }
  0x6f   : > { %9175 = vmatpush3.bf16.msra.mxu1 %v9174_v56  ;;  %v591_v7 = vsub.f32 %v11070_v46, %v14864_v61  ;;  %v598_v6 = vsub.f32 %v11088_v58, %v14862_v0  ;;  %v526_v8 = vand.u32 4294901760, %v217_v57  ;;  %v529_v13 = vand.u32 4294901760, %v218_v59  ;;  %v220_v0 = vld [vmem:[#allocation5 + $0xe8] sm:$0xff] }
  0x70   : > { %v9176_v19 = vpack.c.bf16 %v711_v3, %v704_v2  ;;  %9155 = vmatpush3.bf16.msra.mxu0 %v11136_v4  ;;  %v14863_v23 = vand.u32 4294901760, %v11092_v63  ;;  %v14865_v11 = vand.u32 4294901760, %v11104_v12  ;;  %v478_v24 = vand.u32 4294901760, %v201_v1  ;;  %v219_v3 = vld [vmem:[#allocation5 + $0xe0] sm:$0xff] }
  0x71   : > { %v11149_v30 = vsub.f32 %v200_v29, %v475_v55  ;;  %v592_v37 = vand.u32 4294901760, %v591_v7  ;;  %v599_v47 = vand.u32 4294901760, %v598_v6  ;;  %v11151_v48 = vpack.c.bf16 %v529_v13, %v526_v8  ;;  %v203_v6 = vld [vmem:[#allocation5 + $0x60] sm:$0xff] }
  0x72   : > { %9177 = vmatprep.subr.bf16.mxu1 %v9176_v19  ;;  %v11153_v51 = vsub.f32 %v217_v57, %v526_v8  ;;  %v717_v52 = vsub.f32 %v11092_v63, %v14863_v23  ;;  %v724_v56 = vsub.f32 %v11104_v12, %v14865_v11  ;;  %v481_v2 = vand.u32 4294901760, %v202_v18  ;;  %v204_v11 = vld [vmem:[#allocation5 + $0x68] sm:$0xff] }
  0x73   : > { %v9178_v29 = vpack.c.bf16 %v599_v47, %v592_v37  ;;  %9157 = vmatprep.subr.bf16.mxu0 %v11151_v48  ;;  %v11162_v55 = vsub.f32 %v218_v59, %v529_v13  ;;  %v14868_v7 = vand.u32 4294901760, %v11108_v17  ;;  %v14870_v57 = vand.u32 4294901760, %v11119_v42 }
  0x74   : > { %v718_v8 = vand.u32 4294901760, %v717_v52  ;;  %v725_v19 = vand.u32 4294901760, %v724_v56  ;;  %v11166_v23 = vpack.c.bf16 %v481_v2, %v478_v24  ;;  %v11168_v61 = vsub.f32 %v201_v1, %v478_v24 }
  0x75   : > { %9179 = vmatpush3.bf16.msra.mxu1 %v9178_v29  ;;  %v605_v37 = vsub.f32 %v11108_v17, %v14868_v7  ;;  %v612_v59 = vsub.f32 %v11119_v42, %v14870_v57  ;;  %v532_v13 = vand.u32 4294901760, %v219_v3  ;;  %v535_v47 = vand.u32 4294901760, %v220_v0 }
  0x76   : > { %15267 = vst [vmem:[#allocation11_spill] sm:$0xff] %v11166_v23  ;;  %v9180_v34 = vpack.c.bf16 %v725_v19, %v718_v8  ;;  %9159 = vmatpush3.bf16.msra.mxu0 %v11166_v23  ;;  %v14873_v52 = vand.u32 4294901760, %v11123_v50  ;;  %v14875_v1 = vand.u32 4294901760, %v11132_v60  ;;  %v484_v24 = vand.u32 4294901760, %v203_v6 }
  0x77   : > { %v11179_v56 = vsub.f32 %v202_v18, %v481_v2  ;;  %v606_v29 = vand.u32 4294901760, %v605_v37  ;;  %v613_v33 = vand.u32 4294901760, %v612_v59  ;;  %v11181_v7 = vpack.c.bf16 %v535_v47, %v532_v13  ;;  %v205_v37 = vld [vmem:[#allocation5 + $0x70] sm:$0xff] }
  0x78   : > { %9181 = vmatprep.subr.bf16.mxu1 %v9180_v34  ;;  %v11183_v10 = vsub.f32 %v219_v3, %v532_v13  ;;  %v731_v8 = vsub.f32 %v11123_v50, %v14873_v52  ;;  %v738_v19 = vsub.f32 %v11132_v60, %v14875_v1  ;;  %v487_v57 = vand.u32 4294901760, %v204_v11  ;;  %v206_v1 = vld [vmem:[#allocation5 + $0x78] sm:$0xff] }
  0x79   : > { %15268 = vst [vmem:[#allocation12_spill] sm:$0xff] %v11181_v7  ;;  %v9182_v18 = vpack.c.bf16 %v613_v33, %v606_v29  ;;  %9161 = vmatprep.subr.bf16.mxu0 %v11181_v7  ;;  %v11192_v2 = vsub.f32 %v220_v0, %v535_v47  ;;  %v14877_v34 = vand.u32 4294901760, %v11138_v5  ;;  %v14879_v3 = vand.u32 4294901760, %v11149_v30 }
  0x7a   : > { %v732_v59 = vand.u32 4294901760, %v731_v8  ;;  %v739_v13 = vand.u32 4294901760, %v738_v19  ;;  %v11196_v52 = vpack.c.bf16 %v487_v57, %v484_v24  ;;  %v11198_v53 = vsub.f32 %v203_v6, %v484_v24 }
  0x7b   : > { %9183 = vmatpush3.bf16.msra.mxu1 %v9182_v18  ;;  %v619_v33 = vsub.f32 %v11138_v5, %v14877_v34  ;;  %v626_v0 = vsub.f32 %v11149_v30, %v14879_v3  ;;  %v538_v47 = vand.u32 4294901760, %v221_v9  ;;  %v541_v29 = vand.u32 4294901760, %v222_v54 }
  0x7c   : > { %15269 = vst [vmem:[#allocation13_spill] sm:$0xff] %v11196_v52  ;;  %v9184_v36 = vpack.c.bf16 %v739_v13, %v732_v59  ;;  %9163 = vmatpush3.bf16.msra.mxu0 %v11196_v52  ;;  %v14884_v8 = vand.u32 4294901760, %v11153_v51  ;;  %v14885_v6 = vand.u32 4294901760, %v11162_v55  ;;  %v490_v24 = vand.u32 4294901760, %v205_v37 }
  0x7d   : > { %v11209_v19 = vsub.f32 %v204_v11, %v487_v57  ;;  %v620_v18 = vand.u32 4294901760, %v619_v33  ;;  %v627_v34 = vand.u32 4294901760, %v626_v0  ;;  %v11211_v35 = vpack.c.bf16 %v541_v29, %v538_v47 }
  0x7e   : > { %9185 = vmatprep.subr.bf16.mxu1 %v9184_v36  ;;  %v11213_v3 = vsub.f32 %v221_v9, %v538_v47  ;;  %v745_v59 = vsub.f32 %v11153_v51, %v14884_v8  ;;  %v752_v13 = vsub.f32 %v11162_v55, %v14885_v6  ;;  %v493_v44 = vand.u32 4294901760, %v206_v1  ;;  %v175_v9 = vld [vmem:[%s11021_s29] sm:$0xff] }
  0x7f   : > { %15270 = vst [vmem:[#allocation14_spill] sm:$0xff] %v11211_v35  ;;  %v9186_v52 = vpack.c.bf16 %v627_v34, %v620_v18  ;;  %9165 = vmatprep.subr.bf16.mxu0 %v11211_v35  ;;  %v11223_v11 = vsub.f32 %v222_v54, %v541_v29  ;;  %v14886_v57 = vand.u32 4294901760, %v11168_v61  ;;  %v14887_v36 = vand.u32 4294901760, %v11179_v56 }
  0x80   : > { %v746_v33 = vand.u32 4294901760, %v745_v59  ;;  %v753_v0 = vand.u32 4294901760, %v752_v13  ;;  %v11228_v47 = vpack.c.bf16 %v493_v44, %v490_v24  ;;  %v11230_v8 = vsub.f32 %v205_v37, %v490_v24 }
  0x81   : > { %9187 = vmatpush3.bf16.msra.mxu1 %v9186_v52  ;;  %v633_v34 = vsub.f32 %v11168_v61, %v14886_v57  ;;  %v640_v54 = vsub.f32 %v11179_v56, %v14887_v36  ;;  %v11238_v29 = vand.u32 4294901760, %v176_v41  ;;  %v14890_v18 = vand.u32 4294901760, %v11183_v10 }
  0x82   : > { %15271 = vst [vmem:[#allocation15_spill] sm:$0xff] %v11228_v47  ;;  %v9188_v6 = vpack.c.bf16 %v753_v0, %v746_v33  ;;  %9167 = vmatpush3.bf16.msra.mxu0 %v11228_v47  ;;  %v14896_v59 = vand.u32 4294901760, %v11192_v2  ;;  %v9200_v52 = vpack.c.bf16 %v11053_v32, %v11051_v31  ;;  %v11245_v37 = vand.u32 4294901760, %v175_v9 }
  0x83   : > { %15272 = vst [vmem:[#allocation16_spill] sm:$0xff] %v11238_v29  ;;  %v634_v24 = vand.u32 4294901760, %v633_v34  ;;  %v641_v13 = vand.u32 4294901760, %v640_v54  ;;  %v11248_v57 = vsub.f32 %v176_v41, %v11238_v29  ;;  %v759_v36 = vsub.f32 %v11183_v10, %v14890_v18  ;;  %784 = vmatprep.mubr.f32.mxu1 %v11238_v29 }
  0x84   : > { %9189 = vmatprep.subr.bf16.mxu1 %v9188_v6  ;;  %v766_v33 = vsub.f32 %v11192_v2, %v14896_v59  ;;  %9201 = vmatprep.subr.bf16.mxu0 %v9200_v52  ;;  %v11258_v0 = vsub.f32 %v175_v9, %v11245_v37  ;;  %v14895_v34 = vand.u32 4294901760, %v11198_v53  ;;  %v14897_v41 = vand.u32 4294901760, %v11209_v19 }
  0x85   : > { %v11262_v54 = vsub.f32 %v206_v1, %v493_v44  ;;  %v9190_v47 = vpack.c.bf16 %v641_v13, %v634_v24  ;;  %v14898_v18 = vand.u32 4294901760, %v11248_v57  ;;  %v760_v35 = vand.u32 4294901760, %v759_v36 }
  0x86   : > { %v767_v29 = vand.u32 4294901760, %v766_v33  ;;  %v551_v6 = vand.u32 4294901760, %v11258_v0  ;;  %v647_v52 = vsub.f32 %v11198_v53, %v14895_v34  ;;  %v654_v9 = vsub.f32 %v11209_v19, %v14897_v41 }
  0x87   : > { %9191 = vmatpush3.bf16.msra.mxu1 %v9190_v47  ;;  %v546_v44 = vsub.f32 %v11248_v57, %v14898_v18  ;;  %v9202_v1 = vpack.c.bf16 %v11037_v21, %v11033_v15  ;;  %v14903_v36 = vand.u32 4294901760, %v11213_v3  ;;  %v14906_v24 = vand.u32 4294901760, %v11223_v11 }
  0x88   : > { %v9192_v13 = vpack.c.bf16 %v767_v29, %v760_v35  ;;  %v552_v33 = vsub.f32 %v11258_v0, %v551_v6  ;;  %v648_v34 = vand.u32 4294901760, %v647_v52  ;;  %v655_v59 = vand.u32 4294901760, %v654_v9 }
  0x89   : > { %v547_v41 = vand.u32 4294901760, %v546_v44  ;;  %v773_v47 = vsub.f32 %v11213_v3, %v14903_v36  ;;  %v780_v18 = vsub.f32 %v11223_v11, %v14906_v24  ;;  %v14905_v7 = vand.u32 4294901760, %v11230_v8 }
  0x8a   : > { %9193 = vmatprep.subr.bf16.mxu1 %v9192_v13  ;;  %v553_v23 = vand.u32 4294901760, %v552_v33  ;;  %v9194_v35 = vpack.c.bf16 %v655_v59, %v648_v34  ;;  %v9204_v29 = vpack.c.bf16 %v11044_v26, %v11042_v25  ;;  %v14904_v52 = vand.u32 4294901760, %v11262_v54 }
  0x8b   : > { %548 = vmatprep.mubr.f32.mxu0 %v547_v41  ;;  %v774_v9 = vand.u32 4294901760, %v773_v47  ;;  %v781_v44 = vand.u32 4294901760, %v780_v18  ;;  %v661_v36 = vsub.f32 %v11230_v8, %v14905_v7  ;;  %v9206_v33 = vpack.c.bf16 %v11058_v38, %v11048_v28 }
  0x8c   : > { %554 = vmatmul.mubr.f32.vlgmr.msra.gmra.mrb[0].mxu0 %v553_v23  ;;  %9195 = vmatpush3.bf16.msra.mxu1 %v9194_v35  ;;  %v668_v13 = vsub.f32 %v11262_v54, %v14904_v52  ;;  %v9208_v41 = vpack.c.bf16 %v11065_v43, %v11062_v40  ;;  %v9210_v23 = vpack.c.bf16 %v11088_v58, %v11070_v46  ;;  %v15274_v35 = vand.u32 4294901760, %v11053_v32 }
  0x8d   : > { %9203 = vmatpush3.bf16.msra.mxu0 %v9202_v1  ;;  %v9196_v59 = vpack.c.bf16 %v781_v44, %v774_v9  ;;  %v662_v34 = vand.u32 4294901760, %v661_v36  ;;  %921 = vmatprep.mubr.f32.mxu0 %v11248_v57  ;;  %v9212_v47 = vpack.c.bf16 %v11104_v12, %v11092_v63  ;;  %v15273_v36 = vand.u32 4294901760, %v11051_v31 }
  0x8e   : > { %9205 = vmatprep.subr.bf16.mxu0 %v9204_v29  ;;  %v669_v18 = vand.u32 4294901760, %v668_v13  ;;  %v15275_v44 = vand.u32 4294901760, %v11033_v15  ;;  %v15276_v29 = vand.u32 4294901760, %v11037_v21  ;;  %v15277_v52 = vand.u32 4294901760, %v11042_v25 }
  0x8f   : > { %9197 = vmatprep.subr.bf16.mxu1 %v9196_v59  ;;  %v9264_v9 = vpack.c.bf16 %v15274_v35, %v15273_v36  ;;  %v15278_v59 = vand.u32 4294901760, %v11044_v26  ;;  %v15279_v24 = vand.u32 4294901760, %v11048_v28  ;;  %v15281_v31 = vand.u32 4294901760, %v11062_v40 }
  0x90   : > { %v9198_v1 = vpack.c.bf16 %v669_v18, %v662_v34  ;;  %v9266_v13 = vpack.c.bf16 %v15276_v29, %v15275_v44  ;;  %v15280_v34 = vand.u32 4294901760, %v11058_v38  ;;  %v15282_v32 = vand.u32 4294901760, %v11065_v43  ;;  %v15296_v29 = vld [vmem:[#allocation16_spill] sm:$0xff] }
  0x91   : > { %v9268_v7 = vpack.c.bf16 %v15278_v59, %v15277_v52  ;;  %9207 = vmatpush3.bf16.msra.mxu0 %v9206_v33  ;;  %v15283_v15 = vand.u32 4294901760, %v11070_v46  ;;  %v15284_v21 = vand.u32 4294901760, %v11088_v58  ;;  %v15285_v25 = vand.u32 4294901760, %v11092_v63  ;;  %v240_v59 = vld [vmem:[#allocation5 + $0x188] sm:$0xff] }
  0x92   : > { %v9270_v18 = vpack.c.bf16 %v15280_v34, %v15279_v24  ;;  %v9272_v36 = vpack.c.bf16 %v15282_v32, %v15281_v31  ;;  %v15286_v26 = vand.u32 4294901760, %v11104_v12  ;;  %9199 = vmatpush3.bf16.msra.mxu1 %v9198_v1  ;;  %9209 = vmatprep.subr.bf16.mxu0 %v9208_v41  ;;  %v15287_v28 = vand.u32 4294901760, %v11108_v17  ;;  %v223_v34 = vld [vmem:[#allocation5 + $0x100] sm:$0xff]  ;;  %v224_v31 = vld [vmem:[#allocation5 + $0x108] sm:$0xff] }
  0x93   : > { %v11331_v35 = vpack.c.bf16 %v15284_v21, %v15283_v15  ;;  %v15288_v38 = vand.u32 4294901760, %v11119_v42  ;;  %v15289_v43 = vand.u32 4294901760, %v11123_v50  ;;  %v15290_v46 = vand.u32 4294901760, %v11132_v60  ;;  %9233 = vmatprep.subr.bf16.mxu1 %v11031_v14  ;;  %v15297_v32 = vld [vmem:[#allocation13_spill] sm:$0xff]  ;;  %v15298_v15 = vld [vmem:[#allocation14_spill] sm:$0xff] }
  0x94   : > { %v11337_v52 = vpack.c.bf16 %v15286_v26, %v15285_v25  ;;  %v15291_v63 = vand.u32 4294901760, %v11138_v5  ;;  %v15292_v12 = vand.u32 4294901760, %v11149_v30  ;;  %v9214_v33 = vpack.c.bf16 %v11119_v42, %v11108_v17 }
  0x95   : > { %v11343_v40 = vpack.c.bf16 %v15288_v38, %v15287_v28  ;;  %v11349_v58 = vpack.c.bf16 %v15290_v46, %v15289_v43  ;;  %786 = vmatmul.mubr.f32.vlgmr.msra.gmra.mrb[0].mxu1 %v11245_v37  ;;  %9211 = vmatpush3.bf16.msra.mxu0 %v9210_v23  ;;  %v9216_v41 = vpack.c.bf16 %v11132_v60, %v11123_v50  ;;  %v15293_v1 = vand.u32 4294901760, %v11248_v57  ;;  %v15294_v57 = vld [vmem:[#allocation11_spill] sm:$0xff]  ;;  %v15295_v23 = vld [vmem:[#allocation12_spill] sm:$0xff] }
  0x96   : > { %v11355_v24 = vpack.c.bf16 %v15292_v12, %v15291_v63  ;;  %9235 = vmatpush3.bf16.msra.mxu1 %v11035_v20  ;;  %9213 = vmatprep.subr.bf16.mxu0 %v9212_v47  ;;  %v9218_v44 = vpack.c.bf16 %v11149_v30, %v11138_v5  ;;  %v9220_v17 = vpack.c.bf16 %v11162_v55, %v11153_v51  ;;  %v239_v47 = vld [vmem:[#allocation5 + $0x180] sm:$0xff]  ;;  %v1361_v25 = vand.u32 4294901760, %v240_v59  ;;  %v15299_v28 = vld [vmem:[#allocation15_spill] sm:$0xff]  ;;  %v226_v63 = vld [vmem:[#allocation5 + $0x118] sm:$0xff] }
  0x97   : > { %9237 = vmatprep.subr.bf16.mxu1 %v11039_v22  ;;  %1028 = vmatprep.mubr.f32.mxu1 %v15293_v1  ;;  %v9222_v42 = vpack.c.bf16 %v11179_v56, %v11168_v61  ;;  %v9224_v50 = vpack.c.bf16 %v11192_v2, %v11183_v10  ;;  %v9226_v60 = vpack.c.bf16 %v11209_v19, %v11198_v53  ;;  %v1358_v21 = vand.u32 4294901760, %v239_v47  ;;  %v241_v38 = vld [vmem:[#allocation5 + $0x190] sm:$0xff] }
  0x98   : > { %v9228_v5 = vpack.c.bf16 %v11223_v11, %v11213_v3  ;;  %v9230_v30 = vpack.c.bf16 %v11262_v54, %v11230_v8  ;;  %v1310_v26 = vand.u32 4294901760, %v223_v34  ;;  %v225_v46 = vld [vmem:[#allocation5 + $0x110] sm:$0xff]  ;;  %v11399_v12 = vsub.f32 %v240_v59, %v1361_v25 }
  0x99   : > { %9215 = vmatpush3.bf16.msra.mxu0 %v9214_v33  ;;  %v11397_v43 = vsub.f32 %v239_v47, %v1358_v21 }
  0x9a   : > { %9239 = vmatpush3.bf16.msra.mxu1 %v11046_v27  ;;  %9217 = vmatprep.subr.bf16.mxu0 %v9216_v41  ;;  %v1364_v41 = vand.u32 4294901760, %v241_v38  ;;  %v14916_v59 = vand.u32 4294901760, %v11399_v12 }
  0x9b   : > { %9241 = vmatprep.subr.bf16.mxu1 %v11060_v39 }
  0x9d   : > { %9219 = vmatpush3.bf16.msra.mxu0 %v9218_v44  ;;  %v15302_v44 = vand.u32 4294901760, %v11168_v61 }
  0x9e   : > { %9243 = vmatpush3.bf16.msra.mxu1 %v11068_v45  ;;  %9221 = vmatprep.subr.bf16.mxu0 %v9220_v17  ;;  %v15303_v17 = vand.u32 4294901760, %v11179_v56  ;;  %v15308_v56 = vand.u32 4294901760, %v11213_v3  ;;  %v227_v3 = vld [vmem:[#allocation5 + $0x120] sm:$0xff] }
  0x9f   : > { %9245 = vmatprep.subr.bf16.mxu1 %v11090_v62 }
  0xa1   : > { %9223 = vmatpush3.bf16.msra.mxu0 %v9222_v42  ;;  %v1319_v42 = vand.u32 4294901760, %v226_v63 }
  0xa2   : > { %9247 = vmatpush3.bf16.msra.mxu1 %v11106_v16  ;;  %9225 = vmatprep.subr.bf16.mxu0 %v9224_v50  ;;  %v243_v50 = vld [vmem:[#allocation5 + $0x1a0] sm:$0xff] }
  0xa3   : > { %9249 = vmatprep.subr.bf16.mxu1 %v11121_v49 }
  0xa5   : > { %9227 = vmatpush3.bf16.msra.mxu0 %v9226_v60  ;;  %v244_v60 = vld [vmem:[#allocation5 + $0x1a8] sm:$0xff] }
  0xa6   : > { %9251 = vmatpush3.bf16.msra.mxu1 %v11136_v4  ;;  %9229 = vmatprep.subr.bf16.mxu0 %v9228_v5 }
  0xa7   : > { %9253 = vmatprep.subr.bf16.mxu1 %v11151_v48 }
  0xa9   : > { %9231 = vmatpush3.bf16.msra.mxu0 %v9230_v30  ;;  %v15311_v30 = vand.u32 4294901760, %v11262_v54 }
  0xaa   : > { %9255 = vmatpush3.bf16.msra.mxu1 %v15294_v57  ;;  %9265 = vmatprep.subr.bf16.mxu0 %v9264_v9  ;;  %v1313_v9 = vand.u32 4294901760, %v224_v31 }
  0xab   : > { %9257 = vmatprep.subr.bf16.mxu1 %v15295_v23 }
  0xac   : > { %924 = vmatmul.mubr.f32.vlgmr.msra.gmra.mrb[2].mxu0 %v11258_v0  ;;  %v11403_v33 = vsub.f32 %v224_v31, %v1313_v9  ;;  %v9286_v0 = vpack.c.bf16 %v15303_v17, %v15302_v44  ;;  %v245_v17 = vld [vmem:[#allocation5 + $0x1b0] sm:$0xff] }
  0xad   : > { %9267 = vmatpush3.bf16.msra.mxu0 %v9266_v13  ;;  %1198 = vmatprep.mubr.f32.mxu0 %v15296_v29  ;;  %v242_v13 = vld [vmem:[#allocation5 + $0x198] sm:$0xff] }
  0xae   : > { %9259 = vmatpush3.bf16.msra.mxu1 %v15297_v32  ;;  %9269 = vmatprep.subr.bf16.mxu0 %v9268_v7  ;;  %v11401_v7 = vsub.f32 %v223_v34, %v1310_v26  ;;  %v1367_v1 = vand.u32 4294901760, %v242_v13  ;;  %v228_v34 = vld [vmem:[#allocation5 + $0x128] sm:$0xff]  ;;  %v14907_v31 = vand.u32 4294901760, %v11403_v33 }
  0xaf   : > { %9261 = vmatprep.subr.bf16.mxu1 %v15298_v15 }
  0xb0   : > { %v11454_v54 = vpack.c.bf16 %v1367_v1, %v1364_v41 }
  0xb1   : > { %9271 = vmatpush3.bf16.msra.mxu0 %v9270_v18  ;;  %v15300_v18 = vand.u32 4294901760, %v11153_v51 }
  0xb2   : > { %9263 = vmatpush3.bf16.msra.mxu1 %v15299_v28  ;;  %9273 = vmatprep.subr.bf16.mxu0 %v9272_v36  ;;  %v15301_v36 = vand.u32 4294901760, %v11162_v55  ;;  %v1316_v55 = vand.u32 4294901760, %v225_v46  ;;  %15313 = vst [vmem:[#allocation12_spill] sm:$0xff] %v11454_v54 }
  0xb3   : > { %9297 = vmatprep.subr.bf16.mxu1 %v11031_v14 }
  0xb4   : > { %v9284_v14 = vpack.c.bf16 %v15301_v36, %v15300_v18  ;;  %v1373_v18 = vand.u32 4294901760, %v244_v60  ;;  %v11462_v36 = vpack.c.bf16 %v1319_v42, %v1316_v55 }
  0xb5   : > { %1032 = vmatmul.mubr.f32.vlgmr.msra.gmra.mrb[2].mxu1 %v551_v6  ;;  %9275 = vmatpush3.bf16.msra.mxu0 %v11331_v35  ;;  %v15304_v6 = vand.u32 4294901760, %v11183_v10  ;;  %v15305_v35 = vand.u32 4294901760, %v11192_v2  ;;  %v15309_v10 = vand.u32 4294901760, %v11223_v11  ;;  %v15310_v2 = vand.u32 4294901760, %v11230_v8 }
  0xb6   : > { %9299 = vmatpush3.bf16.msra.mxu1 %v11035_v20  ;;  %9277 = vmatprep.subr.bf16.mxu0 %v11337_v52  ;;  %v15306_v20 = vand.u32 4294901760, %v11198_v53  ;;  %v15307_v52 = vand.u32 4294901760, %v11209_v19  ;;  %v178_v53 = vld [vmem:[%s11021_s29 + $0x18] sm:$0xff]  ;;  %v11446_v19 = vpack.c.bf16 %v1361_v25, %v1358_v21  ;;  %v14913_v11 = vand.u32 4294901760, %v11401_v7  ;;  %15314 = vst [vmem:[#allocation16_spill] sm:$0xff] %v11462_v36 }
  0xb7   : > { %v11422_v51 = vpack.c.bf16 %v15305_v35, %v15304_v6  ;;  %9301 = vmatprep.subr.bf16.mxu1 %v11039_v22  ;;  %v11435_v5 = vpack.c.bf16 %v15309_v10, %v15308_v56  ;;  %v11441_v47 = vpack.c.bf16 %v15311_v30, %v15310_v2  ;;  %1302 = vmatprep.mubr.f32.mxu1 %v15296_v29  ;;  %v14917_v22 = vand.u32 4294901760, %v11397_v43 }
  0xb8   : > { %v11429_v61 = vpack.c.bf16 %v15307_v52, %v15306_v20  ;;  %v11452_v8 = vpack.c.bf16 %v1313_v9, %v1310_v26  ;;  %v1370_v29 = vand.u32 4294901760, %v243_v50  ;;  %v11458_v21 = vsub.f32 %v241_v38, %v1364_v41  ;;  %v229_v52 = vld [vmem:[#allocation5 + $0x130] sm:$0xff] }
  0xb9   : > { %9279 = vmatpush3.bf16.msra.mxu0 %v11343_v40  ;;  %v11460_v25 = vsub.f32 %v242_v13, %v1367_v1  ;;  %v11464_v44 = vand.u32 4294901760, %v178_v53  ;;  %v11467_v40 = vsub.f32 %v225_v46, %v1316_v55  ;;  %v1537_v26 = vsub.f32 %v11397_v43, %v14917_v22  ;;  %v234_v22 = vld [vmem:[#allocation5 + $0x158] sm:$0xff] }
  0xba   : > { %15312 = vst [vmem:[#allocation11_spill] sm:$0xff] %v11452_v8  ;;  %9303 = vmatpush3.bf16.msra.mxu1 %v11046_v27  ;;  %9281 = vmatprep.subr.bf16.mxu0 %v11349_v58  ;;  %v1322_v9 = vand.u32 4294901760, %v227_v3  ;;  %v1325_v27 = vand.u32 4294901760, %v228_v34  ;;  %v246_v58 = vld [vmem:[#allocation5 + $0x1b8] sm:$0xff]  ;;  %v11472_v38 = vsub.f32 %v226_v63, %v1319_v42  ;;  %v1544_v13 = vsub.f32 %v11399_v12, %v14916_v59 }
  0xbb   : > { %15315 = vst [vmem:[#allocation13_spill] sm:$0xff] %v11464_v44  ;;  %9305 = vmatprep.subr.bf16.mxu1 %v11060_v39  ;;  %v1425_v39 = vsub.f32 %v11401_v7, %v14913_v11  ;;  %v1432_v46 = vsub.f32 %v11403_v33, %v14907_v31  ;;  %v11484_v41 = vpack.c.bf16 %v1373_v18, %v1370_v29  ;;  %v1376_v35 = vand.u32 4294901760, %v245_v17  ;;  %v247_v31 = vld [vmem:[#allocation5 + $0x1c0] sm:$0xff] }
  0xbc   : > { %v11486_v1 = vsub.f32 %v243_v50, %v1370_v29  ;;  %v11488_v63 = vsub.f32 %v244_v60, %v1373_v18  ;;  %v11491_v6 = vsub.f32 %v178_v53, %v11464_v44  ;;  %v1379_v55 = vand.u32 4294901760, %v246_v58 }
  0xbd   : > { %9283 = vmatpush3.bf16.msra.mxu0 %v11355_v24  ;;  %15316 = vst [vmem:[#allocation14_spill] sm:$0xff] %v11484_v41  ;;  %v14911_v42 = vand.u32 4294901760, %v11458_v21  ;;  %v14908_v20 = vand.u32 4294901760, %v11460_v25  ;;  %v230_v24 = vld [vmem:[#allocation5 + $0x138] sm:$0xff]  ;;  %v1538_v50 = vand.u32 4294901760, %v1537_v26  ;;  %v11497_v56 = vpack.c.bf16 %v1325_v27, %v1322_v9 }
  0xbe   : > { %9307 = vmatpush3.bf16.msra.mxu1 %v11068_v45  ;;  %9285 = vmatprep.subr.bf16.mxu0 %v9284_v14  ;;  %v11499_v60 = vsub.f32 %v227_v3, %v1322_v9  ;;  %v11501_v10 = vsub.f32 %v228_v34, %v1325_v27  ;;  %v1545_v2 = vand.u32 4294901760, %v1544_v13  ;;  %v1426_v45 = vand.u32 4294901760, %v1425_v39  ;;  %v248_v27 = vld [vmem:[#allocation5 + $0x1c8] sm:$0xff] }
  0xbf   : > { %9309 = vmatprep.subr.bf16.mxu1 %v11090_v62  ;;  %15317 = vst [vmem:[#allocation15_spill] sm:$0xff] %v11497_v56  ;;  %v1433_v14 = vand.u32 4294901760, %v1432_v46  ;;  %v14910_v30 = vand.u32 4294901760, %v11467_v40  ;;  %v1328_v53 = vand.u32 4294901760, %v229_v52  ;;  %v1331_v29 = vand.u32 4294901760, %v230_v24 }
  0xc0   : > { %v14909_v18 = vand.u32 4294901760, %v11472_v38  ;;  %v14920_v62 = vand.u32 4294901760, %v11491_v6  ;;  %v11508_v3 = vpack.c.bf16 %v1379_v55, %v1376_v35  ;;  %v1551_v34 = vsub.f32 %v11458_v21, %v14911_v42 }
  0xc1   : > { %9287 = vmatpush3.bf16.msra.mxu0 %v9286_v0  ;;  %v1558_v0 = vsub.f32 %v11460_v25, %v14908_v20  ;;  %v11517_v26 = vsub.f32 %v245_v17, %v1376_v35  ;;  %v11519_v9 = vsub.f32 %v246_v58, %v1379_v55  ;;  %v11523_v13 = vpack.c.bf16 %v1545_v2, %v1538_v50 }
  0xc2   : > { %9311 = vmatpush3.bf16.msra.mxu1 %v11106_v16  ;;  %9289 = vmatprep.subr.bf16.mxu0 %v11422_v51  ;;  %15318 = vst [vmem:[#allocation17_spill] sm:$0xff] %v11508_v3  ;;  %v14912_v16 = vand.u32 4294901760, %v11486_v1  ;;  %v14915_v51 = vand.u32 4294901760, %v11488_v63  ;;  %v11525_v39 = vpack.c.bf16 %v1433_v14, %v1426_v45  ;;  %v1439_v46 = vsub.f32 %v11467_v40, %v14910_v30 }
  0xc3   : > { %9313 = vmatprep.subr.bf16.mxu1 %v11121_v49  ;;  %v1382_v20 = vand.u32 4294901760, %v247_v31  ;;  %v11531_v49 = vpack.c.bf16 %v1331_v29, %v1328_v53  ;;  %v1446_v17 = vsub.f32 %v11472_v38, %v14909_v18  ;;  %v14914_v58 = vand.u32 4294901760, %v11499_v60 }
  0xc4   : > { %v1408_v35 = vsub.f32 %v11491_v6, %v14920_v62  ;;  %v1552_v55 = vand.u32 4294901760, %v1551_v34  ;;  %v1559_v50 = vand.u32 4294901760, %v1558_v0  ;;  %v1385_v2 = vand.u32 4294901760, %v248_v27  ;;  %v232_v0 = vld [vmem:[#allocation5 + $0x148] sm:$0xff] }
  0xc5   : > { %9291 = vmatpush3.bf16.msra.mxu0 %v11429_v61  ;;  %15319 = vst [vmem:[#allocation18_spill] sm:$0xff] %v11531_v49  ;;  %v231_v61 = vld [vmem:[#allocation5 + $0x140] sm:$0xff]  ;;  %v14919_v45 = vand.u32 4294901760, %v11501_v10  ;;  %v11544_v14 = vsub.f32 %v229_v52, %v1328_v53  ;;  %v11546_v18 = vsub.f32 %v230_v24, %v1331_v29  ;;  %v1565_v30 = vsub.f32 %v11486_v1, %v14912_v16  ;;  %v249_v29 = vld [vmem:[#allocation5 + $0x1d0] sm:$0xff]  ;;  %v250_v16 = vld [vmem:[#allocation5 + $0x1d8] sm:$0xff] }
  0xc6   : > { %9315 = vmatpush3.bf16.msra.mxu1 %v11136_v4  ;;  %9293 = vmatprep.subr.bf16.mxu0 %v11435_v5  ;;  %v1572_v4 = vsub.f32 %v11488_v63, %v14915_v51  ;;  %v1440_v5 = vand.u32 4294901760, %v1439_v46  ;;  %v11554_v34 = vsub.f32 %v247_v31, %v1382_v20  ;;  %v14918_v42 = vand.u32 4294901760, %v11517_v26 }
  0xc7   : > { %9317 = vmatprep.subr.bf16.mxu1 %v11151_v48  ;;  %v14921_v48 = vand.u32 4294901760, %v11519_v9  ;;  %v1447_v52 = vand.u32 4294901760, %v1446_v17  ;;  %v1334_v24 = vand.u32 4294901760, %v231_v61  ;;  %v1453_v53 = vsub.f32 %v11499_v60, %v14914_v58 }
  0xc8   : > { %v1409_v11 = vand.u32 4294901760, %v1408_v35  ;;  %v11564_v31 = vpack.c.bf16 %v1559_v50, %v1552_v55  ;;  %v11566_v46 = vpack.c.bf16 %v1385_v2, %v1382_v20  ;;  %v11572_v17 = vsub.f32 %v248_v27, %v1385_v2  ;;  %v233_v35 = vld [vmem:[#allocation5 + $0x150] sm:$0xff] }
  0xc9   : > { %9295 = vmatpush3.bf16.msra.mxu0 %v11441_v47  ;;  %v1460_v47 = vsub.f32 %v11501_v10, %v14919_v45  ;;  %v1566_v58 = vand.u32 4294901760, %v1565_v30  ;;  %v1573_v51 = vand.u32 4294901760, %v1572_v4  ;;  %v1337_v59 = vand.u32 4294901760, %v232_v0 }
  0xca   : > { %9319 = vmatpush3.bf16.msra.mxu1 %v15294_v57  ;;  %9329 = vmatprep.subr.bf16.mxu0 %v11446_v19  ;;  %15320 = vst [vmem:[#allocation19_spill] sm:$0xff] %v11566_v46  ;;  %v1388_v57 = vand.u32 4294901760, %v249_v29  ;;  %v1391_v55 = vand.u32 4294901760, %v250_v16  ;;  %v1579_v20 = vsub.f32 %v11517_v26, %v14918_v42  ;;  %v1586_v50 = vsub.f32 %v11519_v9, %v14921_v48  ;;  %v251_v48 = vld [vmem:[#allocation5 + $0x1e0] sm:$0xff] }
  0xcb   : > { %9321 = vmatprep.subr.bf16.mxu1 %v15295_v23  ;;  %v11582_v23 = vpack.c.bf16 %v1447_v52, %v1440_v5  ;;  %v11584_v30 = vsub.f32 %v231_v61, %v1334_v24  ;;  %v1454_v27 = vand.u32 4294901760, %v1453_v53  ;;  %v1461_v4 = vand.u32 4294901760, %v1460_v47  ;;  %v252_v53 = vld [vmem:[#allocation5 + $0x1e8] sm:$0xff] }
  0xcc   : > { %1200 = vmatmul.mubr.f32.vlgmr.msra.gmra.mrb[4].mxu0 %v11245_v37  ;;  %v1340_v42 = vand.u32 4294901760, %v233_v35  ;;  %v1343_v45 = vand.u32 4294901760, %v234_v22  ;;  %v14928_v62 = vand.u32 4294901760, %v11546_v18  ;;  %v11591_v5 = vpack.c.bf16 %v1573_v51, %v1566_v58 }
  0xcd   : > { %9331 = vmatpush3.bf16.msra.mxu0 %v11452_v8  ;;  %1410 = vmatprep.mubr.f32.mxu0 %v1409_v11  ;;  %v11593_v61 = vpack.c.bf16 %v1337_v59, %v1334_v24  ;;  %v11595_v52 = vsub.f32 %v232_v0, %v1337_v59  ;;  %v14926_v11 = vand.u32 4294901760, %v11554_v34  ;;  %v1580_v2 = vand.u32 4294901760, %v1579_v20  ;;  %v11601_v8 = vld [vmem:[#allocation5 + $0x160] sm:$0xff] }
  0xce   : > { %9323 = vmatpush3.bf16.msra.mxu1 %v15297_v32  ;;  %9333 = vmatprep.subr.bf16.mxu0 %v11454_v54  ;;  %v11598_v32 = vpack.c.bf16 %v1391_v55, %v1388_v57  ;;  %v1587_v47 = vand.u32 4294901760, %v1586_v50  ;;  %v14927_v54 = vand.u32 4294901760, %v11572_v17  ;;  %v11606_v51 = vsub.f32 %v250_v16, %v1391_v55  ;;  %v11628_v50 = vld [vmem:[#allocation5 + $0x168] sm:$0xff] }
  0xcf   : > { %9325 = vmatprep.subr.bf16.mxu1 %v15298_v15  ;;  %v11604_v15 = vsub.f32 %v249_v29, %v1388_v57  ;;  %v15324_v59 = vand.u32 4294901760, %v11544_v14  ;;  %v1394_v0 = vand.u32 4294901760, %v251_v48  ;;  %v11613_v24 = vpack.c.bf16 %v1461_v4, %v1454_v27 }
  0xd0   : > { %15321 = vst [vmem:[#allocation20_spill] sm:$0xff] %v11598_v32  ;;  %15323 = vst [vmem:[#allocation22_spill] sm:$0xff] %v11606_v51  ;;  %v11615_v20 = vpack.c.bf16 %v1343_v45, %v1340_v42  ;;  %v1474_v29 = vsub.f32 %v11546_v18, %v14928_v62  ;;  %v1397_v57 = vand.u32 4294901760, %v252_v53  ;;  %v11621_v16 = vsub.f32 %v233_v35, %v1340_v42 }
  0xd1   : > { %9335 = vmatpush3.bf16.msra.mxu0 %v11462_v36  ;;  %15322 = vst [vmem:[#allocation21_spill] sm:$0xff] %v11604_v15  ;;  %v1467_v58 = vsub.f32 %v11544_v14, %v15324_v59  ;;  %v11623_v55 = vsub.f32 %v234_v22, %v1343_v45  ;;  %v14929_v27 = vand.u32 4294901760, %v11601_v8  ;;  %v9372_v4 = vpack.c.bf16 %v1587_v47, %v1580_v2  ;;  %v11636_v22 = vld [vmem:[#allocation5 + $0x1f0] sm:$0xff]  ;;  %v11638_v45 = vld [vmem:[#allocation5 + $0x1f8] sm:$0xff] }
  0xd2   : > { %9327 = vmatpush3.bf16.msra.mxu1 %v15299_v28  ;;  %9337 = vmatprep.subr.bf16.mxu0 %v11484_v41  ;;  %v1593_v28 = vsub.f32 %v11554_v34, %v14926_v11  ;;  %v1600_v59 = vsub.f32 %v11572_v17, %v14927_v54  ;;  %v11642_v11 = vsub.f32 %v251_v48, %v1394_v0  ;;  %v177_v54 = vld [vmem:[%s11021_s29 + $0x10] sm:$0xff]  ;;  %v1475_v62 = vand.u32 4294901760, %v1474_v29 }
  0xd3   : > { %9361 = vmatprep.subr.bf16.mxu1 %v11523_v13  ;;  %v1468_v35 = vand.u32 4294901760, %v1467_v58  ;;  %v11649_v42 = vpack.c.bf16 %v1397_v57, %v1394_v0  ;;  %v11651_v13 = vsub.f32 %v252_v53, %v1397_v57  ;;  %v11658_v58 = vsub.f32 %v11601_v8, %v14929_v27  ;;  %v11662_v2 = vld [vmem:[#allocation5 + $0x170] sm:$0xff]  ;;  %v11664_v0 = vld [vmem:[#allocation5 + $0x178] sm:$0xff] }
  0xd4   : > { %v1594_v48 = vand.u32 4294901760, %v1593_v28  ;;  %v1400_v47 = vand.u32 4294901760, %v11636_v22  ;;  %v1601_v53 = vand.u32 4294901760, %v1600_v59  ;;  %v15325_v29 = vand.u32 4294901760, %v11584_v30 }
  0xd5   : > { %1304 = vmatmul.mubr.f32.vlgmr.msra.gmra.mrb[4].mxu1 %v11245_v37  ;;  %9339 = vmatpush3.bf16.msra.mxu0 %v11497_v56  ;;  %v1349_v37 = vand.u32 4294901760, %v11628_v50  ;;  %v15326_v57 = vand.u32 4294901760, %v11595_v52  ;;  %v11673_v27 = vand.u32 4294901760, %v177_v54  ;;  %v15328_v41 = vand.u32 4294901760, %v11606_v51 }
  0xd6   : > { %9363 = vmatpush3.bf16.msra.mxu1 %v11525_v39  ;;  %9341 = vmatprep.subr.bf16.mxu0 %v11508_v3  ;;  %v1403_v39 = vand.u32 4294901760, %v11638_v45  ;;  %v15327_v3 = vand.u32 4294901760, %v11604_v15 }
  0xd7   : > { %9365 = vmatprep.subr.bf16.mxu1 %v11564_v31  ;;  %1646 = vmatprep.mubr.f32.mxu1 %v11464_v44  ;;  %v1481_v31 = vsub.f32 %v11584_v30, %v15325_v29  ;;  %v1488_v28 = vsub.f32 %v11595_v52, %v15326_v57  ;;  %v1614_v59 = vsub.f32 %v11606_v51, %v15328_v41  ;;  %v14950_v29 = vand.u32 4294901760, %v11651_v13 }
  0xd8   : > { %v1607_v56 = vsub.f32 %v11604_v15, %v15327_v3  ;;  %v9374_v57 = vpack.c.bf16 %v1475_v62, %v1468_v35  ;;  %v11687_v36 = vsub.f32 %v11628_v50, %v1349_v37  ;;  %v1355_v3 = vand.u32 4294901760, %v11664_v0 }
  0xd9   : > { %9343 = vmatpush3.bf16.msra.mxu0 %v11531_v49  ;;  %v1352_v49 = vand.u32 4294901760, %v11662_v2  ;;  %v11693_v41 = vsub.f32 %v11636_v22, %v1400_v47  ;;  %v11696_v44 = vsub.f32 %v11638_v45, %v1403_v39  ;;  %v9376_v62 = vpack.c.bf16 %v1601_v53, %v1594_v48 }
  0xda   : > { %9367 = vmatpush3.bf16.msra.mxu1 %v11582_v23  ;;  %9345 = vmatprep.subr.bf16.mxu0 %v11566_v46  ;;  %v1482_v35 = vand.u32 4294901760, %v1481_v31  ;;  %v1489_v50 = vand.u32 4294901760, %v1488_v28  ;;  %v11701_v46 = vsub.f32 %v177_v54, %v11673_v27  ;;  %v1608_v51 = vand.u32 4294901760, %v1607_v56 }
  0xdb   : > { %9369 = vmatprep.subr.bf16.mxu1 %v11591_v5  ;;  %v1615_v5 = vand.u32 4294901760, %v1614_v59  ;;  %v15329_v22 = vand.u32 4294901760, %v11621_v16  ;;  %v15330_v45 = vand.u32 4294901760, %v11623_v55  ;;  %v11713_v48 = vsub.f32 %v11662_v2, %v1352_v49 }
  0xdc   : > { %v11716_v54 = vsub.f32 %v11664_v0, %v1355_v3  ;;  %v15331_v31 = vand.u32 4294901760, %v11642_v11  ;;  %v1634_v59 = vand.u32 4294901760, %v11693_v41  ;;  %v15332_v0 = vand.u32 4294901760, %v11601_v8 }
  0xdd   : > { %9347 = vmatpush3.bf16.msra.mxu0 %v11593_v61  ;;  %v1495_v15 = vsub.f32 %v11621_v16, %v15329_v22  ;;  %v1502_v23 = vsub.f32 %v11623_v55, %v15330_v45  ;;  %v11732_v45 = vpack.c.bf16 %v1403_v39, %v1400_v47  ;;  %v9378_v53 = vpack.c.bf16 %v1489_v50, %v1482_v35 }
  0xde   : > { %9371 = vmatpush3.bf16.msra.mxu1 %v11613_v24  ;;  %9349 = vmatprep.subr.bf16.mxu0 %v11598_v32  ;;  %v1621_v28 = vsub.f32 %v11642_v11, %v15331_v31  ;;  %v1628_v24 = vsub.f32 %v11651_v13, %v14950_v29  ;;  %v11730_v22 = vpack.c.bf16 %v1349_v37, %v15332_v0  ;;  %v15333_v29 = vand.u32 4294901760, %v11658_v58 }
  0xdf   : > { %9373 = vmatprep.subr.bf16.mxu1 %v9372_v4  ;;  %v1413_v4 = vand.u32 4294901760, %v11701_v46  ;;  %v9380_v31 = vpack.c.bf16 %v1615_v5, %v1608_v51  ;;  %v1496_v56 = vand.u32 4294901760, %v1495_v15  ;;  %v1503_v32 = vand.u32 4294901760, %v1502_v23 }
  0xe0   : > { %v1509_v2 = vsub.f32 %v11658_v58, %v15333_v29  ;;  %v15334_v8 = vand.u32 4294901760, %v11687_v36  ;;  %v14951_v37 = vand.u32 4294901760, %v11713_v48  ;;  %v14952_v39 = vand.u32 4294901760, %v11716_v54 }
  0xe1   : > { %9351 = vmatpush3.bf16.msra.mxu0 %v11615_v20  ;;  %v1622_v35 = vand.u32 4294901760, %v1621_v28  ;;  %v1629_v51 = vand.u32 4294901760, %v1628_v24  ;;  %v1635_v15 = vsub.f32 %v11693_v41, %v1634_v59  ;;  %v1414_v29 = vsub.f32 %v11701_v46, %v1413_v4 }
  0xe2   : > { %9375 = vmatpush3.bf16.msra.mxu1 %v9374_v57  ;;  %9353 = vmatprep.subr.bf16.mxu0 %v11649_v42  ;;  %v1516_v47 = vsub.f32 %v11687_v36, %v15334_v8  ;;  %v15335_v57 = vand.u32 4294901760, %v11696_v44  ;;  %v11755_v50 = vpack.c.bf16 %v1355_v3, %v1352_v49  ;;  %v9382_v5 = vpack.c.bf16 %v1503_v32, %v1496_v56 }
  0xe3   : > { %9377 = vmatprep.subr.bf16.mxu1 %v9376_v62  ;;  %v9392_v62 = vpack.c.bf16 %v11399_v12, %v11397_v43  ;;  %v1510_v28 = vand.u32 4294901760, %v1509_v2  ;;  %v1523_v0 = vsub.f32 %v11713_v48, %v14951_v37  ;;  %v1530_v8 = vsub.f32 %v11716_v54, %v14952_v39 }
  0xe4   : > { %v1642_v23 = vsub.f32 %v11696_v44, %v15335_v57  ;;  %v1517_v24 = vand.u32 4294901760, %v1516_v47  ;;  %v9384_v49 = vpack.c.bf16 %v1629_v51, %v1622_v35  ;;  %v1636_v3 = vand.u32 4294901760, %v1635_v15 }
  0xe5   : > { %9355 = vmatpush3.bf16.msra.mxu0 %v11730_v22  ;;  %v1415_v56 = vand.u32 4294901760, %v1414_v29  ;;  %v9396_v47 = vpack.c.bf16 %v11460_v25, %v11458_v21  ;;  %v1524_v57 = vand.u32 4294901760, %v1523_v0  ;;  %v1531_v37 = vand.u32 4294901760, %v1530_v8  ;;  %v15336_v29 = vld [vmem:[#allocation11_spill] sm:$0xff]  ;;  %v15340_v0 = vld [vmem:[#allocation21_spill] sm:$0xff]  ;;  %v15341_v8 = vld [vmem:[#allocation22_spill] sm:$0xff] }
  0xe6   : > { %9379 = vmatpush3.bf16.msra.mxu1 %v9378_v53  ;;  %9357 = vmatprep.subr.bf16.mxu0 %v11732_v45  ;;  %v1643_v32 = vand.u32 4294901760, %v1642_v23  ;;  %v9394_v53 = vpack.c.bf16 %v11403_v33, %v11401_v7  ;;  %v9386_v2 = vpack.c.bf16 %v1517_v24, %v1510_v28  ;;  %v9400_v51 = vpack.c.bf16 %v11488_v63, %v11486_v1  ;;  %v15339_v24 = vld [vmem:[#allocation16_spill] sm:$0xff] }
  0xe7   : > { %9381 = vmatprep.subr.bf16.mxu1 %v9380_v31  ;;  %v9398_v31 = vpack.c.bf16 %v11472_v38, %v11467_v40  ;;  %v9390_v35 = vpack.c.bf16 %v1531_v37, %v1524_v57  ;;  %v9402_v15 = vpack.c.bf16 %v11501_v10, %v11499_v60  ;;  %v9404_v23 = vpack.c.bf16 %v11519_v9, %v11517_v26 }
  0xe8   : > { %v9388_v39 = vpack.c.bf16 %v1643_v32, %v1636_v3  ;;  %v9406_v37 = vpack.c.bf16 %v11546_v18, %v11544_v14  ;;  %v9410_v28 = vpack.c.bf16 %v11595_v52, %v11584_v30  ;;  %v15342_v3 = vld [vmem:[#allocation14_spill] sm:$0xff]  ;;  %v9414_v32 = vpack.c.bf16 %v11623_v55, %v11621_v16 }
  0xe9   : > { %9359 = vmatpush3.bf16.msra.mxu0 %v11755_v50  ;;  %v9420_v57 = vpack.c.bf16 %v11696_v44, %v11693_v41 }
  0xea   : > { %9383 = vmatpush3.bf16.msra.mxu1 %v9382_v5  ;;  %9393 = vmatprep.subr.bf16.mxu0 %v9392_v62  ;;  %v15337_v5 = vld [vmem:[#allocation12_spill] sm:$0xff]  ;;  %v15338_v62 = vand.u32 4294901760, %v11491_v6 }
  0xeb   : > { %9385 = vmatprep.subr.bf16.mxu1 %v9384_v49  ;;  %v9412_v49 = vpack.c.bf16 %v15341_v8, %v15340_v0 }
  0xec   : > { %1416 = vmatmul.mubr.f32.vlgmr.msra.gmra.mrb[6].mxu0 %v1415_v56  ;;  %v15343_v56 = vld [vmem:[#allocation15_spill] sm:$0xff] }
  0xed   : > { %9395 = vmatpush3.bf16.msra.mxu0 %v9394_v53  ;;  %1783 = vmatprep.mubr.f32.mxu0 %v11491_v6  ;;  %v9416_v6 = vpack.c.bf16 %v11651_v13, %v11642_v11  ;;  %v15344_v53 = vld [vmem:[#allocation17_spill] sm:$0xff] }
  0xee   : > { %9387 = vmatpush3.bf16.msra.mxu1 %v9386_v2  ;;  %9397 = vmatprep.subr.bf16.mxu0 %v9396_v47  ;;  %v9418_v2 = vpack.c.bf16 %v11687_v36, %v11658_v58  ;;  %v15345_v47 = vld [vmem:[#allocation18_spill] sm:$0xff] }
  0xef   : > { %9389 = vmatprep.subr.bf16.mxu1 %v9388_v39  ;;  %v9408_v39 = vpack.c.bf16 %v11572_v17, %v11554_v34 }
  0xf1   : > { %9399 = vmatpush3.bf16.msra.mxu0 %v9398_v31  ;;  %v15346_v31 = vld [vmem:[#allocation19_spill] sm:$0xff] }
  0xf2   : > { %9391 = vmatpush3.bf16.msra.mxu1 %v9390_v35  ;;  %9401 = vmatprep.subr.bf16.mxu0 %v9400_v51  ;;  %v9422_v35 = vpack.c.bf16 %v11716_v54, %v11713_v48  ;;  %v15347_v51 = vand.u32 4294901760, %v11397_v43  ;;  %v271_v43 = vld [vmem:[#allocation5 + $0x280] sm:$0xff] }
  0xf3   : > { %9425 = vmatprep.subr.bf16.mxu1 %v11446_v19 }
  0xf5   : > { %1648 = vmatmul.mubr.f32.vlgmr.msra.gmra.mrb[6].mxu1 %v11673_v27  ;;  %9403 = vmatpush3.bf16.msra.mxu0 %v9402_v15  ;;  %v15348_v15 = vand.u32 4294901760, %v11399_v12  ;;  %v15354_v12 = vand.u32 4294901760, %v11467_v40  ;;  %v15359_v40 = vand.u32 4294901760, %v11499_v60  ;;  %v15363_v60 = vand.u32 4294901760, %v11544_v14 }
  0xf6   : > { %9427 = vmatpush3.bf16.msra.mxu1 %v15336_v29  ;;  %9405 = vmatprep.subr.bf16.mxu0 %v9404_v23  ;;  %v15370_v14 = vand.u32 4294901760, %v15341_v8  ;;  %v15374_v8 = vand.u32 4294901760, %v11651_v13  ;;  %v15376_v13 = vand.u32 4294901760, %v11687_v36 }
  0xf7   : > { %9429 = vmatprep.subr.bf16.mxu1 %v15337_v5  ;;  %1890 = vmatprep.mubr.f32.mxu1 %v15338_v62  ;;  %v9456_v23 = vpack.c.bf16 %v15348_v15, %v15347_v51  ;;  %v15351_v62 = vand.u32 4294901760, %v11403_v33  ;;  %v2220_v51 = vand.u32 4294901760, %v271_v43  ;;  %v255_v15 = vld [vmem:[#allocation5 + $0x200] sm:$0xff] }
  0xf9   : > { %9407 = vmatpush3.bf16.msra.mxu0 %v9406_v37  ;;  %v15349_v37 = vld [vmem:[#allocation20_spill] sm:$0xff] }
  0xfa   : > { %9431 = vmatpush3.bf16.msra.mxu1 %v15339_v24  ;;  %9409 = vmatprep.subr.bf16.mxu0 %v9408_v39  ;;  %v15350_v39 = vand.u32 4294901760, %v11401_v7  ;;  %v15355_v7 = vand.u32 4294901760, %v11472_v38  ;;  %v15360_v38 = vand.u32 4294901760, %v11501_v10  ;;  %v15364_v10 = vand.u32 4294901760, %v11546_v18 }
  0xfb   : > { %9433 = vmatprep.subr.bf16.mxu1 %v15342_v3 }
  0xfc   : > { %v9462_v33 = vpack.c.bf16 %v15355_v7, %v15354_v12  ;;  %v9470_v7 = vpack.c.bf16 %v15364_v10, %v15363_v60  ;;  %v275_v60 = vld [vmem:[#allocation5 + $0x2a0] sm:$0xff] }
  0xfd   : > { %9411 = vmatpush3.bf16.msra.mxu0 %v9410_v28  ;;  %v9458_v28 = vpack.c.bf16 %v15351_v62, %v15350_v39  ;;  %v9466_v39 = vpack.c.bf16 %v15360_v38, %v15359_v40  ;;  %v258_v40 = vld [vmem:[#allocation5 + $0x218] sm:$0xff]  ;;  %v15368_v38 = vand.u32 4294901760, %v11595_v52 }
  0xfe   : > { %9435 = vmatpush3.bf16.msra.mxu1 %v15343_v56  ;;  %9413 = vmatprep.subr.bf16.mxu0 %v9412_v49  ;;  %v15352_v49 = vand.u32 4294901760, %v11458_v21  ;;  %v15357_v21 = vand.u32 4294901760, %v11486_v1  ;;  %v15361_v1 = vand.u32 4294901760, %v11517_v26  ;;  %v257_v26 = vld [vmem:[#allocation5 + $0x210] sm:$0xff] }
  0xff   : > { %9437 = vmatprep.subr.bf16.mxu1 %v15344_v53 }
 0x101   : > { %9415 = vmatpush3.bf16.msra.mxu0 %v9414_v32  ;;  %v15353_v32 = vand.u32 4294901760, %v11460_v25  ;;  %v15358_v25 = vand.u32 4294901760, %v11488_v63  ;;  %v15362_v63 = vand.u32 4294901760, %v11519_v9  ;;  %v15367_v9 = vand.u32 4294901760, %v11584_v30 }
 0x102   : > { %9439 = vmatpush3.bf16.msra.mxu1 %v15345_v47  ;;  %9417 = vmatprep.subr.bf16.mxu0 %v9416_v6  ;;  %v15372_v30 = vand.u32 4294901760, %v11623_v55  ;;  %v180_v55 = vld [vmem:[%s11021_s29 + $0x28] sm:$0xff] }
 0x103   : > { %9441 = vmatprep.subr.bf16.mxu1 %v15346_v31  ;;  %v9460_v6 = vpack.c.bf16 %v15353_v32, %v15352_v49  ;;  %v274_v49 = vld [vmem:[#allocation5 + $0x298] sm:$0xff]  ;;  %v9468_v32 = vpack.c.bf16 %v15362_v63, %v15361_v1  ;;  %v9474_v1 = vpack.c.bf16 %v15368_v38, %v15367_v9 }
 0x105   : > { %9419 = vmatpush3.bf16.msra.mxu0 %v9418_v2  ;;  %v15356_v2 = vld [vmem:[#allocation13_spill] sm:$0xff] }
 0x106   : > { %9443 = vmatpush3.bf16.msra.mxu1 %v11593_v61  ;;  %9421 = vmatprep.subr.bf16.mxu0 %v9420_v57  ;;  %v9464_v57 = vpack.c.bf16 %v15358_v25, %v15357_v21  ;;  %v15366_v21 = vand.u32 4294901760, %v11572_v17  ;;  %v276_v17 = vld [vmem:[#allocation5 + $0x2a8] sm:$0xff] }
 0x107   : > { %9445 = vmatprep.subr.bf16.mxu1 %v15349_v37 }
 0x109   : > { %9423 = vmatpush3.bf16.msra.mxu0 %v9422_v35  ;;  %v272_v35 = vld [vmem:[#allocation5 + $0x288] sm:$0xff] }
 0x10a   : > { %9447 = vmatpush3.bf16.msra.mxu1 %v11615_v20  ;;  %9457 = vmatprep.subr.bf16.mxu0 %v9456_v23  ;;  %v256_v23 = vld [vmem:[#allocation5 + $0x208] sm:$0xff]  ;;  %v2223_v62 = vand.u32 4294901760, %v272_v35 }
 0x10b   : > { %9449 = vmatprep.subr.bf16.mxu1 %v11649_v42  ;;  %v2175_v12 = vand.u32 4294901760, %v256_v23 }
 0x10c   : > { %1786 = vmatmul.mubr.f32.vlgmr.msra.gmra.mrb[8].mxu0 %v11701_v46 }
 0x10d   : > { %9459 = vmatpush3.bf16.msra.mxu0 %v9458_v28  ;;  %2060 = vmatprep.mubr.f32.mxu0 %v15356_v2  ;;  %v273_v28 = vld [vmem:[#allocation5 + $0x290] sm:$0xff] }
 0x10e   : > { %9451 = vmatpush3.bf16.msra.mxu1 %v11730_v22  ;;  %9461 = vmatprep.subr.bf16.mxu0 %v9460_v6  ;;  %v2172_v6 = vand.u32 4294901760, %v255_v15  ;;  %v2226_v63 = vand.u32 4294901760, %v273_v28 }
 0x10f   : > { %9453 = vmatprep.subr.bf16.mxu1 %v11732_v45 }
 0x110   : > { %v11883_v46 = vsub.f32 %v255_v15, %v2172_v6  ;;  %v11909_v36 = vsub.f32 %v273_v28, %v2226_v63 }
 0x111   : > { %9463 = vmatpush3.bf16.msra.mxu0 %v9462_v33  ;;  %v15365_v33 = vand.u32 4294901760, %v11554_v34  ;;  %v2229_v34 = vand.u32 4294901760, %v274_v49 }
 0x112   : > { %9455 = vmatpush3.bf16.msra.mxu1 %v11755_v50  ;;  %9465 = vmatprep.subr.bf16.mxu0 %v9464_v57  ;;  %v11856_v57 = vsub.f32 %v271_v43, %v2220_v51  ;;  %v15371_v43 = vand.u32 4294901760, %v11621_v16  ;;  %v2178_v16 = vand.u32 4294901760, %v257_v26  ;;  %v14958_v28 = vand.u32 4294901760, %v11883_v46 }
 0x113   : > { %9489 = vmatprep.subr.bf16.mxu1 %v11446_v19  ;;  %v9472_v25 = vpack.c.bf16 %v15366_v21, %v15365_v33  ;;  %v15369_v19 = vand.u32 4294901760, %v15340_v0  ;;  %v15373_v0 = vand.u32 4294901760, %v11642_v11  ;;  %v11880_v33 = vsub.f32 %v272_v35, %v2223_v62 }
 0x114   : > { %v11872_v52 = vpack.c.bf16 %v15372_v30, %v15371_v43  ;;  %v15375_v11 = vand.u32 4294901760, %v11658_v58  ;;  %v2232_v35 = vand.u32 4294901760, %v275_v60  ;;  %v14963_v15 = vand.u32 4294901760, %v11856_v57 }
 0x115   : > { %v9476_v18 = vpack.c.bf16 %v15370_v14, %v15369_v19  ;;  %1894 = vmatmul.mubr.f32.vlgmr.msra.gmra.mrb[8].mxu1 %v1413_v4  ;;  %9467 = vmatpush3.bf16.msra.mxu0 %v9466_v39  ;;  %v11878_v10 = vpack.c.bf16 %v15374_v8, %v15373_v0  ;;  %v11885_v4 = vsub.f32 %v256_v23, %v2175_v12  ;;  %v2181_v39 = vand.u32 4294901760, %v258_v40 }
 0x116   : > { %9491 = vmatpush3.bf16.msra.mxu1 %v15336_v29  ;;  %9469 = vmatprep.subr.bf16.mxu0 %v9468_v32  ;;  %v11893_v21 = vpack.c.bf16 %v15376_v13, %v15375_v11  ;;  %v2235_v29 = vand.u32 4294901760, %v276_v17  ;;  %v15377_v23 = vand.u32 4294901760, %v11696_v44  ;;  %v15379_v58 = vand.u32 4294901760, %v11716_v54  ;;  %v259_v44 = vld [vmem:[#allocation5 + $0x220] sm:$0xff] }
 0x117   : > { %9493 = vmatprep.subr.bf16.mxu1 %v15337_v5  ;;  %2164 = vmatprep.mubr.f32.mxu1 %v15356_v2  ;;  %v15378_v5 = vand.u32 4294901760, %v11713_v48  ;;  %v11911_v38 = vsub.f32 %v274_v49, %v2229_v34  ;;  %v11913_v2 = vpack.c.bf16 %v2223_v62, %v2220_v51  ;;  %v11915_v19 = vpack.c.bf16 %v2175_v12, %v2172_v6  ;;  %v277_v62 = vld [vmem:[#allocation5 + $0x2b0] sm:$0xff]  ;;  %v278_v49 = vld [vmem:[#allocation5 + $0x2b8] sm:$0xff] }
 0x118   : > { %v11901_v32 = vpack.c.bf16 %v15377_v23, %v1634_v59  ;;  %v14961_v41 = vand.u32 4294901760, %v11880_v33  ;;  %v260_v59 = vld [vmem:[#allocation5 + $0x228] sm:$0xff]  ;;  %v11918_v14 = vand.u32 4294901760, %v180_v55  ;;  %v11921_v48 = vpack.c.bf16 %v2229_v34, %v2226_v63 }
 0x119   : > { %v11907_v9 = vpack.c.bf16 %v15379_v58, %v15378_v5  ;;  %9471 = vmatpush3.bf16.msra.mxu0 %v9470_v7  ;;  %15380 = vst [vmem:[#allocation11_spill] sm:$0xff] %v11915_v19  ;;  %v11923_v54 = vpack.c.bf16 %v2181_v39, %v2178_v16  ;;  %v14957_v51 = vand.u32 4294901760, %v11885_v4  ;;  %v11928_v6 = vsub.f32 %v257_v26, %v2178_v16 }
 0x11a   : > { %15381 = vst [vmem:[#allocation12_spill] sm:$0xff] %v11918_v14  ;;  %9495 = vmatpush3.bf16.msra.mxu1 %v15339_v24  ;;  %9473 = vmatprep.subr.bf16.mxu0 %v9472_v25  ;;  %15382 = vst [vmem:[#allocation16_spill] sm:$0xff] %v11921_v48  ;;  %v11930_v12 = vsub.f32 %v258_v40, %v2181_v39  ;;  %v11932_v7 = vpack.c.bf16 %v2235_v29, %v2232_v35  ;;  %v2184_v25 = vand.u32 4294901760, %v259_v44 }
 0x11b   : > { %15383 = vst [vmem:[#allocation21_spill] sm:$0xff] %v11923_v54  ;;  %9497 = vmatprep.subr.bf16.mxu1 %v15342_v3  ;;  %v2399_v24 = vsub.f32 %v11856_v57, %v14963_v15  ;;  %v2187_v63 = vand.u32 4294901760, %v260_v59  ;;  %v14954_v34 = vand.u32 4294901760, %v11909_v36  ;;  %v14953_v43 = vand.u32 4294901760, %v11911_v38 }
 0x11c   : > { %15384 = vst [vmem:[#allocation22_spill] sm:$0xff] %v11932_v7  ;;  %v2406_v3 = vsub.f32 %v11880_v33, %v14961_v41  ;;  %v2238_v26 = vand.u32 4294901760, %v277_v62  ;;  %v2241_v40 = vand.u32 4294901760, %v278_v49  ;;  %v11943_v30 = vsub.f32 %v180_v55, %v11918_v14  ;;  %v261_v55 = vld [vmem:[#allocation5 + $0x230] sm:$0xff] }
 0x11d   : > { %9475 = vmatpush3.bf16.msra.mxu0 %v9474_v1  ;;  %v11946_v0 = vsub.f32 %v275_v60, %v2232_v35  ;;  %v2287_v8 = vsub.f32 %v11883_v46, %v14958_v28  ;;  %v2294_v1 = vsub.f32 %v11885_v4, %v14957_v51  ;;  %v11955_v16 = vsub.f32 %v276_v17, %v2235_v29  ;;  %v262_v17 = vld [vmem:[#allocation5 + $0x238] sm:$0xff]  ;;  %v264_v28 = vld [vmem:[#allocation5 + $0x248] sm:$0xff] }
 0x11e   : > { %9499 = vmatpush3.bf16.msra.mxu1 %v15343_v56  ;;  %9477 = vmatprep.subr.bf16.mxu0 %v9476_v18  ;;  %v2400_v39 = vand.u32 4294901760, %v2399_v24  ;;  %v14956_v11 = vand.u32 4294901760, %v11928_v6  ;;  %v14955_v56 = vand.u32 4294901760, %v11930_v12  ;;  %v11959_v18 = vpack.c.bf16 %v2187_v63, %v2184_v25 }
 0x11f   : > { %9501 = vmatprep.subr.bf16.mxu1 %v15344_v53  ;;  %v11961_v60 = vsub.f32 %v259_v44, %v2184_v25  ;;  %v2413_v13 = vsub.f32 %v11909_v36, %v14954_v34  ;;  %v2420_v53 = vsub.f32 %v11911_v38, %v14953_v43  ;;  %v2407_v35 = vand.u32 4294901760, %v2406_v3  ;;  %v279_v43 = vld [vmem:[#allocation5 + $0x2c0] sm:$0xff]  ;;  %v280_v34 = vld [vmem:[#allocation5 + $0x2c8] sm:$0xff] }
 0x120   : > { %15385 = vst [vmem:[#allocation14_spill] sm:$0xff] %v11959_v18  ;;  %v11970_v29 = vsub.f32 %v260_v59, %v2187_v63  ;;  %v11972_v23 = vpack.c.bf16 %v2241_v40, %v2238_v26  ;;  %v14964_v5 = vand.u32 4294901760, %v11943_v30  ;;  %v2288_v58 = vand.u32 4294901760, %v2287_v8  ;;  %v263_v8 = vld [vmem:[#allocation5 + $0x240] sm:$0xff] }
 0x121   : > { %9479 = vmatpush3.bf16.msra.mxu0 %v11872_v52  ;;  %v2295_v44 = vand.u32 4294901760, %v2294_v1  ;;  %v11977_v24 = vsub.f32 %v277_v62, %v2238_v26  ;;  %v2190_v25 = vand.u32 4294901760, %v261_v55  ;;  %v11980_v52 = vsub.f32 %v278_v49, %v2241_v40 }
 0x122   : > { %15386 = vst [vmem:[#allocation15_spill] sm:$0xff] %v11972_v23  ;;  %9503 = vmatpush3.bf16.msra.mxu1 %v15345_v47  ;;  %9481 = vmatprep.subr.bf16.mxu0 %v11878_v10  ;;  %v2193_v59 = vand.u32 4294901760, %v262_v17  ;;  %v2301_v63 = vsub.f32 %v11928_v6, %v14956_v11  ;;  %v2308_v47 = vsub.f32 %v11930_v12, %v14955_v56  ;;  %v2414_v10 = vand.u32 4294901760, %v2413_v13 }
 0x123   : > { %9505 = vmatprep.subr.bf16.mxu1 %v15346_v31  ;;  %v2421_v3 = vand.u32 4294901760, %v2420_v53  ;;  %v14960_v62 = vand.u32 4294901760, %v11946_v0  ;;  %v14959_v26 = vand.u32 4294901760, %v11955_v16  ;;  %v11991_v31 = vpack.c.bf16 %v2407_v35, %v2400_v39 }
 0x124   : > { %v2244_v49 = vand.u32 4294901760, %v279_v43  ;;  %v2247_v40 = vand.u32 4294901760, %v280_v34  ;;  %v2270_v1 = vsub.f32 %v11943_v30, %v14964_v5  ;;  %v11998_v13 = vpack.c.bf16 %v2295_v44, %v2288_v58  ;;  %v282_v44 = vld [vmem:[#allocation5 + $0x2d8] sm:$0xff] }
 0x125   : > { %9483 = vmatpush3.bf16.msra.mxu0 %v11893_v21  ;;  %v12000_v53 = vsub.f32 %v261_v55, %v2190_v25  ;;  %v14962_v56 = vand.u32 4294901760, %v11961_v60  ;;  %v14965_v21 = vand.u32 4294901760, %v11970_v29  ;;  %v12005_v39 = vpack.c.bf16 %v2193_v59, %v2190_v25  ;;  %v266_v5 = vld [vmem:[#allocation5 + $0x258] sm:$0xff] }
 0x126   : > { %9507 = vmatpush3.bf16.msra.mxu1 %v11593_v61  ;;  %9485 = vmatprep.subr.bf16.mxu0 %v11901_v32  ;;  %v12007_v35 = vsub.f32 %v262_v17, %v2193_v59  ;;  %v2302_v11 = vand.u32 4294901760, %v2301_v63  ;;  %v2309_v51 = vand.u32 4294901760, %v2308_v47  ;;  %v12009_v61 = vpack.c.bf16 %v2421_v3, %v2414_v10  ;;  %v281_v17 = vld [vmem:[#allocation5 + $0x2d0] sm:$0xff] }
 0x127   : > { %9509 = vmatprep.subr.bf16.mxu1 %v15349_v37  ;;  %15387 = vst [vmem:[#allocation17_spill] sm:$0xff] %v12005_v39  ;;  %v2427_v32 = vsub.f32 %v11946_v0, %v14960_v62  ;;  %v2434_v55 = vsub.f32 %v11955_v16, %v14959_v26  ;;  %v2196_v58 = vand.u32 4294901760, %v263_v8  ;;  %v12018_v37 = vpack.c.bf16 %v2247_v40, %v2244_v49 }
 0x128   : > { %v14967_v25 = vand.u32 4294901760, %v11977_v24  ;;  %v14966_v59 = vand.u32 4294901760, %v11980_v52  ;;  %v2271_v63 = vand.u32 4294901760, %v2270_v1  ;;  %v12024_v47 = vsub.f32 %v279_v43, %v2244_v49 }
 0x129   : > { %9487 = vmatpush3.bf16.msra.mxu0 %v11907_v9  ;;  %15388 = vst [vmem:[#allocation18_spill] sm:$0xff] %v12018_v37  ;;  %v2199_v10 = vand.u32 4294901760, %v264_v28  ;;  %v2315_v9 = vsub.f32 %v11961_v60, %v14962_v56  ;;  %v2322_v3 = vsub.f32 %v11970_v29, %v14965_v21  ;;  %v12033_v26 = vpack.c.bf16 %v2309_v51, %v2302_v11 }
 0x12a   : > { %9511 = vmatpush3.bf16.msra.mxu1 %v11615_v20  ;;  %9521 = vmatprep.subr.bf16.mxu0 %v11913_v2  ;;  %v12035_v1 = vsub.f32 %v280_v34, %v2247_v40  ;;  %v265_v20 = vld [vmem:[#allocation5 + $0x250] sm:$0xff]  ;;  %v14970_v62 = vand.u32 4294901760, %v12000_v53  ;;  %v14973_v43 = vand.u32 4294901760, %v12007_v35  ;;  %v2428_v49 = vand.u32 4294901760, %v2427_v32 }
 0x12b   : > { %9513 = vmatprep.subr.bf16.mxu1 %v11649_v42  ;;  %v2435_v41 = vand.u32 4294901760, %v2434_v55  ;;  %v2250_v56 = vand.u32 4294901760, %v281_v17  ;;  %v2253_v15 = vand.u32 4294901760, %v282_v44  ;;  %v12041_v21 = vsub.f32 %v263_v8, %v2196_v58 }
 0x12c   : > { %2062 = vmatmul.mubr.f32.vlgmr.msra.gmra.mrb[10].mxu0 %v11673_v27  ;;  %v2441_v42 = vsub.f32 %v11977_v24, %v14967_v25  ;;  %v2448_v51 = vsub.f32 %v11980_v52, %v14966_v59  ;;  %v12051_v34 = vpack.c.bf16 %v2199_v10, %v2196_v58  ;;  %v2316_v11 = vand.u32 4294901760, %v2315_v9  ;;  %v283_v59 = vld [vmem:[#allocation5 + $0x2e0] sm:$0xff] }
 0x12d   : > { %9523 = vmatpush3.bf16.msra.mxu0 %v11915_v19  ;;  %2272 = vmatprep.mubr.f32.mxu0 %v2271_v63  ;;  %v2323_v40 = vand.u32 4294901760, %v2322_v3  ;;  %v2202_v32 = vand.u32 4294901760, %v265_v20  ;;  %v2205_v8 = vand.u32 4294901760, %v266_v5  ;;  %v2329_v55 = vsub.f32 %v12000_v53, %v14970_v62  ;;  %v12079_v25 = vld [vmem:[#allocation5 + $0x260] sm:$0xff] }
 0x12e   : > { %9515 = vmatpush3.bf16.msra.mxu1 %v11730_v22  ;;  %9525 = vmatprep.subr.bf16.mxu0 %v11921_v48  ;;  %v2336_v63 = vsub.f32 %v12007_v35, %v14973_v43  ;;  %v284_v22 = vld [vmem:[#allocation5 + $0x2e8] sm:$0xff]  ;;  %v12061_v58 = vpack.c.bf16 %v2435_v41, %v2428_v49  ;;  %v12063_v9 = vsub.f32 %v264_v28, %v2199_v10  ;;  %v2442_v19 = vand.u32 4294901760, %v2441_v42 }
 0x12f   : > { %9517 = vmatprep.subr.bf16.mxu1 %v11732_v45  ;;  %v12065_v3 = vpack.c.bf16 %v2253_v15, %v2250_v56  ;;  %v14974_v45 = vand.u32 4294901760, %v12035_v1  ;;  %v12069_v48 = vsub.f32 %v281_v17, %v2250_v56  ;;  %v12071_v62 = vsub.f32 %v282_v44, %v2253_v15  ;;  %v12087_v42 = vld [vmem:[#allocation5 + $0x268] sm:$0xff] }
 0x130   : > { %v2449_v43 = vand.u32 4294901760, %v2448_v51  ;;  %v12075_v41 = vpack.c.bf16 %v2323_v40, %v2316_v11  ;;  %v12077_v28 = vsub.f32 %v265_v20, %v2202_v32  ;;  %v2256_v10 = vand.u32 4294901760, %v283_v59  ;;  %v12096_v40 = vld [vmem:[#allocation5 + $0x2f0] sm:$0xff] }
 0x131   : > { %9527 = vmatpush3.bf16.msra.mxu0 %v11923_v54  ;;  %15389 = vst [vmem:[#allocation19_spill] sm:$0xff] %v12069_v48  ;;  %15390 = vst [vmem:[#allocation20_spill] sm:$0xff] %v12071_v62  ;;  %v2259_v49 = vand.u32 4294901760, %v284_v22  ;;  %v12082_v56 = vpack.c.bf16 %v2205_v8, %v2202_v32  ;;  %v2330_v15 = vand.u32 4294901760, %v2329_v55  ;;  %v2337_v17 = vand.u32 4294901760, %v2336_v63  ;;  %v12098_v32 = vld [vmem:[#allocation5 + $0x2f8] sm:$0xff] }
 0x132   : > { %9519 = vmatpush3.bf16.msra.mxu1 %v11755_v50  ;;  %9529 = vmatprep.subr.bf16.mxu0 %v11932_v7  ;;  %v15391_v44 = vand.u32 4294901760, %v12024_v47  ;;  %v12089_v51 = vsub.f32 %v266_v5, %v2205_v8  ;;  %v2462_v20 = vsub.f32 %v12035_v1, %v14974_v45  ;;  %v9564_v55 = vpack.c.bf16 %v2449_v43, %v2442_v19 }
 0x133   : > { %9553 = vmatprep.subr.bf16.mxu1 %v11991_v31  ;;  %v2208_v5 = vand.u32 4294901760, %v12079_v25  ;;  %v12108_v45 = vpack.c.bf16 %v2259_v49, %v2256_v10  ;;  %v12110_v31 = vsub.f32 %v283_v59, %v2256_v10  ;;  %v12112_v11 = vsub.f32 %v284_v22, %v2259_v49 }
 0x134   : > { %v2455_v50 = vsub.f32 %v12024_v47, %v15391_v44  ;;  %v179_v44 = vld [vmem:[%s11021_s29 + $0x20] sm:$0xff]  ;;  %v9566_v19 = vpack.c.bf16 %v2337_v17, %v2330_v15  ;;  %v2262_v8 = vand.u32 4294901760, %v12096_v40  ;;  %v2265_v63 = vand.u32 4294901760, %v12098_v32 }
 0x135   : > { %2166 = vmatmul.mubr.f32.vlgmr.msra.gmra.mrb[10].mxu1 %v11673_v27  ;;  %9531 = vmatpush3.bf16.msra.mxu0 %v11959_v18  ;;  %v2211_v27 = vand.u32 4294901760, %v12087_v42  ;;  %v12118_v18 = vld [vmem:[#allocation5 + $0x270] sm:$0xff]  ;;  %v2463_v59 = vand.u32 4294901760, %v2462_v20  ;;  %v15392_v22 = vand.u32 4294901760, %v12041_v21  ;;  %v15393_v49 = vand.u32 4294901760, %v12063_v9 }
 0x136   : > { %9555 = vmatpush3.bf16.msra.mxu1 %v11998_v13  ;;  %9533 = vmatprep.subr.bf16.mxu0 %v11972_v23  ;;  %v2456_v43 = vand.u32 4294901760, %v2455_v50  ;;  %v12120_v13 = vld [vmem:[#allocation5 + $0x278] sm:$0xff]  ;;  %v12129_v15 = vand.u32 4294901760, %v179_v44  ;;  %v15394_v17 = vand.u32 4294901760, %v12069_v48  ;;  %v15395_v23 = vand.u32 4294901760, %v12071_v62 }
 0x137   : > { %9557 = vmatprep.subr.bf16.mxu1 %v12009_v61  ;;  %2508 = vmatprep.mubr.f32.mxu1 %v11918_v14  ;;  %v2343_v10 = vsub.f32 %v12041_v21, %v15392_v22  ;;  %v2350_v61 = vsub.f32 %v12063_v9, %v15393_v49  ;;  %v12143_v49 = vsub.f32 %v12079_v25, %v2208_v5  ;;  %v2217_v7 = vand.u32 4294901760, %v12120_v13 }
 0x138   : > { %v2469_v50 = vsub.f32 %v12069_v48, %v15394_v17  ;;  %v2476_v20 = vsub.f32 %v12071_v62, %v15395_v23  ;;  %v2214_v17 = vand.u32 4294901760, %v12118_v18  ;;  %v12152_v23 = vsub.f32 %v12096_v40, %v2262_v8 }
 0x139   : > { %9535 = vmatpush3.bf16.msra.mxu0 %v12005_v39  ;;  %v12146_v39 = vsub.f32 %v12087_v42, %v2211_v27  ;;  %v12155_v22 = vsub.f32 %v12098_v32, %v2265_v63  ;;  %v14993_v25 = vand.u32 4294901760, %v12112_v11  ;;  %v9568_v14 = vpack.c.bf16 %v2463_v59, %v2456_v43 }
 0x13a   : > { %9559 = vmatpush3.bf16.msra.mxu1 %v12033_v26  ;;  %9537 = vmatprep.subr.bf16.mxu0 %v12018_v37  ;;  %v2344_v37 = vand.u32 4294901760, %v2343_v10  ;;  %v2351_v42 = vand.u32 4294901760, %v2350_v61  ;;  %v12160_v62 = vsub.f32 %v179_v44, %v12129_v15  ;;  %v2470_v48 = vand.u32 4294901760, %v2469_v50 }
 0x13b   : > { %9561 = vmatprep.subr.bf16.mxu1 %v12061_v58  ;;  %v2477_v58 = vand.u32 4294901760, %v2476_v20  ;;  %v15396_v40 = vand.u32 4294901760, %v12077_v28  ;;  %v15397_v32 = vand.u32 4294901760, %v12089_v51  ;;  %v12172_v43 = vsub.f32 %v12118_v18, %v2214_v17 }
 0x13c   : > { %v12175_v44 = vsub.f32 %v12120_v13, %v2217_v7  ;;  %v15398_v61 = vand.u32 4294901760, %v12110_v31  ;;  %v14995_v18 = vand.u32 4294901760, %v12155_v22  ;;  %v12189_v13 = vpack.c.bf16 %v2265_v63, %v2262_v8 }
 0x13d   : > { %9539 = vmatpush3.bf16.msra.mxu0 %v12051_v34  ;;  %v2357_v54 = vsub.f32 %v12077_v28, %v15396_v40  ;;  %v2364_v26 = vsub.f32 %v12089_v51, %v15397_v32  ;;  %v12187_v40 = vpack.c.bf16 %v2211_v27, %v2208_v5  ;;  %v14997_v32 = vand.u32 4294901760, %v12160_v62 }
 0x13e   : > { %9563 = vmatpush3.bf16.msra.mxu1 %v12075_v41  ;;  %9541 = vmatprep.subr.bf16.mxu0 %v12065_v3  ;;  %v2483_v50 = vsub.f32 %v12110_v31, %v15398_v61  ;;  %v2490_v41 = vsub.f32 %v12112_v11, %v14993_v25  ;;  %v9572_v10 = vpack.c.bf16 %v2477_v58, %v2470_v48  ;;  %v15399_v25 = vand.u32 4294901760, %v12143_v49 }
 0x13f   : > { %9565 = vmatprep.subr.bf16.mxu1 %v9564_v55  ;;  %v9570_v55 = vpack.c.bf16 %v2351_v42, %v2344_v37  ;;  %v2358_v59 = vand.u32 4294901760, %v2357_v54  ;;  %v2365_v61 = vand.u32 4294901760, %v2364_v26  ;;  %v15400_v5 = vand.u32 4294901760, %v12146_v39 }
 0x140   : > { %v2371_v20 = vsub.f32 %v12143_v49, %v15399_v25  ;;  %v14994_v63 = vand.u32 4294901760, %v12172_v43  ;;  %v14996_v27 = vand.u32 4294901760, %v12175_v44  ;;  %v2484_v37 = vand.u32 4294901760, %v2483_v50 }
 0x141   : > { %9543 = vmatpush3.bf16.msra.mxu0 %v12082_v56  ;;  %v2378_v8 = vsub.f32 %v12146_v39, %v15400_v5  ;;  %v2491_v48 = vand.u32 4294901760, %v2490_v41  ;;  %v15401_v54 = vand.u32 4294901760, %v12152_v23  ;;  %v2504_v26 = vsub.f32 %v12155_v22, %v14995_v18 }
 0x142   : > { %9567 = vmatpush3.bf16.msra.mxu1 %v9566_v19  ;;  %9545 = vmatprep.subr.bf16.mxu0 %v12108_v45  ;;  %v2276_v25 = vsub.f32 %v12160_v62, %v14997_v32  ;;  %v12212_v42 = vpack.c.bf16 %v2217_v7, %v2214_v17  ;;  %v9574_v58 = vpack.c.bf16 %v2365_v61, %v2358_v59  ;;  %v2372_v50 = vand.u32 4294901760, %v2371_v20  ;;  %v12287_v32 = vld [vmem:[#allocation5 + $0x300] sm:$0xff] }
 0x143   : > { %9569 = vmatprep.subr.bf16.mxu1 %v9568_v14  ;;  %v2497_v19 = vsub.f32 %v12152_v23, %v15401_v54  ;;  %v9584_v14 = vpack.c.bf16 %v11880_v33, %v11856_v57  ;;  %v2379_v41 = vand.u32 4294901760, %v2378_v8  ;;  %v2385_v5 = vsub.f32 %v12172_v43, %v14994_v63 }
 0x144   : > { %v2392_v54 = vsub.f32 %v12175_v44, %v14996_v27  ;;  %v9576_v7 = vpack.c.bf16 %v2491_v48, %v2484_v37  ;;  %v2505_v59 = vand.u32 4294901760, %v2504_v26  ;;  %v2277_v61 = vand.u32 4294901760, %v2276_v25  ;;  %v15403_v25 = vld [vmem:[#allocation16_spill] sm:$0xff] }
 0x145   : > { %9547 = vmatpush3.bf16.msra.mxu0 %v12187_v40  ;;  %v2498_v17 = vand.u32 4294901760, %v2497_v19  ;;  %v9578_v20 = vpack.c.bf16 %v2379_v41, %v2372_v50  ;;  %v9588_v8 = vpack.c.bf16 %v11911_v38, %v11909_v36  ;;  %v2386_v63 = vand.u32 4294901760, %v2385_v5  ;;  %v15405_v50 = vld [vmem:[#allocation21_spill] sm:$0xff]  ;;  %v15406_v41 = vld [vmem:[#allocation19_spill] sm:$0xff]  ;;  %v15407_v5 = vld [vmem:[#allocation20_spill] sm:$0xff] }
 0x146   : > { %9571 = vmatpush3.bf16.msra.mxu1 %v9570_v55  ;;  %9549 = vmatprep.subr.bf16.mxu0 %v12189_v13  ;;  %v9586_v55 = vpack.c.bf16 %v11885_v4, %v11883_v46  ;;  %v2393_v18 = vand.u32 4294901760, %v2392_v54  ;;  %v9592_v48 = vpack.c.bf16 %v11955_v16, %v11946_v0  ;;  %v9594_v19 = vpack.c.bf16 %v11970_v29, %v11961_v60 }
 0x147   : > { %9573 = vmatprep.subr.bf16.mxu1 %v9572_v10  ;;  %v9580_v27 = vpack.c.bf16 %v2505_v59, %v2498_v17  ;;  %v9590_v10 = vpack.c.bf16 %v11930_v12, %v11928_v6  ;;  %v9596_v26 = vpack.c.bf16 %v11980_v52, %v11977_v24  ;;  %v9604_v54 = vpack.c.bf16 %v15407_v5, %v15406_v41  ;;  %v15409_v59 = vld [vmem:[#allocation14_spill] sm:$0xff] }
 0x148   : > { %v9582_v37 = vpack.c.bf16 %v2393_v18, %v2386_v63  ;;  %v9598_v18 = vpack.c.bf16 %v12007_v35, %v12000_v53  ;;  %v15402_v63 = vld [vmem:[#allocation11_spill] sm:$0xff]  ;;  %v9606_v17 = vpack.c.bf16 %v12089_v51, %v12077_v28 }
 0x149   : > { %9551 = vmatpush3.bf16.msra.mxu0 %v12212_v42 }
 0x14a   : > { %9575 = vmatpush3.bf16.msra.mxu1 %v9574_v58  ;;  %9585 = vmatprep.subr.bf16.mxu0 %v9584_v14  ;;  %v15404_v58 = vand.u32 4294901760, %v11943_v30  ;;  %v9602_v14 = vpack.c.bf16 %v12063_v9, %v12041_v21 }
 0x14b   : > { %9577 = vmatprep.subr.bf16.mxu1 %v9576_v7  ;;  %v15408_v7 = vld [vmem:[#allocation22_spill] sm:$0xff] }
 0x14c   : > { %2278 = vmatmul.mubr.f32.vlgmr.msra.gmra.mrb[12].mxu0 %v2277_v61  ;;  %v15410_v61 = vld [vmem:[#allocation15_spill] sm:$0xff] }
 0x14d   : > { %9587 = vmatpush3.bf16.msra.mxu0 %v9586_v55  ;;  %2645 = vmatprep.mubr.f32.mxu0 %v11943_v30  ;;  %v9608_v30 = vpack.c.bf16 %v12112_v11, %v12110_v31 }
 0x14e   : > { %9579 = vmatpush3.bf16.msra.mxu1 %v9578_v20  ;;  %9589 = vmatprep.subr.bf16.mxu0 %v9588_v8  ;;  %v9610_v8 = vpack.c.bf16 %v12146_v39, %v12143_v49 }
 0x14f   : > { %9581 = vmatprep.subr.bf16.mxu1 %v9580_v27  ;;  %v9600_v27 = vpack.c.bf16 %v12035_v1, %v12024_v47 }
 0x151   : > { %9591 = vmatpush3.bf16.msra.mxu0 %v9590_v10 }
 0x152   : > { %9583 = vmatpush3.bf16.msra.mxu1 %v9582_v37  ;;  %9593 = vmatprep.subr.bf16.mxu0 %v9592_v48  ;;  %v15411_v37 = vld [vmem:[#allocation17_spill] sm:$0xff]  ;;  %v9612_v48 = vpack.c.bf16 %v12155_v22, %v12152_v23 }
 0x153   : > { %9617 = vmatprep.subr.bf16.mxu1 %v11913_v2 }
 0x155   : > { %2510 = vmatmul.mubr.f32.vlgmr.msra.gmra.mrb[12].mxu1 %v12129_v15  ;;  %9595 = vmatpush3.bf16.msra.mxu0 %v9594_v19  ;;  %v15412_v19 = vld [vmem:[#allocation18_spill] sm:$0xff] }
 0x156   : > { %9619 = vmatpush3.bf16.msra.mxu1 %v15402_v63  ;;  %9597 = vmatprep.subr.bf16.mxu0 %v9596_v26  ;;  %v9614_v26 = vpack.c.bf16 %v12175_v44, %v12172_v43 }
 0x157   : > { %9621 = vmatprep.subr.bf16.mxu1 %v15403_v25  ;;  %2752 = vmatprep.mubr.f32.mxu1 %v15404_v58 }
 0x159   : > { %9599 = vmatpush3.bf16.msra.mxu0 %v9598_v18  ;;  %v15413_v18 = vand.u32 4294901760, %v11856_v57  ;;  %v15417_v57 = vand.u32 4294901760, %v11909_v36  ;;  %v15419_v36 = vand.u32 4294901760, %v11928_v6 }
 0x15a   : > { %9623 = vmatpush3.bf16.msra.mxu1 %v15405_v50  ;;  %9601 = vmatprep.subr.bf16.mxu0 %v9600_v27  ;;  %v15414_v27 = vand.u32 4294901760, %v11880_v33  ;;  %v15418_v33 = vand.u32 4294901760, %v11911_v38  ;;  %v15420_v38 = vand.u32 4294901760, %v11930_v12 }
 0x15b   : > { %9625 = vmatprep.subr.bf16.mxu1 %v15408_v7 }
 0x15c   : > { %v9648_v58 = vpack.c.bf16 %v15414_v27, %v15413_v18  ;;  %v9652_v18 = vpack.c.bf16 %v15418_v33, %v15417_v57  ;;  %v15425_v57 = vand.u32 4294901760, %v11970_v29 }
 0x15d   : > { %9603 = vmatpush3.bf16.msra.mxu0 %v9602_v14  ;;  %v12273_v14 = vld [vmem:[#allocation5 + $0x380] sm:$0xff] }
 0x15e   : > { %9627 = vmatpush3.bf16.msra.mxu1 %v15409_v59  ;;  %9605 = vmatprep.subr.bf16.mxu0 %v9604_v54  ;;  %v15001_v27 = vand.u32 4294901760, %v12273_v14 }
 0x15f   : > { %9629 = vmatprep.subr.bf16.mxu1 %v15410_v61  ;;  %v7488_v55 = vpop.f32.mrb[0].mxu0 }
 0x160   : > { %v7489_v20 = vpop.f32.mrb[1].mxu0 }
 0x161   : > { %9607 = vmatpush3.bf16.msra.mxu0 %v9606_v17  ;;  %v7490_v10 = vadd.f32 %v7489_v20, %v7488_v55  ;;  %v12275_v17 = vld [vmem:[#allocation5 + $0x388] sm:$0xff]  ;;  %v15415_v55 = vand.u32 4294901760, %v11883_v46  ;;  %v15416_v20 = vand.u32 4294901760, %v11885_v4 }
 0x162   : > { %9631 = vmatpush3.bf16.msra.mxu1 %v15411_v37  ;;  %9609 = vmatprep.subr.bf16.mxu0 %v9608_v30  ;;  %v15000_v46 = vand.u32 4294901760, %v12275_v17 }
 0x163   : > { %9633 = vmatprep.subr.bf16.mxu1 %v15412_v19 }
 0x164   : > { %v12317_v12 = vsub.f32 %v12275_v17, %v15000_v46 }
 0x165   : > { %9611 = vmatpush3.bf16.msra.mxu0 %v9610_v8  ;;  %v9650_v8 = vpack.c.bf16 %v15416_v20, %v15415_v55  ;;  %v15422_v55 = vand.u32 4294901760, %v11946_v0  ;;  %v12321_v0 = vld [vmem:[#allocation5 + $0x398] sm:$0xff] }
 0x166   : > { %9635 = vmatpush3.bf16.msra.mxu1 %v12051_v34  ;;  %9613 = vmatprep.subr.bf16.mxu0 %v9612_v48 }
 0x167   : > { %9637 = vmatprep.subr.bf16.mxu1 %v12065_v3 }
 0x168   : > { %v7523_v54 = vpop.f32.mrb[0].mxu1 }
 0x169   : > { %v7524_v30 = vpop.f32.mrb[1].mxu1  ;;  %9615 = vmatpush3.bf16.msra.mxu0 %v9614_v26  ;;  %v12291_v26 = vld [vmem:[#allocation5 + $0x308] sm:$0xff] }
 0x16a   : > { %v7525_v48 = vadd.f32 %v7524_v30, %v7523_v54  ;;  %9639 = vmatpush3.bf16.msra.mxu1 %v12082_v56  ;;  %9649 = vmatprep.subr.bf16.mxu0 %v9648_v58  ;;  %v9654_v58 = vpack.c.bf16 %v15420_v38, %v15419_v36  ;;  %v15421_v54 = vld [vmem:[#allocation12_spill] sm:$0xff]  ;;  %v14999_v30 = vand.u32 4294901760, %v12287_v32  ;;  %v14998_v6 = vand.u32 4294901760, %v12291_v26  ;;  %v289_v36 = vld [vmem:[#allocation5 + $0x310] sm:$0xff] }
 0x16b   : > { %9641 = vmatprep.subr.bf16.mxu1 %v12108_v45  ;;  %v15426_v38 = vand.u32 4294901760, %v11977_v24  ;;  %v15428_v24 = vand.u32 4294901760, %v12000_v53  ;;  %v3040_v46 = vand.u32 4294901760, %v289_v36  ;;  %v15435_v53 = vand.u32 4294901760, %v15406_v41  ;;  %v308_v41 = vld [vmem:[#allocation5 + $0x3a8] sm:$0xff] }
 0x16c   : > { %v12293_v4 = vadd.f32 %v7525_v48, %v7490_v10  ;;  %2648 = vmatmul.mubr.f32.vlgmr.msra.gmra.mrb[14].mxu0 %v12160_v62  ;;  %v15423_v10 = vand.u32 4294901760, %v11955_v16  ;;  %v12319_v48 = vld [vmem:[#allocation5 + $0x390] sm:$0xff]  ;;  %v15424_v16 = vand.u32 4294901760, %v11961_v60  ;;  %v12340_v60 = vsub.f32 %v12291_v26, %v14998_v6 }
 0x16d   : > { %9651 = vmatpush3.bf16.msra.mxu0 %v9650_v8  ;;  %2922 = vmatprep.mubr.f32.mxu0 %v15421_v54  ;;  %v12310_v8 = vsub.f32 %v12273_v14, %v15001_v27  ;;  %v3088_v29 = vand.u32 4294901760, %v12319_v48  ;;  %v15431_v6 = vand.u32 4294901760, %v12035_v1  ;;  %v15432_v27 = vand.u32 4294901760, %v12160_v62 }
 0x16e   : > { %9643 = vmatpush3.bf16.msra.mxu1 %v12187_v40  ;;  %9653 = vmatprep.subr.bf16.mxu0 %v9652_v18  ;;  %v9656_v20 = vpack.c.bf16 %v15423_v10, %v15422_v55  ;;  %v9658_v33 = vpack.c.bf16 %v15425_v57, %v15424_v16  ;;  %v12330_v18 = vsub.f32 %v12287_v32, %v14999_v30  ;;  %v15427_v55 = vand.u32 4294901760, %v11980_v52  ;;  %v290_v57 = vld [vmem:[#allocation5 + $0x318] sm:$0xff] }
 0x16f   : > { %9645 = vmatprep.subr.bf16.mxu1 %v12189_v13  ;;  %v3091_v16 = vand.u32 4294901760, %v12321_v0  ;;  %v15429_v52 = vand.u32 4294901760, %v12007_v35  ;;  %v15436_v35 = vand.u32 4294901760, %v15407_v5  ;;  %v15438_v1 = vand.u32 4294901760, %v12089_v51  ;;  %v182_v51 = vld [vmem:[%s11021_s29 + $0x38] sm:$0xff] }
 0x170   : > { %v9660_v10 = vpack.c.bf16 %v15427_v55, %v15426_v38  ;;  %v15430_v55 = vand.u32 4294901760, %v12024_v47  ;;  %v15437_v47 = vand.u32 4294901760, %v12077_v28  ;;  %v15011_v62 = vand.u32 4294901760, %v12330_v18 }
 0x171   : > { %9655 = vmatpush3.bf16.msra.mxu0 %v9654_v58  ;;  %v9662_v38 = vpack.c.bf16 %v15429_v52, %v15428_v24  ;;  %v9668_v24 = vpack.c.bf16 %v15436_v35, %v15435_v53  ;;  %v15439_v5 = vand.u32 4294901760, %v12310_v8  ;;  %v15002_v28 = vand.u32 4294901760, %v12340_v60 }
 0x172   : > { %9647 = vmatpush3.bf16.msra.mxu1 %v12212_v42  ;;  %9657 = vmatprep.subr.bf16.mxu0 %v9656_v20  ;;  %v9664_v30 = vpack.c.bf16 %v15431_v6, %v15430_v55  ;;  %v15434_v20 = vand.u32 4294901760, %v12063_v9  ;;  %v12369_v6 = vpack.c.bf16 %v15438_v1, %v15437_v47  ;;  %v3043_v9 = vand.u32 4294901760, %v290_v57 }
 0x173   : > { %9681 = vmatprep.subr.bf16.mxu1 %v11913_v2  ;;  %v15433_v2 = vand.u32 4294901760, %v12041_v21  ;;  %v12374_v21 = vsub.f32 %v12319_v48, %v3088_v29  ;;  %v12389_v48 = vsub.f32 %v12321_v0, %v3091_v16  ;;  %v15442_v52 = vand.u32 4294901760, %v12317_v12 }
 0x174   : > { %v15444_v53 = vand.u32 4294901760, %v12146_v39  ;;  %v15447_v0 = vand.u32 4294901760, %v12172_v43  ;;  %v12413_v1 = vsub.f32 %v289_v36, %v3040_v46  ;;  %v12421_v43 = vsub.f32 %v290_v57, %v3043_v9 }
 0x175   : > { %2756 = vmatmul.mubr.f32.vlgmr.msra.gmra.mrb[14].mxu1 %v15432_v27  ;;  %9659 = vmatpush3.bf16.msra.mxu0 %v9658_v33  ;;  %v9666_v58 = vpack.c.bf16 %v15434_v20, %v15433_v2  ;;  %v307_v27 = vld [vmem:[#allocation5 + $0x3a0] sm:$0xff]  ;;  %v3261_v33 = vsub.f32 %v12310_v8, %v15439_v5  ;;  %v15440_v20 = vand.u32 4294901760, %v12110_v31  ;;  %v3268_v55 = vsub.f32 %v12317_v12, %v15442_v52 }
 0x176   : > { %9683 = vmatpush3.bf16.msra.mxu1 %v15402_v63  ;;  %9661 = vmatprep.subr.bf16.mxu0 %v9660_v10  ;;  %v15441_v63 = vand.u32 4294901760, %v12112_v11  ;;  %v15443_v2 = vand.u32 4294901760, %v12143_v49  ;;  %v15445_v31 = vand.u32 4294901760, %v12152_v23  ;;  %v15446_v11 = vand.u32 4294901760, %v12155_v22  ;;  %v291_v5 = vld [vmem:[#allocation5 + $0x320] sm:$0xff]  ;;  %v292_v49 = vld [vmem:[#allocation5 + $0x328] sm:$0xff] }
 0x177   : > { %9685 = vmatprep.subr.bf16.mxu1 %v15403_v25  ;;  %3026 = vmatprep.mubr.f32.mxu1 %v15421_v54  ;;  %v15448_v54 = vand.u32 4294901760, %v12175_v44  ;;  %v3094_v39 = vand.u32 4294901760, %v307_v27  ;;  %v3149_v23 = vsub.f32 %v12330_v18, %v15011_v62  ;;  %v12418_v22 = vand.u32 4294901760, %v182_v51 }
 0x178   : > { %v12386_v10 = vpack.c.bf16 %v15441_v63, %v15440_v20  ;;  %v12399_v25 = vpack.c.bf16 %v15444_v53, %v15443_v2  ;;  %v12405_v35 = vpack.c.bf16 %v15446_v11, %v15445_v31  ;;  %v3097_v20 = vand.u32 4294901760, %v308_v41 }
 0x179   : > { %v12411_v47 = vpack.c.bf16 %v15448_v54, %v15447_v0  ;;  %9663 = vmatpush3.bf16.msra.mxu0 %v9662_v38  ;;  %15449 = vst [vmem:[#allocation13_spill] sm:$0xff] %v12418_v22  ;;  %v3262_v44 = vand.u32 4294901760, %v3261_v33  ;;  %v3156_v36 = vsub.f32 %v12340_v60, %v15002_v28  ;;  %v15006_v38 = vand.u32 4294901760, %v12374_v21  ;;  %v309_v28 = vld [vmem:[#allocation5 + $0x3b0] sm:$0xff] }
 0x17a   : > { %9687 = vmatpush3.bf16.msra.mxu1 %v15405_v50  ;;  %9665 = vmatprep.subr.bf16.mxu0 %v9664_v30  ;;  %v3269_v63 = vand.u32 4294901760, %v3268_v55  ;;  %v3046_v52 = vand.u32 4294901760, %v291_v5  ;;  %v3049_v2 = vand.u32 4294901760, %v292_v49  ;;  %v15003_v53 = vand.u32 4294901760, %v12389_v48 }
 0x17b   : > { %9689 = vmatprep.subr.bf16.mxu1 %v15408_v7  ;;  %v15450_v31 = vand.u32 4294901760, %v12273_v14  ;;  %v15451_v50 = vand.u32 4294901760, %v12275_v17  ;;  %v15453_v57 = vand.u32 4294901760, %v12287_v32  ;;  %v15454_v33 = vand.u32 4294901760, %v12291_v26  ;;  %v310_v17 = vld [vmem:[#allocation5 + $0x3b8] sm:$0xff]  ;;  %v293_v26 = vld [vmem:[#allocation5 + $0x330] sm:$0xff] }
 0x17c   : > { %v12441_v0 = vpack.c.bf16 %v3091_v16, %v3088_v29  ;;  %v12443_v7 = vpack.c.bf16 %v3043_v9, %v3040_v46  ;;  %v12445_v55 = vpack.c.bf16 %v3097_v20, %v3094_v39  ;;  %v12447_v54 = vsub.f32 %v307_v27, %v3094_v39  ;;  %v294_v29 = vld [vmem:[#allocation5 + $0x338] sm:$0xff] }
 0x17d   : > { %v12433_v30 = vpack.c.bf16 %v15451_v50, %v15450_v31  ;;  %v12439_v11 = vpack.c.bf16 %v15454_v33, %v15453_v57  ;;  %9667 = vmatpush3.bf16.msra.mxu0 %v9666_v58  ;;  %v3150_v14 = vand.u32 4294901760, %v3149_v23  ;;  %v12450_v31 = vsub.f32 %v182_v51, %v12418_v22 }
 0x17e   : > { %15456 = vst [vmem:[#allocation21_spill] sm:$0xff] %v12441_v0  ;;  %15457 = vst [vmem:[#allocation19_spill] sm:$0xff] %v12445_v55  ;;  %9691 = vmatpush3.bf16.msra.mxu1 %v15409_v59  ;;  %9669 = vmatprep.subr.bf16.mxu0 %v9668_v24  ;;  %v3157_v32 = vand.u32 4294901760, %v3156_v36  ;;  %v3275_v46 = vsub.f32 %v12374_v21, %v15006_v38  ;;  %v15005_v58 = vand.u32 4294901760, %v12413_v1  ;;  %v15004_v16 = vand.u32 4294901760, %v12421_v43 }
 0x17f   : > { %15452 = vst [vmem:[#allocation11_spill] sm:$0xff] %v12433_v30  ;;  %15455 = vst [vmem:[#allocation16_spill] sm:$0xff] %v12439_v11  ;;  %v7558_v9 = vpop.f32.mrb[2].mxu0  ;;  %9693 = vmatprep.subr.bf16.mxu1 %v15410_v61  ;;  %v12459_v27 = vsub.f32 %v308_v41, %v3097_v20  ;;  %v12461_v51 = vpack.c.bf16 %v3269_v63, %v3262_v44  ;;  %v12463_v59 = vpack.c.bf16 %v3049_v2, %v3046_v52  ;;  %v311_v20 = vld [vmem:[#allocation5 + $0x3c0] sm:$0xff]  ;;  %v312_v44 = vld [vmem:[#allocation5 + $0x3c8] sm:$0xff] }
 0x180   : > { %v3282_v24 = vsub.f32 %v12389_v48, %v15003_v53  ;;  %v7559_v39 = vpop.f32.mrb[3].mxu0  ;;  %v12468_v23 = vsub.f32 %v291_v5, %v3046_v52  ;;  %v12470_v36 = vsub.f32 %v292_v49, %v3049_v2  ;;  %v3100_v50 = vand.u32 4294901760, %v309_v28 }
 0x181   : > { %15458 = vst [vmem:[#allocation20_spill] sm:$0xff] %v12463_v59  ;;  %v3103_v57 = vand.u32 4294901760, %v310_v17  ;;  %v7560_v33 = vadd.f32 %v7559_v39, %v7558_v9  ;;  %9671 = vmatpush3.bf16.msra.mxu0 %v12369_v6  ;;  %v3052_v61 = vand.u32 4294901760, %v293_v26  ;;  %v3055_v41 = vand.u32 4294901760, %v294_v29 }
 0x182   : > { %v15012_v63 = vand.u32 4294901760, %v12450_v31  ;;  %9695 = vmatpush3.bf16.msra.mxu1 %v15411_v37  ;;  %9673 = vmatprep.subr.bf16.mxu0 %v12386_v10  ;;  %v12476_v53 = vpack.c.bf16 %v3157_v32, %v3150_v14  ;;  %v3276_v5 = vand.u32 4294901760, %v3275_v46  ;;  %v3163_v49 = vsub.f32 %v12413_v1, %v15005_v58 }
 0x183   : > { %v3170_v6 = vsub.f32 %v12421_v43, %v15004_v16  ;;  %v926_v52 = vadd.f32 %v7560_v33, %v12293_v4  ;;  %9697 = vmatprep.subr.bf16.mxu1 %v15412_v19  ;;  %v3283_v2 = vand.u32 4294901760, %v3282_v24  ;;  %v15009_v37 = vand.u32 4294901760, %v12447_v54  ;;  %v12496_v4 = vld [vmem:[#allocation5 + $0x340] sm:$0xff] }
 0x184   : > { %v15007_v10 = vand.u32 4294901760, %v12459_v27  ;;  %v12488_v14 = vpack.c.bf16 %v3103_v57, %v3100_v50  ;;  %v3106_v32 = vand.u32 4294901760, %v311_v20  ;;  %v3109_v46 = vand.u32 4294901760, %v312_v44 }
 0x185   : > { %v15008_v9 = vand.u32 4294901760, %v12468_v23  ;;  %9675 = vmatpush3.bf16.msra.mxu0 %v12399_v25  ;;  %v12492_v39 = vsub.f32 %v309_v28, %v3100_v50  ;;  %v12494_v16 = vsub.f32 %v310_v17, %v3103_v57  ;;  %v15010_v19 = vand.u32 4294901760, %v12470_v36 }
 0x186   : > { %15459 = vst [vmem:[#allocation22_spill] sm:$0xff] %v12488_v14  ;;  %v3132_v24 = vsub.f32 %v12450_v31, %v15012_v63  ;;  %9699 = vmatpush3.bf16.msra.mxu1 %v12051_v34  ;;  %9677 = vmatprep.subr.bf16.mxu0 %v12405_v35  ;;  %v12504_v33 = vpack.c.bf16 %v3055_v41, %v3052_v61  ;;  %v3164_v25 = vand.u32 4294901760, %v3163_v49  ;;  %v3171_v50 = vand.u32 4294901760, %v3170_v6  ;;  %v313_v49 = vld [vmem:[#allocation5 + $0x3d0] sm:$0xff]  ;;  %v314_v6 = vld [vmem:[#allocation5 + $0x3d8] sm:$0xff] }
 0x187   : > { %v12506_v58 = vsub.f32 %v293_v26, %v3052_v61  ;;  %v12508_v28 = vsub.f32 %v294_v29, %v3055_v41  ;;  %9701 = vmatprep.subr.bf16.mxu1 %v12065_v3  ;;  %v12511_v17 = vpack.c.bf16 %v3283_v2, %v3276_v5  ;;  %v3289_v57 = vsub.f32 %v12447_v54, %v15009_v37  ;;  %v296_v29 = vld [vmem:[#allocation5 + $0x348] sm:$0xff] }
 0x188   : > { %15460 = vst [vmem:[#allocation14_spill] sm:$0xff] %v12504_v33  ;;  %v3296_v34 = vsub.f32 %v12459_v27, %v15007_v10  ;;  %v7593_v35 = vpop.f32.mrb[2].mxu1  ;;  %v12519_v38 = vpack.c.bf16 %v3109_v46, %v3106_v32  ;;  %v12521_v26 = vsub.f32 %v311_v20, %v3106_v32  ;;  %v3058_v61 = vand.u32 4294901760, %v12496_v4  ;;  %v297_v20 = vld [vmem:[#allocation5 + $0x350] sm:$0xff] }
 0x189   : > { %15461 = vst [vmem:[#allocation15_spill] sm:$0xff] %v12506_v58  ;;  %15462 = vst [vmem:[#allocation17_spill] sm:$0xff] %v12508_v28  ;;  %v3177_v3 = vsub.f32 %v12468_v23, %v15008_v9  ;;  %v7594_v41 = vpop.f32.mrb[3].mxu1  ;;  %9679 = vmatpush3.bf16.msra.mxu0 %v12411_v47  ;;  %v3184_v5 = vsub.f32 %v12470_v36, %v15010_v19  ;;  %v3133_v32 = vand.u32 4294901760, %v3132_v24  ;;  %v15019_v47 = vand.u32 4294901760, %v12506_v58  ;;  %v298_v24 = vld [vmem:[#allocation5 + $0x358] sm:$0xff] }
 0x18a   : > { %15463 = vst [vmem:[#allocation18_spill] sm:$0xff] %v12519_v38  ;;  %v7595_v10 = vadd.f32 %v7594_v41, %v7593_v35  ;;  %9703 = vmatpush3.bf16.msra.mxu1 %v12082_v56  ;;  %9713 = vmatprep.subr.bf16.mxu0 %v12433_v30  ;;  %v12535_v9 = vsub.f32 %v312_v44, %v3109_v46  ;;  %v15022_v37 = vand.u32 4294901760, %v12508_v28  ;;  %v3290_v62 = vand.u32 4294901760, %v3289_v57 }
 0x18b   : > { %9705 = vmatprep.subr.bf16.mxu1 %v12108_v45  ;;  %v12540_v19 = vpack.c.bf16 %v3171_v50, %v3164_v25  ;;  %v3297_v63 = vand.u32 4294901760, %v3296_v34  ;;  %v3061_v2 = vand.u32 4294901760, %v296_v29  ;;  %v12546_v56 = vsub.f32 %v12496_v4, %v3058_v61 }
 0x18c   : > { %v12542_v35 = vadd.f32 %v7595_v10, %v926_v52  ;;  %2924 = vmatmul.mubr.f32.vlgmr.msra.gmra.mrb[16].mxu0 %v12129_v15  ;;  %v3112_v44 = vand.u32 4294901760, %v313_v49  ;;  %v3115_v46 = vand.u32 4294901760, %v314_v6  ;;  %v3178_v41 = vand.u32 4294901760, %v3177_v3  ;;  %v315_v10 = vld [vmem:[#allocation5 + $0x3e0] sm:$0xff] }
 0x18d   : > { %9715 = vmatpush3.bf16.msra.mxu0 %v12439_v11  ;;  %v3185_v45 = vand.u32 4294901760, %v3184_v5  ;;  %v15464_v25 = vand.u32 4294901760, %v12492_v39  ;;  %v15465_v57 = vand.u32 4294901760, %v12494_v16  ;;  %3134 = vmatprep.mubr.f32.mxu0 %v3133_v32  ;;  %v3064_v4 = vand.u32 4294901760, %v297_v20 }
 0x18e   : > { %9707 = vmatpush3.bf16.msra.mxu1 %v12187_v40  ;;  %9717 = vmatprep.subr.bf16.mxu0 %v12441_v0  ;;  %v3067_v34 = vand.u32 4294901760, %v298_v24  ;;  %v3191_v3 = vsub.f32 %v12506_v58, %v15019_v47  ;;  %v3198_v5 = vsub.f32 %v12508_v28, %v15022_v37  ;;  %v12566_v32 = vpack.c.bf16 %v3061_v2, %v3058_v61 }
 0x18f   : > { %v3303_v50 = vsub.f32 %v12492_v39, %v15464_v25  ;;  %v3310_v52 = vsub.f32 %v12494_v16, %v15465_v57  ;;  %v316_v25 = vld [vmem:[#allocation5 + $0x3e8] sm:$0xff]  ;;  %9709 = vmatprep.subr.bf16.mxu1 %v12189_v13  ;;  %v12564_v57 = vpack.c.bf16 %v3297_v63, %v3290_v62  ;;  %v12568_v40 = vsub.f32 %v296_v29, %v3061_v2 }
 0x190   : > { %15466 = vst [vmem:[#allocation12_spill] sm:$0xff] %v12566_v32  ;;  %v15025_v0 = vand.u32 4294901760, %v12521_v26  ;;  %v12571_v11 = vpack.c.bf16 %v3115_v46, %v3112_v44  ;;  %v12573_v30 = vsub.f32 %v313_v49, %v3112_v44  ;;  %v12575_v47 = vsub.f32 %v314_v6, %v3115_v46  ;;  %v300_v46 = vld [vmem:[#allocation5 + $0x368] sm:$0xff] }
 0x191   : > { %v3118_v58 = vand.u32 4294901760, %v315_v10  ;;  %9719 = vmatpush3.bf16.msra.mxu0 %v12443_v7  ;;  %v3304_v37 = vand.u32 4294901760, %v3303_v50  ;;  %v3311_v28 = vand.u32 4294901760, %v3310_v52  ;;  %v3121_v13 = vand.u32 4294901760, %v316_v25  ;;  %v12599_v52 = vld [vmem:[#allocation5 + $0x3f0] sm:$0xff] }
 0x192   : > { %15467 = vst [vmem:[#allocation23_spill] sm:$0xff] %v12571_v11  ;;  %v15026_v62 = vand.u32 4294901760, %v12535_v9  ;;  %9711 = vmatpush3.bf16.msra.mxu1 %v12212_v42  ;;  %9721 = vmatprep.subr.bf16.mxu0 %v12445_v55  ;;  %v12581_v63 = vpack.c.bf16 %v3185_v45, %v3178_v41  ;;  %v12583_v29 = vpack.c.bf16 %v3067_v34, %v3064_v4  ;;  %v3192_v61 = vand.u32 4294901760, %v3191_v3  ;;  %v299_v42 = vld [vmem:[#allocation5 + $0x360] sm:$0xff]  ;;  %v181_v3 = vld [vmem:[%s11021_s29 + $0x30] sm:$0xff] }
 0x193   : > { %v3199_v49 = vand.u32 4294901760, %v3198_v5  ;;  %9745 = vmatprep.subr.bf16.mxu1 %v12461_v51  ;;  %v12586_v6 = vsub.f32 %v297_v20, %v3064_v4  ;;  %v12588_v2 = vsub.f32 %v298_v24, %v3067_v34  ;;  %v12593_v44 = vsub.f32 %v12521_v26, %v15025_v0  ;;  %v12601_v51 = vld [vmem:[#allocation5 + $0x3f8] sm:$0xff] }
 0x194   : > { %v15027_v41 = vand.u32 4294901760, %v12546_v56  ;;  %v12596_v45 = vsub.f32 %v315_v10, %v3118_v58  ;;  %v15034_v50 = vand.u32 4294901760, %v12568_v40  ;;  %v9756_v4 = vpack.c.bf16 %v3311_v28, %v3304_v37 }
 0x195   : > { %15468 = vst [vmem:[#allocation24_spill] sm:$0xff] %v12588_v2  ;;  %3028 = vmatmul.mubr.f32.vlgmr.msra.gmra.mrb[16].mxu1 %v12129_v15  ;;  %9723 = vmatpush3.bf16.msra.mxu0 %v12463_v59  ;;  %v12607_v34 = vpack.c.bf16 %v3121_v13, %v3118_v58  ;;  %v3324_v10 = vsub.f32 %v12535_v9, %v15026_v62  ;;  %v3070_v24 = vand.u32 4294901760, %v299_v42  ;;  %v3073_v20 = vand.u32 4294901760, %v300_v46  ;;  %v12626_v62 = vld [vmem:[#allocation5 + $0x378] sm:$0xff] }
 0x196   : > { %15469 = vst [vmem:[#allocation25_spill] sm:$0xff] %v12596_v45  ;;  %9747 = vmatpush3.bf16.msra.mxu1 %v12476_v53  ;;  %9725 = vmatprep.subr.bf16.mxu0 %v12488_v14  ;;  %v9758_v5 = vpack.c.bf16 %v3199_v49, %v3192_v61  ;;  %v12615_v0 = vsub.f32 %v316_v25, %v3121_v13  ;;  %v3318_v15 = vand.u32 4294901760, %v12593_v44  ;;  %v3124_v37 = vand.u32 4294901760, %v12599_v52  ;;  %v12624_v53 = vld [vmem:[#allocation5 + $0x370] sm:$0xff] }
 0x197   : > { %9749 = vmatprep.subr.bf16.mxu1 %v12511_v17  ;;  %v3205_v58 = vsub.f32 %v12546_v56, %v15027_v41  ;;  %v3127_v28 = vand.u32 4294901760, %v12601_v51  ;;  %3370 = vmatprep.mubr.f32.mxu1 %v12418_v22  ;;  %v3212_v17 = vsub.f32 %v12568_v40, %v15034_v50  ;;  %v15470_v25 = vand.u32 4294901760, %v12573_v30 }
 0x198   : > { %v15471_v61 = vand.u32 4294901760, %v12575_v47  ;;  %v12638_v44 = vand.u32 4294901760, %v181_v3  ;;  %v3325_v41 = vand.u32 4294901760, %v3324_v10  ;;  %v12648_v50 = vsub.f32 %v300_v46, %v3073_v20 }
 0x199   : > { %v3331_v13 = vsub.f32 %v12573_v30, %v15470_v25  ;;  %9727 = vmatpush3.bf16.msra.mxu0 %v12504_v33  ;;  %v12646_v25 = vsub.f32 %v299_v42, %v3070_v24  ;;  %v3079_v55 = vand.u32 4294901760, %v12626_v62  ;;  %v3206_v10 = vand.u32 4294901760, %v3205_v58 }
 0x19a   : > { %v3338_v49 = vsub.f32 %v12575_v47, %v15471_v61  ;;  %9751 = vmatpush3.bf16.msra.mxu1 %v12540_v19  ;;  %9729 = vmatprep.subr.bf16.mxu0 %v12519_v38  ;;  %v3076_v61 = vand.u32 4294901760, %v12624_v53  ;;  %v12654_v14 = vsub.f32 %v12599_v52, %v3124_v37  ;;  %v12657_v59 = vsub.f32 %v12601_v51, %v3127_v28 }
 0x19b   : > { %9753 = vmatprep.subr.bf16.mxu1 %v12564_v57  ;;  %v3213_v22 = vand.u32 4294901760, %v3212_v17  ;;  %v3332_v42 = vand.u32 4294901760, %v3331_v13  ;;  %v12661_v46 = vsub.f32 %v181_v3, %v12638_v44  ;;  %v12664_v33 = vpack.c.bf16 %v3073_v20, %v3070_v24 }
 0x19c   : > { %v3339_v38 = vand.u32 4294901760, %v3338_v49  ;;  %v15472_v57 = vand.u32 4294901760, %v12586_v6  ;;  %v15473_v58 = vand.u32 4294901760, %v12588_v2  ;;  %v15474_v19 = vand.u32 4294901760, %v12596_v45 }
 0x19d   : > { %9731 = vmatpush3.bf16.msra.mxu0 %v12566_v32  ;;  %v12678_v3 = vsub.f32 %v12624_v53, %v3076_v61  ;;  %v12681_v20 = vsub.f32 %v12626_v62, %v3079_v55  ;;  %v15052_v13 = vand.u32 4294901760, %v12648_v50  ;;  %v9762_v32 = vpack.c.bf16 %v3213_v22, %v3206_v10 }
 0x19e   : > { %v3219_v52 = vsub.f32 %v12586_v6, %v15472_v57  ;;  %v3226_v51 = vsub.f32 %v12588_v2, %v15473_v58  ;;  %v3345_v17 = vsub.f32 %v12596_v45, %v15474_v19  ;;  %9755 = vmatpush3.bf16.msra.mxu1 %v12581_v63  ;;  %9733 = vmatprep.subr.bf16.mxu0 %v12571_v11  ;;  %v15475_v58 = vand.u32 4294901760, %v12615_v0 }
 0x19f   : > { %v7628_v49 = vpop.f32.mrb[4].mxu0  ;;  %9757 = vmatprep.subr.bf16.mxu1 %v9756_v4  ;;  %v9760_v57 = vpack.c.bf16 %v3325_v41, %v3318_v15  ;;  %v15051_v63 = vand.u32 4294901760, %v12654_v14  ;;  %v12690_v45 = vpack.c.bf16 %v3127_v28, %v3124_v37  ;;  %v9764_v62 = vpack.c.bf16 %v3339_v38, %v3332_v42 }
 0x1a0   : > { %v3352_v19 = vsub.f32 %v12615_v0, %v15475_v58  ;;  %v7629_v53 = vpop.f32.mrb[5].mxu0  ;;  %v15053_v24 = vand.u32 4294901760, %v12661_v46  ;;  %v3220_v4 = vand.u32 4294901760, %v3219_v52  ;;  %v3227_v41 = vand.u32 4294901760, %v3226_v51 }
 0x1a1   : > { %v7630_v2 = vadd.f32 %v7629_v53, %v7628_v49  ;;  %9735 = vmatpush3.bf16.msra.mxu0 %v12583_v29  ;;  %v3346_v15 = vand.u32 4294901760, %v3345_v17  ;;  %v15476_v58 = vand.u32 4294901760, %v12646_v25  ;;  %v3240_v22 = vsub.f32 %v12648_v50, %v15052_v13 }
 0x1a2   : > { %9759 = vmatpush3.bf16.msra.mxu1 %v9758_v5  ;;  %9737 = vmatprep.subr.bf16.mxu0 %v12607_v34  ;;  %v15049_v38 = vand.u32 4294901760, %v12678_v3  ;;  %v15050_v37 = vand.u32 4294901760, %v12681_v20  ;;  %v3353_v10 = vand.u32 4294901760, %v3352_v19  ;;  %v3359_v5 = vsub.f32 %v12654_v14, %v15051_v63 }
 0x1a3   : > { %v3233_v11 = vsub.f32 %v12646_v25, %v15476_v58  ;;  %v1202_v28 = vadd.f32 %v7630_v2, %v12542_v35  ;;  %9761 = vmatprep.subr.bf16.mxu1 %v9760_v57  ;;  %v15477_v42 = vand.u32 4294901760, %v12657_v59  ;;  %v3138_v51 = vsub.f32 %v12661_v46, %v15053_v24 }
 0x1a4   : > { %v12714_v17 = vpack.c.bf16 %v3079_v55, %v3076_v61  ;;  %v9766_v49 = vpack.c.bf16 %v3227_v41, %v3220_v4  ;;  %v9776_v35 = vpack.c.bf16 %v12317_v12, %v12310_v8  ;;  %v3241_v57 = vand.u32 4294901760, %v3240_v22 }
 0x1a5   : > { %v3366_v52 = vsub.f32 %v12657_v59, %v15477_v42  ;;  %9739 = vmatpush3.bf16.msra.mxu0 %v12664_v33  ;;  %v3234_v2 = vand.u32 4294901760, %v3233_v11  ;;  %v3247_v19 = vsub.f32 %v12678_v3, %v15049_v38  ;;  %v3254_v53 = vsub.f32 %v12681_v20, %v15050_v37 }
 0x1a6   : > { %9763 = vmatpush3.bf16.msra.mxu1 %v9762_v32  ;;  %9741 = vmatprep.subr.bf16.mxu0 %v12690_v45  ;;  %v9768_v55 = vpack.c.bf16 %v3353_v10, %v3346_v15  ;;  %v3360_v61 = vand.u32 4294901760, %v3359_v5  ;;  %v3139_v58 = vand.u32 4294901760, %v3138_v51  ;;  %v9778_v11 = vpack.c.bf16 %v12340_v60, %v12330_v18 }
 0x1a7   : > { %9765 = vmatprep.subr.bf16.mxu1 %v9764_v62  ;;  %v3367_v4 = vand.u32 4294901760, %v3366_v52  ;;  %v9780_v32 = vpack.c.bf16 %v12389_v48, %v12374_v21  ;;  %v9770_v38 = vpack.c.bf16 %v3241_v57, %v3234_v2  ;;  %v3248_v37 = vand.u32 4294901760, %v3247_v19  ;;  %v15481_v57 = vld [vmem:[#allocation16_spill] sm:$0xff] }
 0x1a8   : > { %v7663_v41 = vpop.f32.mrb[4].mxu1  ;;  %v3255_v62 = vand.u32 4294901760, %v3254_v53  ;;  %v9782_v5 = vpack.c.bf16 %v12421_v43, %v12413_v1  ;;  %v9784_v51 = vpack.c.bf16 %v12459_v27, %v12447_v54  ;;  %v9792_v19 = vpack.c.bf16 %v12535_v9, %v12521_v26  ;;  %v15482_v53 = vld [vmem:[#allocation21_spill] sm:$0xff] }
 0x1a9   : > { %v7664_v42 = vpop.f32.mrb[5].mxu1  ;;  %9743 = vmatpush3.bf16.msra.mxu0 %v12714_v17  ;;  %v9772_v15 = vpack.c.bf16 %v3367_v4, %v3360_v61  ;;  %v9794_v61 = vpack.c.bf16 %v12568_v40, %v12546_v56  ;;  %v9796_v4 = vpack.c.bf16 %v12575_v47, %v12573_v30  ;;  %v15496_v63 = vand.u32 4294901760, %v12340_v60 }
 0x1aa   : > { %v7665_v22 = vadd.f32 %v7664_v42, %v7663_v41  ;;  %9767 = vmatpush3.bf16.msra.mxu1 %v9766_v49  ;;  %9777 = vmatprep.subr.bf16.mxu0 %v9776_v35  ;;  %v9774_v52 = vpack.c.bf16 %v3255_v62, %v3248_v37  ;;  %v9786_v49 = vpack.c.bf16 %v12470_v36, %v12468_v23  ;;  %v15478_v35 = vld [vmem:[#allocation11_spill] sm:$0xff]  ;;  %v15480_v37 = vld [vmem:[#allocation17_spill] sm:$0xff]  ;;  %v15488_v62 = vld [vmem:[#allocation22_spill] sm:$0xff]  ;;  %v15499_v60 = vand.u32 4294901760, %v12413_v1 }
 0x1ab   : > { %9769 = vmatprep.subr.bf16.mxu1 %v9768_v55  ;;  %v15483_v55 = vand.u32 4294901760, %v12450_v31  ;;  %v15484_v41 = vld [vmem:[#allocation19_spill] sm:$0xff] }
 0x1ac   : > { %v1306_v10 = vadd.f32 %v7665_v22, %v1202_v28  ;;  %3140 = vmatmul.mubr.f32.vlgmr.msra.gmra.mrb[18].mxu0 %v3139_v58  ;;  %v9788_v28 = vpack.c.bf16 %v12494_v16, %v12492_v39  ;;  %v15485_v58 = vld [vmem:[#allocation24_spill] sm:$0xff] }
 0x1ad   : > { %9779 = vmatpush3.bf16.msra.mxu0 %v9778_v11  ;;  %3507 = vmatprep.mubr.f32.mxu0 %v12450_v31  ;;  %v9798_v42 = vpack.c.bf16 %v15485_v58, %v12586_v6  ;;  %v15486_v11 = vld [vmem:[#allocation20_spill] sm:$0xff]  ;;  %v15487_v31 = vld [vmem:[#allocation25_spill] sm:$0xff] }
 0x1ae   : > { %9771 = vmatpush3.bf16.msra.mxu1 %v9770_v38  ;;  %9781 = vmatprep.subr.bf16.mxu0 %v9780_v32  ;;  %v15479_v38 = vld [vmem:[#allocation15_spill] sm:$0xff]  ;;  %v9800_v32 = vpack.c.bf16 %v12615_v0, %v15487_v31 }
 0x1af   : > { %9773 = vmatprep.subr.bf16.mxu1 %v9772_v15  ;;  %v9790_v2 = vpack.c.bf16 %v15480_v37, %v15479_v38 }
 0x1b1   : > { %9783 = vmatpush3.bf16.msra.mxu0 %v9782_v5 }
 0x1b2   : > { %9775 = vmatpush3.bf16.msra.mxu1 %v9774_v52  ;;  %9785 = vmatprep.subr.bf16.mxu0 %v9784_v51  ;;  %v9802_v52 = vpack.c.bf16 %v12648_v50, %v12646_v25  ;;  %v15489_v51 = vld [vmem:[#allocation14_spill] sm:$0xff] }
 0x1b3   : > { %9809 = vmatprep.subr.bf16.mxu1 %v15478_v35 }
 0x1b5   : > { %3372 = vmatmul.mubr.f32.vlgmr.msra.gmra.mrb[18].mxu1 %v12638_v44  ;;  %9787 = vmatpush3.bf16.msra.mxu0 %v9786_v49  ;;  %v9804_v49 = vpack.c.bf16 %v12657_v59, %v12654_v14 }
 0x1b6   : > { %9811 = vmatpush3.bf16.msra.mxu1 %v15481_v57  ;;  %9789 = vmatprep.subr.bf16.mxu0 %v9788_v28 }
 0x1b7   : > { %9813 = vmatprep.subr.bf16.mxu1 %v15482_v53  ;;  %3614 = vmatprep.mubr.f32.mxu1 %v15483_v55  ;;  %v15491_v55 = vld [vmem:[#allocation12_spill] sm:$0xff] }
 0x1b9   : > { %9791 = vmatpush3.bf16.msra.mxu0 %v9790_v2  ;;  %v15490_v2 = vld [vmem:[#allocation18_spill] sm:$0xff] }
 0x1ba   : > { %9815 = vmatpush3.bf16.msra.mxu1 %v12443_v7  ;;  %9793 = vmatprep.subr.bf16.mxu0 %v9792_v19  ;;  %v9806_v19 = vpack.c.bf16 %v12681_v20, %v12678_v3 }
 0x1bb   : > { %9817 = vmatprep.subr.bf16.mxu1 %v15484_v41 }
 0x1bd   : > { %9795 = vmatpush3.bf16.msra.mxu0 %v9794_v61  ;;  %v15492_v61 = vand.u32 4294901760, %v12310_v8  ;;  %v15497_v8 = vand.u32 4294901760, %v12374_v21  ;;  %v15500_v21 = vand.u32 4294901760, %v12421_v43 }
 0x1be   : > { %9819 = vmatpush3.bf16.msra.mxu1 %v15486_v11  ;;  %9797 = vmatprep.subr.bf16.mxu0 %v9796_v4  ;;  %v15493_v4 = vand.u32 4294901760, %v12317_v12  ;;  %v15498_v12 = vand.u32 4294901760, %v12389_v48  ;;  %v15501_v48 = vld [vmem:[#allocation13_spill] sm:$0xff] }
 0x1bf   : > { %v7698_v22 = vpop.f32.mrb[6].mxu0  ;;  %9821 = vmatprep.subr.bf16.mxu1 %v15488_v62 }
 0x1c0   : > { %v7699_v15 = vpop.f32.mrb[7].mxu0 }
 0x1c1   : > { %v7700_v5 = vadd.f32 %v7699_v15, %v7698_v22  ;;  %9799 = vmatpush3.bf16.msra.mxu0 %v9798_v42  ;;  %v9840_v42 = vpack.c.bf16 %v15493_v4, %v15492_v61  ;;  %v15494_v22 = vld [vmem:[#allocation23_spill] sm:$0xff]  ;;  %v9844_v61 = vpack.c.bf16 %v15498_v12, %v15497_v8  ;;  %v15507_v12 = vand.u32 4294901760, %v12494_v16 }
 0x1c2   : > { %9823 = vmatpush3.bf16.msra.mxu1 %v15489_v51  ;;  %9801 = vmatprep.subr.bf16.mxu0 %v9800_v32  ;;  %v12775_v32 = vld [vmem:[#allocation5 + $0x480] sm:$0xff]  ;;  %v15508_v16 = vand.u32 4294901760, %v15479_v38  ;;  %v15514_v38 = vand.u32 4294901760, %v12568_v40 }
 0x1c3   : > { %v1418_v28 = vadd.f32 %v7700_v5, %v1306_v10  ;;  %9825 = vmatprep.subr.bf16.mxu1 %v15490_v2  ;;  %v12777_v10 = vld [vmem:[#allocation5 + $0x488] sm:$0xff]  ;;  %v3944_v4 = vand.u32 4294901760, %v12775_v32 }
 0x1c5   : > { %9803 = vmatpush3.bf16.msra.mxu0 %v9802_v52  ;;  %v15495_v52 = vand.u32 4294901760, %v12330_v18  ;;  %v12794_v18 = vld [vmem:[#allocation5 + $0x400] sm:$0xff] }
 0x1c6   : > { %9827 = vmatpush3.bf16.msra.mxu1 %v15491_v55  ;;  %9805 = vmatprep.subr.bf16.mxu0 %v9804_v49  ;;  %v15054_v43 = vand.u32 4294901760, %v12794_v18 }
 0x1c7   : > { %9829 = vmatprep.subr.bf16.mxu1 %v15494_v22  ;;  %v9842_v13 = vpack.c.bf16 %v15496_v63, %v15495_v52  ;;  %v9846_v63 = vpack.c.bf16 %v15500_v21, %v15499_v60  ;;  %v12809_v52 = vsub.f32 %v12775_v32, %v3944_v4 }
 0x1c8   : > { %v7733_v15 = vpop.f32.mrb[6].mxu1 }
 0x1c9   : > { %v7734_v5 = vpop.f32.mrb[7].mxu1  ;;  %9807 = vmatpush3.bf16.msra.mxu0 %v9806_v19  ;;  %v3947_v19 = vand.u32 4294901760, %v12777_v10 }
 0x1ca   : > { %v7735_v49 = vadd.f32 %v7734_v5, %v7733_v15  ;;  %9831 = vmatpush3.bf16.msra.mxu1 %v12583_v29  ;;  %9841 = vmatprep.subr.bf16.mxu0 %v9840_v42  ;;  %v12801_v42 = vld [vmem:[#allocation5 + $0x408] sm:$0xff]  ;;  %v15503_v15 = vand.u32 4294901760, %v12459_v27  ;;  %v15505_v27 = vand.u32 4294901760, %v12470_v36  ;;  %v322_v36 = vld [vmem:[#allocation5 + $0x418] sm:$0xff] }
 0x1cb   : > { %9833 = vmatprep.subr.bf16.mxu1 %v12607_v34  ;;  %v12813_v1 = vsub.f32 %v12777_v10, %v3947_v19  ;;  %v3899_v8 = vand.u32 4294901760, %v12801_v42  ;;  %v15506_v10 = vand.u32 4294901760, %v12492_v39 }
 0x1cc   : > { %v12791_v24 = vadd.f32 %v7735_v49, %v1418_v28  ;;  %3510 = vmatmul.mubr.f32.vlgmr.msra.gmra.mrb[20].mxu0 %v12661_v46  ;;  %v15502_v28 = vand.u32 4294901760, %v12447_v54  ;;  %v12818_v49 = vld [vmem:[#allocation5 + $0x498] sm:$0xff]  ;;  %v15504_v54 = vand.u32 4294901760, %v12468_v23  ;;  %v12837_v23 = vsub.f32 %v12794_v18, %v15054_v43 }
 0x1cd   : > { %9843 = vmatpush3.bf16.msra.mxu0 %v9842_v13  ;;  %3784 = vmatprep.mubr.f32.mxu0 %v15501_v48  ;;  %v12816_v13 = vld [vmem:[#allocation5 + $0x490] sm:$0xff]  ;;  %v3953_v21 = vand.u32 4294901760, %v12818_v49  ;;  %v15513_v43 = vand.u32 4294901760, %v12546_v56 }
 0x1ce   : > { %9835 = vmatpush3.bf16.msra.mxu1 %v12664_v33  ;;  %9845 = vmatprep.subr.bf16.mxu0 %v9844_v61  ;;  %v9848_v5 = vpack.c.bf16 %v15503_v15, %v15502_v28  ;;  %v9850_v32 = vpack.c.bf16 %v15505_v27, %v15504_v54  ;;  %v9852_v61 = vpack.c.bf16 %v15507_v12, %v15506_v10  ;;  %v3950_v60 = vand.u32 4294901760, %v12816_v13  ;;  %v321_v28 = vld [vmem:[#allocation5 + $0x410] sm:$0xff] }
 0x1cf   : > { %9837 = vmatprep.subr.bf16.mxu1 %v12690_v45  ;;  %v15509_v15 = vand.u32 4294901760, %v15480_v37  ;;  %v15510_v54 = vand.u32 4294901760, %v12521_v26  ;;  %v15511_v27 = vand.u32 4294901760, %v12535_v9  ;;  %v15512_v12 = vand.u32 4294901760, %v12661_v46  ;;  %v339_v46 = vld [vmem:[#allocation5 + $0x4a0] sm:$0xff] }
 0x1d0   : > { %v9858_v39 = vpack.c.bf16 %v15514_v38, %v15513_v43  ;;  %v15515_v37 = vand.u32 4294901760, %v12573_v30  ;;  %v15516_v26 = vand.u32 4294901760, %v12575_v47  ;;  %v15517_v9 = vand.u32 4294901760, %v12586_v6  ;;  %v340_v47 = vld [vmem:[#allocation5 + $0x4a8] sm:$0xff] }
 0x1d1   : > { %9847 = vmatpush3.bf16.msra.mxu0 %v9846_v63  ;;  %v15059_v63 = vand.u32 4294901760, %v12809_v52  ;;  %v9856_v10 = vpack.c.bf16 %v15511_v27, %v15510_v54  ;;  %v3902_v54 = vand.u32 4294901760, %v321_v28  ;;  %v12869_v56 = vsub.f32 %v12816_v13, %v3950_v60 }
 0x1d2   : > { %9839 = vmatpush3.bf16.msra.mxu1 %v12714_v17  ;;  %9849 = vmatprep.subr.bf16.mxu0 %v9848_v5  ;;  %v9854_v5 = vpack.c.bf16 %v15509_v15, %v15508_v16  ;;  %v9860_v16 = vpack.c.bf16 %v15516_v26, %v15515_v37  ;;  %v15518_v15 = vand.u32 4294901760, %v15485_v58  ;;  %v12872_v40 = vsub.f32 %v12818_v49, %v3953_v21  ;;  %v184_v58 = vld [vmem:[%s11021_s29 + $0x48] sm:$0xff] }
 0x1d3   : > { %9873 = vmatprep.subr.bf16.mxu1 %v15478_v35  ;;  %v12849_v35 = vsub.f32 %v12801_v42, %v3899_v8  ;;  %v3905_v30 = vand.u32 4294901760, %v322_v36  ;;  %v4123_v6 = vsub.f32 %v12809_v52, %v15059_v63  ;;  %v15519_v43 = vand.u32 4294901760, %v15487_v31 }
 0x1d4   : > { %v12865_v42 = vpack.c.bf16 %v15518_v15, %v15517_v9  ;;  %v15521_v13 = vand.u32 4294901760, %v12646_v25  ;;  %v15522_v49 = vand.u32 4294901760, %v12648_v50  ;;  %v15523_v27 = vand.u32 4294901760, %v12813_v1  ;;  %v324_v9 = vld [vmem:[#allocation5 + $0x428] sm:$0xff] }
 0x1d5   : > { %3618 = vmatmul.mubr.f32.vlgmr.msra.gmra.mrb[20].mxu1 %v15512_v12  ;;  %9851 = vmatpush3.bf16.msra.mxu0 %v9850_v32  ;;  %v15524_v31 = vand.u32 4294901760, %v12654_v14  ;;  %v15526_v25 = vand.u32 4294901760, %v12678_v3  ;;  %v15527_v50 = vand.u32 4294901760, %v12681_v20  ;;  %v12908_v26 = vpack.c.bf16 %v3947_v19, %v3944_v4 }
 0x1d6   : > { %9875 = vmatpush3.bf16.msra.mxu1 %v15481_v57  ;;  %9853 = vmatprep.subr.bf16.mxu0 %v9852_v61  ;;  %v15520_v57 = vand.u32 4294901760, %v12615_v0  ;;  %v12889_v61 = vpack.c.bf16 %v15522_v49, %v15521_v13  ;;  %v4130_v12 = vsub.f32 %v12813_v1, %v15523_v27  ;;  %v15525_v0 = vand.u32 4294901760, %v12657_v59 }
 0x1d7   : > { %9877 = vmatprep.subr.bf16.mxu1 %v15482_v53  ;;  %3888 = vmatprep.mubr.f32.mxu1 %v15501_v48  ;;  %v15058_v53 = vand.u32 4294901760, %v12837_v23  ;;  %v12906_v37 = vpack.c.bf16 %v15527_v50, %v15526_v25  ;;  %v323_v48 = vld [vmem:[#allocation5 + $0x420] sm:$0xff]  ;;  %v15057_v15 = vand.u32 4294901760, %v12849_v35  ;;  %v3956_v14 = vand.u32 4294901760, %v339_v46  ;;  %v342_v25 = vld [vmem:[#allocation5 + $0x4b8] sm:$0xff] }
 0x1d8   : > { %v12883_v32 = vpack.c.bf16 %v15520_v57, %v15519_v43  ;;  %v12900_v38 = vpack.c.bf16 %v15525_v0, %v15524_v31  ;;  %v12911_v43 = vsub.f32 %v321_v28, %v3902_v54  ;;  %v3959_v57 = vand.u32 4294901760, %v340_v47  ;;  %v341_v0 = vld [vmem:[#allocation5 + $0x4b0] sm:$0xff] }
 0x1d9   : > { %9855 = vmatpush3.bf16.msra.mxu0 %v9854_v5  ;;  %v12913_v59 = vand.u32 4294901760, %v184_v58  ;;  %v12916_v3 = vsub.f32 %v322_v36, %v3905_v30  ;;  %v4124_v20 = vand.u32 4294901760, %v4123_v6  ;;  %v15056_v4 = vand.u32 4294901760, %v12869_v56 }
 0x1da   : > { %9879 = vmatpush3.bf16.msra.mxu1 %v12443_v7  ;;  %9857 = vmatprep.subr.bf16.mxu0 %v9856_v10  ;;  %v15055_v19 = vand.u32 4294901760, %v12872_v40  ;;  %v4131_v13 = vand.u32 4294901760, %v4130_v12  ;;  %v3908_v5 = vand.u32 4294901760, %v323_v48  ;;  %v3911_v28 = vand.u32 4294901760, %v324_v9 }
 0x1db   : > { %15528 = vst [vmem:[#allocation11_spill] sm:$0xff] %v12913_v59  ;;  %9881 = vmatprep.subr.bf16.mxu1 %v15484_v41  ;;  %v4011_v49 = vsub.f32 %v12837_v23, %v15058_v53  ;;  %v15529_v27 = vand.u32 4294901760, %v12794_v18  ;;  %v12928_v36 = vpack.c.bf16 %v3953_v21, %v3950_v60  ;;  %v12930_v10 = vpack.c.bf16 %v3905_v30, %v3902_v54  ;;  %v325_v21 = vld [vmem:[#allocation5 + $0x430] sm:$0xff] }
 0x1dc   : > { %v4018_v6 = vsub.f32 %v12849_v35, %v15057_v15  ;;  %v12935_v41 = vpack.c.bf16 %v3959_v57, %v3956_v14  ;;  %v12937_v12 = vsub.f32 %v339_v46, %v3956_v14  ;;  %v12939_v31 = vsub.f32 %v340_v47, %v3959_v57  ;;  %v344_v15 = vld [vmem:[#allocation5 + $0x4c8] sm:$0xff] }
 0x1dd   : > { %v12926_v7 = vpack.c.bf16 %v3899_v8, %v15529_v27  ;;  %15531 = vst [vmem:[#allocation17_spill] sm:$0xff] %v12928_v36  ;;  %9859 = vmatpush3.bf16.msra.mxu0 %v9858_v39  ;;  %v12942_v18 = vsub.f32 %v184_v58, %v12913_v59  ;;  %v4137_v8 = vsub.f32 %v12869_v56, %v15056_v4  ;;  %v326_v39 = vld [vmem:[#allocation5 + $0x438] sm:$0xff]  ;;  %v15061_v54 = vand.u32 4294901760, %v12911_v43  ;;  %v343_v4 = vld [vmem:[#allocation5 + $0x4c0] sm:$0xff] }
 0x1de   : > { %15532 = vst [vmem:[#allocation16_spill] sm:$0xff] %v12935_v41  ;;  %9883 = vmatpush3.bf16.msra.mxu1 %v15486_v11  ;;  %9861 = vmatprep.subr.bf16.mxu0 %v9860_v16  ;;  %v4144_v60 = vsub.f32 %v12872_v40, %v15055_v19  ;;  %v15060_v30 = vand.u32 4294901760, %v12916_v3  ;;  %v12954_v47 = vpack.c.bf16 %v4131_v13, %v4124_v20  ;;  %v4012_v58 = vand.u32 4294901760, %v4011_v49 }
 0x1df   : > { %15530 = vst [vmem:[#allocation15_spill] sm:$0xff] %v12926_v7  ;;  %v7768_v46 = vpop.f32.mrb[8].mxu0  ;;  %9885 = vmatprep.subr.bf16.mxu1 %v15488_v62  ;;  %v12956_v11 = vpack.c.bf16 %v3911_v28, %v3908_v5  ;;  %v12958_v16 = vsub.f32 %v323_v48, %v3908_v5  ;;  %v12960_v14 = vsub.f32 %v324_v9, %v3911_v28  ;;  %v4019_v57 = vand.u32 4294901760, %v4018_v6 }
 0x1e0   : > { %v7769_v50 = vpop.f32.mrb[9].mxu0  ;;  %v3962_v27 = vand.u32 4294901760, %v341_v0  ;;  %v3965_v19 = vand.u32 4294901760, %v342_v25  ;;  %v3914_v63 = vand.u32 4294901760, %v325_v21  ;;  %v3917_v62 = vand.u32 4294901760, %v326_v39 }
 0x1e1   : > { %15533 = vst [vmem:[#allocation21_spill] sm:$0xff] %v12956_v11  ;;  %v7770_v53 = vadd.f32 %v7769_v50, %v7768_v46  ;;  %9863 = vmatpush3.bf16.msra.mxu0 %v12865_v42  ;;  %v15065_v20 = vand.u32 4294901760, %v12942_v18  ;;  %v4138_v48 = vand.u32 4294901760, %v4137_v8  ;;  %v4145_v13 = vand.u32 4294901760, %v4144_v60 }
 0x1e2   : > { %9887 = vmatpush3.bf16.msra.mxu1 %v15489_v51  ;;  %9865 = vmatprep.subr.bf16.mxu0 %v12883_v32  ;;  %v4025_v9 = vsub.f32 %v12911_v43, %v15061_v54  ;;  %v4032_v5 = vsub.f32 %v12916_v3, %v15060_v30  ;;  %v3968_v28 = vand.u32 4294901760, %v343_v4  ;;  %v3971_v49 = vand.u32 4294901760, %v344_v15 }
 0x1e3   : > { %v1788_v42 = vadd.f32 %v7770_v53, %v12791_v24  ;;  %9889 = vmatprep.subr.bf16.mxu1 %v15490_v2  ;;  %v15063_v51 = vand.u32 4294901760, %v12937_v12  ;;  %v12975_v6 = vpack.c.bf16 %v4019_v57, %v4012_v58  ;;  %v12977_v32 = vpack.c.bf16 %v3965_v19, %v3962_v27  ;;  %v327_v24 = vld [vmem:[#allocation5 + $0x440] sm:$0xff]  ;;  %v328_v2 = vld [vmem:[#allocation5 + $0x448] sm:$0xff] }
 0x1e4   : > { %v12979_v8 = vsub.f32 %v341_v0, %v3962_v27  ;;  %v15062_v60 = vand.u32 4294901760, %v12939_v31  ;;  %v12983_v46 = vsub.f32 %v342_v25, %v3965_v19  ;;  %v12985_v50 = vpack.c.bf16 %v3917_v62, %v3914_v63 }
 0x1e5   : > { %15534 = vst [vmem:[#allocation19_spill] sm:$0xff] %v12977_v32  ;;  %9867 = vmatpush3.bf16.msra.mxu0 %v12889_v61  ;;  %v15064_v53 = vand.u32 4294901760, %v12958_v16  ;;  %v3994_v58 = vsub.f32 %v12942_v18, %v15065_v20  ;;  %v12993_v0 = vsub.f32 %v325_v21, %v3914_v63  ;;  %v12995_v57 = vsub.f32 %v326_v39, %v3917_v62  ;;  %v345_v62 = vld [vmem:[#allocation5 + $0x4d0] sm:$0xff] }
 0x1e6   : > { %15535 = vst [vmem:[#allocation24_spill] sm:$0xff] %v12985_v50  ;;  %9891 = vmatpush3.bf16.msra.mxu1 %v15491_v55  ;;  %9869 = vmatprep.subr.bf16.mxu0 %v12900_v38  ;;  %v4026_v61 = vand.u32 4294901760, %v4025_v9  ;;  %v15066_v19 = vand.u32 4294901760, %v12960_v14  ;;  %v12999_v25 = vpack.c.bf16 %v4145_v13, %v4138_v48  ;;  %v4033_v27 = vand.u32 4294901760, %v4032_v5  ;;  %v346_v13 = vld [vmem:[#allocation5 + $0x4d8] sm:$0xff]  ;;  %v329_v9 = vld [vmem:[#allocation5 + $0x450] sm:$0xff] }
 0x1e7   : > { %15536 = vst [vmem:[#allocation20_spill] sm:$0xff] %v12993_v0  ;;  %15537 = vst [vmem:[#allocation25_spill] sm:$0xff] %v12995_v57  ;;  %9893 = vmatprep.subr.bf16.mxu1 %v15494_v22  ;;  %v13001_v30 = vpack.c.bf16 %v3971_v49, %v3968_v28  ;;  %v4151_v55 = vsub.f32 %v12937_v12, %v15063_v51  ;;  %v13006_v38 = vsub.f32 %v343_v4, %v3968_v28 }
 0x1e8   : > { %v7803_v54 = vpop.f32.mrb[8].mxu1  ;;  %v4158_v63 = vsub.f32 %v12939_v31, %v15062_v60  ;;  %v3920_v21 = vand.u32 4294901760, %v327_v24  ;;  %v3923_v39 = vand.u32 4294901760, %v328_v2  ;;  %v4039_v48 = vsub.f32 %v12958_v16, %v15064_v53 }
 0x1e9   : > { %15538 = vst [vmem:[#allocation22_spill] sm:$0xff] %v13001_v30  ;;  %v7804_v22 = vpop.f32.mrb[9].mxu1  ;;  %9871 = vmatpush3.bf16.msra.mxu0 %v12906_v37  ;;  %v3995_v5 = vand.u32 4294901760, %v3994_v58  ;;  %v4046_v60 = vsub.f32 %v12960_v14, %v15066_v19  ;;  %v13025_v53 = vpack.c.bf16 %v4033_v27, %v4026_v61  ;;  %v13027_v20 = vsub.f32 %v344_v15, %v3971_v49  ;;  %v330_v37 = vld [vmem:[#allocation5 + $0x458] sm:$0xff] }
 0x1ea   : > { %v7805_v28 = vadd.f32 %v7804_v22, %v7803_v54  ;;  %9895 = vmatpush3.bf16.msra.mxu1 %v12583_v29  ;;  %9905 = vmatprep.subr.bf16.mxu0 %v12908_v26  ;;  %v4152_v58 = vand.u32 4294901760, %v4151_v55  ;;  %v3974_v54 = vand.u32 4294901760, %v345_v62  ;;  %v4159_v29 = vand.u32 4294901760, %v4158_v63 }
 0x1eb   : > { %9897 = vmatprep.subr.bf16.mxu1 %v12607_v34  ;;  %v13032_v4 = vsub.f32 %v327_v24, %v3920_v21  ;;  %v3977_v19 = vand.u32 4294901760, %v346_v13  ;;  %v13035_v51 = vpack.c.bf16 %v3923_v39, %v3920_v21  ;;  %v15540_v34 = vand.u32 4294901760, %v12979_v8 }
 0x1ec   : > { %v13029_v22 = vadd.f32 %v7805_v28, %v1788_v42  ;;  %3786 = vmatmul.mubr.f32.vlgmr.msra.gmra.mrb[22].mxu0 %v12638_v44  ;;  %v15541_v49 = vand.u32 4294901760, %v12983_v46  ;;  %v4040_v24 = vand.u32 4294901760, %v4039_v48  ;;  %v4047_v61 = vand.u32 4294901760, %v4046_v60  ;;  %v347_v28 = vld [vmem:[#allocation5 + $0x4e0] sm:$0xff] }
 0x1ed   : > { %9907 = vmatpush3.bf16.msra.mxu0 %v12926_v7  ;;  %15539 = vst [vmem:[#allocation14_spill] sm:$0xff] %v13035_v51  ;;  %v4165_v15 = vsub.f32 %v12979_v8, %v15540_v34  ;;  %3996 = vmatprep.mubr.f32.mxu0 %v3995_v5  ;;  %v15542_v27 = vand.u32 4294901760, %v12993_v0  ;;  %v15543_v63 = vand.u32 4294901760, %v12995_v57  ;;  %v348_v34 = vld [vmem:[#allocation5 + $0x4e8] sm:$0xff]  ;;  %v3926_v5 = vand.u32 4294901760, %v329_v9 }
 0x1ee   : > { %v4172_v42 = vsub.f32 %v12983_v46, %v15541_v49  ;;  %9899 = vmatpush3.bf16.msra.mxu1 %v12664_v33  ;;  %9909 = vmatprep.subr.bf16.mxu0 %v12928_v36  ;;  %v13052_v49 = vsub.f32 %v328_v2, %v3923_v39  ;;  %v3929_v33 = vand.u32 4294901760, %v330_v37  ;;  %v15075_v36 = vand.u32 4294901760, %v13006_v38 }
 0x1ef   : > { %v4053_v55 = vsub.f32 %v12993_v0, %v15542_v27  ;;  %v4060_v21 = vsub.f32 %v12995_v57, %v15543_v63  ;;  %9901 = vmatprep.subr.bf16.mxu1 %v12690_v45  ;;  %v13055_v48 = vpack.c.bf16 %v4159_v29, %v4152_v58  ;;  %v13057_v60 = vpack.c.bf16 %v3977_v19, %v3974_v54 }
 0x1f0   : > { %v13059_v7 = vsub.f32 %v345_v62, %v3974_v54  ;;  %v13061_v27 = vsub.f32 %v346_v13, %v3977_v19  ;;  %v4166_v63 = vand.u32 4294901760, %v4165_v15  ;;  %v4173_v57 = vand.u32 4294901760, %v4172_v42  ;;  %v331_v62 = vld [vmem:[#allocation5 + $0x460] sm:$0xff]  ;;  %v332_v54 = vld [vmem:[#allocation5 + $0x468] sm:$0xff] }
 0x1f1   : > { %15544 = vst [vmem:[#allocation18_spill] sm:$0xff] %v13057_v60  ;;  %9911 = vmatpush3.bf16.msra.mxu0 %v12930_v10  ;;  %v3980_v0 = vand.u32 4294901760, %v347_v28  ;;  %v3983_v45 = vand.u32 4294901760, %v348_v34  ;;  %v13066_v2 = vpack.c.bf16 %v4047_v61, %v4040_v24  ;;  %v4054_v39 = vand.u32 4294901760, %v4053_v55  ;;  %v13083_v61 = vld [vmem:[#allocation5 + $0x4f0] sm:$0xff] }
 0x1f2   : > { %15545 = vst [vmem:[#allocation12_spill] sm:$0xff] %v13061_v27  ;;  %9903 = vmatpush3.bf16.msra.mxu1 %v12714_v17  ;;  %9913 = vmatprep.subr.bf16.mxu0 %v12935_v41  ;;  %v4061_v58 = vand.u32 4294901760, %v4060_v21  ;;  %v15076_v29 = vand.u32 4294901760, %v13027_v20  ;;  %v13070_v19 = vpack.c.bf16 %v3929_v33, %v3926_v5  ;;  %v13072_v13 = vsub.f32 %v329_v9, %v3926_v5 }
 0x1f3   : > { %9937 = vmatprep.subr.bf16.mxu1 %v12954_v47  ;;  %v13077_v17 = vsub.f32 %v13006_v38, %v15075_v36  ;;  %v13080_v42 = vsub.f32 %v330_v37, %v3929_v33  ;;  %v13085_v47 = vld [vmem:[#allocation5 + $0x4f8] sm:$0xff]  ;;  %v15083_v9 = vand.u32 4294901760, %v13059_v7  ;;  %v9948_v21 = vpack.c.bf16 %v4173_v57, %v4166_v63  ;;  %v183_v33 = vld [vmem:[%s11021_s29 + $0x40] sm:$0xff] }
 0x1f4   : > { %v13091_v5 = vpack.c.bf16 %v3983_v45, %v3980_v0  ;;  %v13093_v36 = vsub.f32 %v347_v28, %v3980_v0  ;;  %v3932_v37 = vand.u32 4294901760, %v331_v62  ;;  %v9950_v24 = vpack.c.bf16 %v4061_v58, %v4054_v39  ;;  %v13110_v39 = vld [vmem:[#allocation5 + $0x470] sm:$0xff] }
 0x1f5   : > { %15546 = vst [vmem:[#allocation23_spill] sm:$0xff] %v13080_v42  ;;  %3890 = vmatmul.mubr.f32.vlgmr.msra.gmra.mrb[22].mxu1 %v12638_v44  ;;  %9915 = vmatpush3.bf16.msra.mxu0 %v12956_v11  ;;  %v13098_v15 = vsub.f32 %v348_v34, %v3983_v45  ;;  %v4186_v44 = vsub.f32 %v13027_v20, %v15076_v29  ;;  %v3935_v55 = vand.u32 4294901760, %v332_v54  ;;  %v4180_v57 = vand.u32 4294901760, %v13077_v17  ;;  %v13112_v34 = vld [vmem:[#allocation5 + $0x478] sm:$0xff] }
 0x1f6   : > { %15547 = vst [vmem:[#allocation13_spill] sm:$0xff] %v13093_v36  ;;  %9939 = vmatpush3.bf16.msra.mxu1 %v12975_v6  ;;  %9917 = vmatprep.subr.bf16.mxu0 %v12977_v32  ;;  %v15548_v0 = vand.u32 4294901760, %v13032_v4  ;;  %v3986_v6 = vand.u32 4294901760, %v13083_v61  ;;  %v3989_v63 = vand.u32 4294901760, %v13085_v47  ;;  %v15549_v45 = vand.u32 4294901760, %v13052_v49 }
 0x1f7   : > { %9941 = vmatprep.subr.bf16.mxu1 %v12999_v25  ;;  %4232 = vmatprep.mubr.f32.mxu1 %v12913_v59  ;;  %v4193_v58 = vsub.f32 %v13059_v7, %v15083_v9  ;;  %v15550_v17 = vand.u32 4294901760, %v13061_v27  ;;  %v13124_v29 = vand.u32 4294901760, %v183_v33  ;;  %v13127_v32 = vsub.f32 %v331_v62, %v3932_v37 }
 0x1f8   : > { %v4067_v28 = vsub.f32 %v13032_v4, %v15548_v0  ;;  %v4074_v25 = vsub.f32 %v13052_v49, %v15549_v45  ;;  %v4187_v9 = vand.u32 4294901760, %v4186_v44  ;;  %v13134_v41 = vsub.f32 %v332_v54, %v3935_v55 }
 0x1f9   : > { %v4200_v0 = vsub.f32 %v13061_v27, %v15550_v17  ;;  %9919 = vmatpush3.bf16.msra.mxu0 %v12985_v50  ;;  %v3938_v17 = vand.u32 4294901760, %v13110_v39  ;;  %v3941_v27 = vand.u32 4294901760, %v13112_v34  ;;  %v13140_v59 = vsub.f32 %v13083_v61, %v3986_v6 }
 0x1fa   : > { %9943 = vmatpush3.bf16.msra.mxu1 %v13025_v53  ;;  %9921 = vmatprep.subr.bf16.mxu0 %v13001_v30  ;;  %v4068_v62 = vand.u32 4294901760, %v4067_v28  ;;  %v13143_v11 = vsub.f32 %v13085_v47, %v3989_v63  ;;  %v4075_v45 = vand.u32 4294901760, %v4074_v25  ;;  %v4194_v30 = vand.u32 4294901760, %v4193_v58 }
 0x1fb   : > { %9945 = vmatprep.subr.bf16.mxu1 %v13055_v48  ;;  %v4201_v44 = vand.u32 4294901760, %v4200_v0  ;;  %v13147_v54 = vsub.f32 %v183_v33, %v13124_v29  ;;  %v13150_v50 = vpack.c.bf16 %v3935_v55, %v3932_v37  ;;  %v15551_v48 = vand.u32 4294901760, %v13072_v13 }
 0x1fc   : > { %v15552_v28 = vand.u32 4294901760, %v13080_v42  ;;  %v15553_v53 = vand.u32 4294901760, %v13093_v36  ;;  %v13164_v33 = vsub.f32 %v13110_v39, %v3938_v17  ;;  %v13167_v55 = vsub.f32 %v13112_v34, %v3941_v27 }
 0x1fd   : > { %9923 = vmatpush3.bf16.msra.mxu0 %v13035_v51  ;;  %v4081_v61 = vsub.f32 %v13072_v13, %v15551_v48  ;;  %v15103_v58 = vand.u32 4294901760, %v13134_v41  ;;  %v9952_v48 = vpack.c.bf16 %v4187_v9, %v4180_v57  ;;  %v9954_v51 = vpack.c.bf16 %v4075_v45, %v4068_v62 }
 0x1fe   : > { %v4088_v47 = vsub.f32 %v13080_v42, %v15552_v28  ;;  %v4207_v25 = vsub.f32 %v13093_v36, %v15553_v53  ;;  %9947 = vmatpush3.bf16.msra.mxu1 %v13066_v2  ;;  %9925 = vmatprep.subr.bf16.mxu0 %v13057_v60  ;;  %v15554_v28 = vand.u32 4294901760, %v13098_v15  ;;  %v15102_v2 = vand.u32 4294901760, %v13140_v59 }
 0x1ff   : > { %v7838_v0 = vpop.f32.mrb[10].mxu0  ;;  %9949 = vmatprep.subr.bf16.mxu1 %v9948_v21  ;;  %v13176_v36 = vpack.c.bf16 %v3989_v63, %v3986_v6  ;;  %v9956_v34 = vpack.c.bf16 %v4201_v44, %v4194_v30  ;;  %v15104_v37 = vand.u32 4294901760, %v13147_v54  ;;  %v4082_v21 = vand.u32 4294901760, %v4081_v61 }
 0x200   : > { %v4214_v53 = vsub.f32 %v13098_v15, %v15554_v28  ;;  %v7839_v39 = vpop.f32.mrb[11].mxu0  ;;  %v4089_v9 = vand.u32 4294901760, %v4088_v47  ;;  %v4208_v57 = vand.u32 4294901760, %v4207_v25  ;;  %v15555_v28 = vand.u32 4294901760, %v13127_v32 }
 0x201   : > { %v7840_v42 = vadd.f32 %v7839_v39, %v7838_v0  ;;  %9927 = vmatpush3.bf16.msra.mxu0 %v13070_v19  ;;  %v4102_v6 = vsub.f32 %v13134_v41, %v15103_v58  ;;  %v15100_v30 = vand.u32 4294901760, %v13164_v33  ;;  %v15101_v63 = vand.u32 4294901760, %v13167_v55 }
 0x202   : > { %9951 = vmatpush3.bf16.msra.mxu1 %v9950_v24  ;;  %9929 = vmatprep.subr.bf16.mxu0 %v13091_v5  ;;  %v4095_v60 = vsub.f32 %v13127_v32, %v15555_v28  ;;  %v4215_v62 = vand.u32 4294901760, %v4214_v53  ;;  %v4221_v24 = vsub.f32 %v13140_v59, %v15102_v2  ;;  %v15556_v44 = vand.u32 4294901760, %v13143_v11 }
 0x203   : > { %v2064_v45 = vadd.f32 %v7840_v42, %v13029_v22  ;;  %9953 = vmatprep.subr.bf16.mxu1 %v9952_v48  ;;  %v4000_v47 = vsub.f32 %v13147_v54, %v15104_v37  ;;  %v13200_v25 = vpack.c.bf16 %v3941_v27, %v3938_v17  ;;  %v9958_v0 = vpack.c.bf16 %v4089_v9, %v4082_v21 }
 0x204   : > { %v4228_v61 = vsub.f32 %v13143_v11, %v15556_v44  ;;  %v9968_v22 = vpack.c.bf16 %v12813_v1, %v12809_v52  ;;  %v4096_v42 = vand.u32 4294901760, %v4095_v60  ;;  %v4103_v48 = vand.u32 4294901760, %v4102_v6 }
 0x205   : > { %9931 = vmatpush3.bf16.msra.mxu0 %v13150_v50  ;;  %v4109_v53 = vsub.f32 %v13164_v33, %v15100_v30  ;;  %v4116_v39 = vsub.f32 %v13167_v55, %v15101_v63  ;;  %v9960_v27 = vpack.c.bf16 %v4215_v62, %v4208_v57  ;;  %v4222_v17 = vand.u32 4294901760, %v4221_v24 }
 0x206   : > { %9955 = vmatpush3.bf16.msra.mxu1 %v9954_v51  ;;  %9933 = vmatprep.subr.bf16.mxu0 %v13176_v36  ;;  %v4229_v21 = vand.u32 4294901760, %v4228_v61  ;;  %v4001_v28 = vand.u32 4294901760, %v4000_v47  ;;  %v9970_v51 = vpack.c.bf16 %v12849_v35, %v12837_v23  ;;  %v9972_v60 = vpack.c.bf16 %v12872_v40, %v12869_v56 }
 0x207   : > { %9957 = vmatprep.subr.bf16.mxu1 %v9956_v34  ;;  %v9962_v30 = vpack.c.bf16 %v4103_v48, %v4096_v42  ;;  %v4110_v63 = vand.u32 4294901760, %v4109_v53  ;;  %v4117_v34 = vand.u32 4294901760, %v4116_v39  ;;  %v9974_v24 = vpack.c.bf16 %v12916_v3, %v12911_v43  ;;  %v15559_v42 = vld [vmem:[#allocation15_spill] sm:$0xff]  ;;  %v15560_v53 = vld [vmem:[#allocation17_spill] sm:$0xff] }
 0x208   : > { %v7873_v9 = vpop.f32.mrb[10].mxu1  ;;  %v9964_v57 = vpack.c.bf16 %v4229_v21, %v4222_v17  ;;  %v9976_v47 = vpack.c.bf16 %v12939_v31, %v12937_v12  ;;  %v9984_v48 = vpack.c.bf16 %v13027_v20, %v13006_v38  ;;  %v15561_v39 = vand.u32 4294901760, %v12942_v18  ;;  %v15562_v17 = vld [vmem:[#allocation12_spill] sm:$0xff] }
 0x209   : > { %v7874_v44 = vpop.f32.mrb[11].mxu1  ;;  %9935 = vmatpush3.bf16.msra.mxu0 %v13200_v25  ;;  %v9966_v61 = vpack.c.bf16 %v4117_v34, %v4110_v63  ;;  %v15558_v63 = vld [vmem:[#allocation25_spill] sm:$0xff]  ;;  %v9988_v21 = vpack.c.bf16 %v15562_v17, %v13059_v7  ;;  %v15567_v34 = vld [vmem:[#allocation19_spill] sm:$0xff]  ;;  %v15575_v2 = vand.u32 4294901760, %v12849_v35  ;;  %v15578_v35 = vand.u32 4294901760, %v12911_v43 }
 0x20a   : > { %v7875_v6 = vadd.f32 %v7874_v44, %v7873_v9  ;;  %9959 = vmatpush3.bf16.msra.mxu1 %v9958_v0  ;;  %9969 = vmatprep.subr.bf16.mxu0 %v9968_v22  ;;  %v9978_v0 = vpack.c.bf16 %v12960_v14, %v12958_v16  ;;  %v15563_v9 = vld [vmem:[#allocation16_spill] sm:$0xff] }
 0x20b   : > { %9961 = vmatprep.subr.bf16.mxu1 %v9960_v27  ;;  %v9986_v27 = vpack.c.bf16 %v13052_v49, %v13032_v4 }
 0x20c   : > { %v2168_v62 = vadd.f32 %v7875_v6, %v2064_v45  ;;  %4002 = vmatmul.mubr.f32.vlgmr.msra.gmra.mrb[24].mxu0 %v4001_v28  ;;  %v9980_v45 = vpack.c.bf16 %v12983_v46, %v12979_v8  ;;  %v15564_v28 = vld [vmem:[#allocation23_spill] sm:$0xff] }
 0x20d   : > { %9971 = vmatpush3.bf16.msra.mxu0 %v9970_v51  ;;  %4369 = vmatprep.mubr.f32.mxu0 %v12942_v18  ;;  %v9990_v44 = vpack.c.bf16 %v15564_v28, %v13072_v13  ;;  %v15565_v51 = vld [vmem:[#allocation21_spill] sm:$0xff] }
 0x20e   : > { %9963 = vmatpush3.bf16.msra.mxu1 %v9962_v30  ;;  %9973 = vmatprep.subr.bf16.mxu0 %v9972_v60  ;;  %v15557_v30 = vld [vmem:[#allocation20_spill] sm:$0xff]  ;;  %v15566_v18 = vld [vmem:[#allocation13_spill] sm:$0xff] }
 0x20f   : > { %9965 = vmatprep.subr.bf16.mxu1 %v9964_v57  ;;  %v9982_v22 = vpack.c.bf16 %v15558_v63, %v15557_v30  ;;  %v9992_v60 = vpack.c.bf16 %v13098_v15, %v15566_v18 }
 0x211   : > { %9975 = vmatpush3.bf16.msra.mxu0 %v9974_v24 }
 0x212   : > { %9967 = vmatpush3.bf16.msra.mxu1 %v9966_v61  ;;  %9977 = vmatprep.subr.bf16.mxu0 %v9976_v47  ;;  %v9994_v61 = vpack.c.bf16 %v13134_v41, %v13127_v32  ;;  %v15568_v47 = vld [vmem:[#allocation24_spill] sm:$0xff] }
 0x213   : > { %10001 = vmatprep.subr.bf16.mxu1 %v12908_v26 }
 0x215   : > { %4234 = vmatmul.mubr.f32.vlgmr.msra.gmra.mrb[24].mxu1 %v13124_v29  ;;  %9979 = vmatpush3.bf16.msra.mxu0 %v9978_v0  ;;  %v9996_v0 = vpack.c.bf16 %v13143_v11, %v13140_v59 }
 0x216   : > { %10003 = vmatpush3.bf16.msra.mxu1 %v15559_v42  ;;  %9981 = vmatprep.subr.bf16.mxu0 %v9980_v45 }
 0x217   : > { %10005 = vmatprep.subr.bf16.mxu1 %v15560_v53  ;;  %4476 = vmatprep.mubr.f32.mxu1 %v15561_v39  ;;  %v15570_v39 = vld [vmem:[#allocation14_spill] sm:$0xff] }
 0x219   : > { %9983 = vmatpush3.bf16.msra.mxu0 %v9982_v22  ;;  %v15569_v22 = vld [vmem:[#allocation22_spill] sm:$0xff] }
 0x21a   : > { %10007 = vmatpush3.bf16.msra.mxu1 %v12930_v10  ;;  %9985 = vmatprep.subr.bf16.mxu0 %v9984_v48  ;;  %v9998_v48 = vpack.c.bf16 %v13167_v55, %v13164_v33 }
 0x21b   : > { %10009 = vmatprep.subr.bf16.mxu1 %v15563_v9 }
 0x21d   : > { %9987 = vmatpush3.bf16.msra.mxu0 %v9986_v27  ;;  %v15571_v27 = vand.u32 4294901760, %v12809_v52  ;;  %v15576_v52 = vand.u32 4294901760, %v12869_v56  ;;  %v15579_v56 = vand.u32 4294901760, %v12916_v3 }
 0x21e   : > { %10011 = vmatpush3.bf16.msra.mxu1 %v15565_v51  ;;  %9989 = vmatprep.subr.bf16.mxu0 %v9988_v21  ;;  %v15572_v21 = vand.u32 4294901760, %v12813_v1  ;;  %v15577_v1 = vand.u32 4294901760, %v12872_v40  ;;  %v15580_v40 = vld [vmem:[#allocation11_spill] sm:$0xff] }
 0x21f   : > { %v7908_v6 = vpop.f32.mrb[12].mxu0  ;;  %10013 = vmatprep.subr.bf16.mxu1 %v15567_v34 }
 0x220   : > { %v7909_v57 = vpop.f32.mrb[13].mxu0 }
 0x221   : > { %v7910_v24 = vadd.f32 %v7909_v57, %v7908_v6  ;;  %9991 = vmatpush3.bf16.msra.mxu0 %v9990_v44  ;;  %v10032_v44 = vpack.c.bf16 %v15572_v21, %v15571_v27  ;;  %v15573_v6 = vld [vmem:[#allocation18_spill] sm:$0xff]  ;;  %v10036_v27 = vpack.c.bf16 %v15577_v1, %v15576_v52  ;;  %v15586_v1 = vand.u32 4294901760, %v12983_v46 }
 0x222   : > { %10015 = vmatpush3.bf16.msra.mxu1 %v15568_v47  ;;  %9993 = vmatprep.subr.bf16.mxu0 %v9992_v60  ;;  %v13261_v60 = vld [vmem:[#allocation5 + $0x580] sm:$0xff]  ;;  %v15587_v46 = vand.u32 4294901760, %v15557_v30  ;;  %v15593_v30 = vand.u32 4294901760, %v13052_v49 }
 0x223   : > { %v2280_v45 = vadd.f32 %v7910_v24, %v2168_v62  ;;  %10017 = vmatprep.subr.bf16.mxu1 %v15569_v22  ;;  %v13263_v62 = vld [vmem:[#allocation5 + $0x588] sm:$0xff]  ;;  %v4806_v21 = vand.u32 4294901760, %v13261_v60 }
 0x225   : > { %9995 = vmatpush3.bf16.msra.mxu0 %v9994_v61  ;;  %v15574_v61 = vand.u32 4294901760, %v12837_v23  ;;  %v13280_v23 = vld [vmem:[#allocation5 + $0x500] sm:$0xff] }
 0x226   : > { %10019 = vmatpush3.bf16.msra.mxu1 %v15570_v39  ;;  %9997 = vmatprep.subr.bf16.mxu0 %v9996_v0  ;;  %v15105_v3 = vand.u32 4294901760, %v13280_v23 }
 0x227   : > { %10021 = vmatprep.subr.bf16.mxu1 %v15573_v6  ;;  %v10034_v58 = vpack.c.bf16 %v15575_v2, %v15574_v61  ;;  %v10038_v2 = vpack.c.bf16 %v15579_v56, %v15578_v35  ;;  %v13295_v61 = vsub.f32 %v13261_v60, %v4806_v21 }
 0x228   : > { %v7943_v57 = vpop.f32.mrb[12].mxu1 }
 0x229   : > { %v7944_v24 = vpop.f32.mrb[13].mxu1  ;;  %9999 = vmatpush3.bf16.msra.mxu0 %v9998_v48  ;;  %v4809_v48 = vand.u32 4294901760, %v13263_v62 }
 0x22a   : > { %v7945_v0 = vadd.f32 %v7944_v24, %v7943_v57  ;;  %10023 = vmatpush3.bf16.msra.mxu1 %v13070_v19  ;;  %10033 = vmatprep.subr.bf16.mxu0 %v10032_v44  ;;  %v13287_v44 = vld [vmem:[#allocation5 + $0x508] sm:$0xff]  ;;  %v15582_v57 = vand.u32 4294901760, %v12939_v31  ;;  %v15584_v31 = vand.u32 4294901760, %v12960_v14  ;;  %v354_v14 = vld [vmem:[#allocation5 + $0x518] sm:$0xff] }
 0x22b   : > { %10025 = vmatprep.subr.bf16.mxu1 %v13091_v5  ;;  %v13299_v43 = vsub.f32 %v13263_v62, %v4809_v48  ;;  %v4761_v52 = vand.u32 4294901760, %v13287_v44  ;;  %v15585_v62 = vand.u32 4294901760, %v12979_v8 }
 0x22c   : > { %v13277_v37 = vadd.f32 %v7945_v0, %v2280_v45  ;;  %4372 = vmatmul.mubr.f32.vlgmr.msra.gmra.mrb[26].mxu0 %v13147_v54  ;;  %v15581_v45 = vand.u32 4294901760, %v12937_v12  ;;  %v13304_v0 = vld [vmem:[#allocation5 + $0x598] sm:$0xff]  ;;  %v15583_v12 = vand.u32 4294901760, %v12958_v16  ;;  %v13323_v16 = vsub.f32 %v13280_v23, %v15105_v3 }
 0x22d   : > { %10035 = vmatpush3.bf16.msra.mxu0 %v10034_v58  ;;  %4646 = vmatprep.mubr.f32.mxu0 %v15580_v40  ;;  %v13302_v58 = vld [vmem:[#allocation5 + $0x590] sm:$0xff]  ;;  %v4815_v56 = vand.u32 4294901760, %v13304_v0  ;;  %v15592_v3 = vand.u32 4294901760, %v13032_v4 }
 0x22e   : > { %10027 = vmatpush3.bf16.msra.mxu1 %v13150_v50  ;;  %10037 = vmatprep.subr.bf16.mxu0 %v10036_v27  ;;  %v10040_v24 = vpack.c.bf16 %v15582_v57, %v15581_v45  ;;  %v10042_v60 = vpack.c.bf16 %v15584_v31, %v15583_v12  ;;  %v10044_v27 = vpack.c.bf16 %v15586_v1, %v15585_v62  ;;  %v4812_v35 = vand.u32 4294901760, %v13302_v58  ;;  %v353_v45 = vld [vmem:[#allocation5 + $0x510] sm:$0xff] }
 0x22f   : > { %10029 = vmatprep.subr.bf16.mxu1 %v13176_v36  ;;  %v15588_v57 = vand.u32 4294901760, %v15558_v63  ;;  %v15589_v12 = vand.u32 4294901760, %v13006_v38  ;;  %v15590_v31 = vand.u32 4294901760, %v13027_v20  ;;  %v15591_v1 = vand.u32 4294901760, %v13147_v54  ;;  %v371_v54 = vld [vmem:[#allocation5 + $0x5a0] sm:$0xff] }
 0x230   : > { %v10050_v8 = vpack.c.bf16 %v15593_v30, %v15592_v3  ;;  %v15594_v63 = vand.u32 4294901760, %v13059_v7  ;;  %v15595_v38 = vand.u32 4294901760, %v15562_v17  ;;  %v15596_v20 = vand.u32 4294901760, %v13072_v13  ;;  %v372_v17 = vld [vmem:[#allocation5 + $0x5a8] sm:$0xff] }
 0x231   : > { %10039 = vmatpush3.bf16.msra.mxu0 %v10038_v2  ;;  %v15110_v2 = vand.u32 4294901760, %v13295_v61  ;;  %v10048_v62 = vpack.c.bf16 %v15590_v31, %v15589_v12  ;;  %v4764_v12 = vand.u32 4294901760, %v353_v45  ;;  %v13355_v4 = vsub.f32 %v13302_v58, %v4812_v35 }
 0x232   : > { %10031 = vmatpush3.bf16.msra.mxu1 %v13200_v25  ;;  %10041 = vmatprep.subr.bf16.mxu0 %v10040_v24  ;;  %v10046_v24 = vpack.c.bf16 %v15588_v57, %v15587_v46  ;;  %v10052_v46 = vpack.c.bf16 %v15595_v38, %v15594_v63  ;;  %v15597_v57 = vand.u32 4294901760, %v15564_v28  ;;  %v13358_v49 = vsub.f32 %v13304_v0, %v4815_v56  ;;  %v186_v28 = vld [vmem:[%s11021_s29 + $0x58] sm:$0xff] }
 0x233   : > { %10065 = vmatprep.subr.bf16.mxu1 %v12908_v26  ;;  %v13335_v26 = vsub.f32 %v13287_v44, %v4761_v52  ;;  %v4767_v7 = vand.u32 4294901760, %v354_v14  ;;  %v4985_v13 = vsub.f32 %v13295_v61, %v15110_v2  ;;  %v15598_v3 = vand.u32 4294901760, %v15566_v18 }
 0x234   : > { %v13351_v44 = vpack.c.bf16 %v15597_v57, %v15596_v20  ;;  %v15600_v58 = vand.u32 4294901760, %v13127_v32  ;;  %v15601_v0 = vand.u32 4294901760, %v13134_v41  ;;  %v15602_v31 = vand.u32 4294901760, %v13299_v43  ;;  %v356_v20 = vld [vmem:[#allocation5 + $0x528] sm:$0xff] }
 0x235   : > { %4480 = vmatmul.mubr.f32.vlgmr.msra.gmra.mrb[26].mxu1 %v15591_v1  ;;  %10043 = vmatpush3.bf16.msra.mxu0 %v10042_v60  ;;  %v15603_v18 = vand.u32 4294901760, %v13140_v59  ;;  %v15605_v32 = vand.u32 4294901760, %v13164_v33  ;;  %v15606_v41 = vand.u32 4294901760, %v13167_v55  ;;  %v13394_v38 = vpack.c.bf16 %v4809_v48, %v4806_v21 }
 0x236   : > { %10067 = vmatpush3.bf16.msra.mxu1 %v15559_v42  ;;  %10045 = vmatprep.subr.bf16.mxu0 %v10044_v27  ;;  %v15599_v42 = vand.u32 4294901760, %v13098_v15  ;;  %v13375_v27 = vpack.c.bf16 %v15601_v0, %v15600_v58  ;;  %v4992_v1 = vsub.f32 %v13299_v43, %v15602_v31  ;;  %v15604_v15 = vand.u32 4294901760, %v13143_v11 }
 0x237   : > { %10069 = vmatprep.subr.bf16.mxu1 %v15560_v53  ;;  %4750 = vmatprep.mubr.f32.mxu1 %v15580_v40  ;;  %v15109_v53 = vand.u32 4294901760, %v13323_v16  ;;  %v13392_v63 = vpack.c.bf16 %v15606_v41, %v15605_v32  ;;  %v355_v40 = vld [vmem:[#allocation5 + $0x520] sm:$0xff]  ;;  %v15108_v57 = vand.u32 4294901760, %v13335_v26  ;;  %v4818_v59 = vand.u32 4294901760, %v371_v54  ;;  %v374_v32 = vld [vmem:[#allocation5 + $0x5b8] sm:$0xff] }
 0x238   : > { %v13369_v60 = vpack.c.bf16 %v15599_v42, %v15598_v3  ;;  %v13386_v30 = vpack.c.bf16 %v15604_v15, %v15603_v18  ;;  %v13397_v3 = vsub.f32 %v353_v45, %v4764_v12  ;;  %v4821_v42 = vand.u32 4294901760, %v372_v17  ;;  %v373_v15 = vld [vmem:[#allocation5 + $0x5b0] sm:$0xff] }
 0x239   : > { %10047 = vmatpush3.bf16.msra.mxu0 %v10046_v24  ;;  %v13399_v11 = vand.u32 4294901760, %v186_v28  ;;  %v13402_v33 = vsub.f32 %v354_v14, %v4767_v7  ;;  %v4986_v55 = vand.u32 4294901760, %v4985_v13  ;;  %v15107_v21 = vand.u32 4294901760, %v13355_v4 }
 0x23a   : > { %10071 = vmatpush3.bf16.msra.mxu1 %v12930_v10  ;;  %10049 = vmatprep.subr.bf16.mxu0 %v10048_v62  ;;  %v15106_v48 = vand.u32 4294901760, %v13358_v49  ;;  %v4993_v58 = vand.u32 4294901760, %v4992_v1  ;;  %v4770_v24 = vand.u32 4294901760, %v355_v40  ;;  %v4773_v45 = vand.u32 4294901760, %v356_v20 }
 0x23b   : > { %15607 = vst [vmem:[#allocation20_spill] sm:$0xff] %v13399_v11  ;;  %10073 = vmatprep.subr.bf16.mxu1 %v15563_v9  ;;  %v4873_v0 = vsub.f32 %v13323_v16, %v15109_v53  ;;  %v15608_v31 = vand.u32 4294901760, %v13280_v23  ;;  %v13414_v14 = vpack.c.bf16 %v4815_v56, %v4812_v35  ;;  %v13416_v62 = vpack.c.bf16 %v4767_v7, %v4764_v12  ;;  %v357_v56 = vld [vmem:[#allocation5 + $0x530] sm:$0xff] }
 0x23c   : > { %v4880_v13 = vsub.f32 %v13335_v26, %v15108_v57  ;;  %v13421_v9 = vpack.c.bf16 %v4821_v42, %v4818_v59  ;;  %v13423_v1 = vsub.f32 %v371_v54, %v4818_v59  ;;  %v13425_v18 = vsub.f32 %v372_v17, %v4821_v42  ;;  %v376_v57 = vld [vmem:[#allocation5 + $0x5c8] sm:$0xff] }
 0x23d   : > { %v13412_v10 = vpack.c.bf16 %v4761_v52, %v15608_v31  ;;  %15610 = vst [vmem:[#allocation15_spill] sm:$0xff] %v13414_v14  ;;  %10051 = vmatpush3.bf16.msra.mxu0 %v10050_v8  ;;  %v13428_v23 = vsub.f32 %v186_v28, %v13399_v11  ;;  %v4999_v52 = vsub.f32 %v13355_v4, %v15107_v21  ;;  %v358_v8 = vld [vmem:[#allocation5 + $0x538] sm:$0xff]  ;;  %v15112_v12 = vand.u32 4294901760, %v13397_v3  ;;  %v375_v21 = vld [vmem:[#allocation5 + $0x5c0] sm:$0xff] }
 0x23e   : > { %15611 = vst [vmem:[#allocation17_spill] sm:$0xff] %v13421_v9  ;;  %10075 = vmatpush3.bf16.msra.mxu1 %v15565_v51  ;;  %10053 = vmatprep.subr.bf16.mxu0 %v10052_v46  ;;  %v5006_v35 = vsub.f32 %v13358_v49, %v15106_v48  ;;  %v15111_v7 = vand.u32 4294901760, %v13402_v33  ;;  %v13440_v17 = vpack.c.bf16 %v4993_v58, %v4986_v55  ;;  %v4874_v28 = vand.u32 4294901760, %v4873_v0 }
 0x23f   : > { %15609 = vst [vmem:[#allocation25_spill] sm:$0xff] %v13412_v10  ;;  %v7978_v54 = vpop.f32.mrb[14].mxu0  ;;  %10077 = vmatprep.subr.bf16.mxu1 %v15567_v34  ;;  %v13442_v51 = vpack.c.bf16 %v4773_v45, %v4770_v24  ;;  %v13444_v46 = vsub.f32 %v355_v40, %v4770_v24  ;;  %v13446_v59 = vsub.f32 %v356_v20, %v4773_v45  ;;  %v4881_v42 = vand.u32 4294901760, %v4880_v13 }
 0x240   : > { %v7979_v41 = vpop.f32.mrb[15].mxu0  ;;  %v4824_v31 = vand.u32 4294901760, %v373_v15  ;;  %v4827_v48 = vand.u32 4294901760, %v374_v32  ;;  %v4776_v2 = vand.u32 4294901760, %v357_v56  ;;  %v4779_v34 = vand.u32 4294901760, %v358_v8 }
 0x241   : > { %15612 = vst [vmem:[#allocation12_spill] sm:$0xff] %v13442_v51  ;;  %v7980_v53 = vadd.f32 %v7979_v41, %v7978_v54  ;;  %10055 = vmatpush3.bf16.msra.mxu0 %v13351_v44  ;;  %v15116_v55 = vand.u32 4294901760, %v13428_v23  ;;  %v5000_v40 = vand.u32 4294901760, %v4999_v52  ;;  %v5007_v58 = vand.u32 4294901760, %v5006_v35 }
 0x242   : > { %10079 = vmatpush3.bf16.msra.mxu1 %v15568_v47  ;;  %10057 = vmatprep.subr.bf16.mxu0 %v13369_v60  ;;  %v4887_v20 = vsub.f32 %v13397_v3, %v15112_v12  ;;  %v4894_v24 = vsub.f32 %v13402_v33, %v15111_v7  ;;  %v4830_v45 = vand.u32 4294901760, %v375_v21  ;;  %v4833_v0 = vand.u32 4294901760, %v376_v57 }
 0x243   : > { %v2650_v44 = vadd.f32 %v7980_v53, %v13277_v37  ;;  %10081 = vmatprep.subr.bf16.mxu1 %v15569_v22  ;;  %v15114_v47 = vand.u32 4294901760, %v13423_v1  ;;  %v13461_v13 = vpack.c.bf16 %v4881_v42, %v4874_v28  ;;  %v13463_v60 = vpack.c.bf16 %v4827_v48, %v4824_v31  ;;  %v359_v37 = vld [vmem:[#allocation5 + $0x540] sm:$0xff]  ;;  %v360_v22 = vld [vmem:[#allocation5 + $0x548] sm:$0xff] }
 0x244   : > { %v13465_v52 = vsub.f32 %v373_v15, %v4824_v31  ;;  %v15113_v35 = vand.u32 4294901760, %v13425_v18  ;;  %v13469_v54 = vsub.f32 %v374_v32, %v4827_v48  ;;  %v13471_v41 = vpack.c.bf16 %v4779_v34, %v4776_v2 }
 0x245   : > { %15613 = vst [vmem:[#allocation16_spill] sm:$0xff] %v13463_v60  ;;  %10059 = vmatpush3.bf16.msra.mxu0 %v13375_v27  ;;  %v15115_v53 = vand.u32 4294901760, %v13444_v46  ;;  %v4856_v28 = vsub.f32 %v13428_v23, %v15116_v55  ;;  %v13479_v15 = vsub.f32 %v357_v56, %v4776_v2  ;;  %v13481_v42 = vsub.f32 %v358_v8, %v4779_v34  ;;  %v377_v34 = vld [vmem:[#allocation5 + $0x5d0] sm:$0xff] }
 0x246   : > { %15614 = vst [vmem:[#allocation23_spill] sm:$0xff] %v13471_v41  ;;  %10083 = vmatpush3.bf16.msra.mxu1 %v15570_v39  ;;  %10061 = vmatprep.subr.bf16.mxu0 %v13386_v30  ;;  %v4888_v27 = vand.u32 4294901760, %v4887_v20  ;;  %v15117_v48 = vand.u32 4294901760, %v13446_v59  ;;  %v13485_v32 = vpack.c.bf16 %v5007_v58, %v5000_v40  ;;  %v4895_v31 = vand.u32 4294901760, %v4894_v24  ;;  %v378_v58 = vld [vmem:[#allocation5 + $0x5d8] sm:$0xff]  ;;  %v361_v20 = vld [vmem:[#allocation5 + $0x550] sm:$0xff] }
 0x247   : > { %15615 = vst [vmem:[#allocation21_spill] sm:$0xff] %v13479_v15  ;;  %15616 = vst [vmem:[#allocation13_spill] sm:$0xff] %v13481_v42  ;;  %10085 = vmatprep.subr.bf16.mxu1 %v15573_v6  ;;  %v13487_v7 = vpack.c.bf16 %v4833_v0, %v4830_v45  ;;  %v5013_v39 = vsub.f32 %v13423_v1, %v15114_v47  ;;  %v13492_v30 = vsub.f32 %v375_v21, %v4830_v45 }
 0x248   : > { %v8013_v12 = vpop.f32.mrb[14].mxu1  ;;  %v5020_v2 = vsub.f32 %v13425_v18, %v15113_v35  ;;  %v4782_v56 = vand.u32 4294901760, %v359_v37  ;;  %v4785_v8 = vand.u32 4294901760, %v360_v22  ;;  %v4901_v40 = vsub.f32 %v13444_v46, %v15115_v53 }
 0x249   : > { %15617 = vst [vmem:[#allocation19_spill] sm:$0xff] %v13487_v7  ;;  %v8014_v6 = vpop.f32.mrb[15].mxu1  ;;  %10063 = vmatpush3.bf16.msra.mxu0 %v13392_v63  ;;  %v4857_v24 = vand.u32 4294901760, %v4856_v28  ;;  %v4908_v35 = vsub.f32 %v13446_v59, %v15117_v48  ;;  %v13511_v53 = vpack.c.bf16 %v4895_v31, %v4888_v27  ;;  %v13513_v55 = vsub.f32 %v376_v57, %v4833_v0  ;;  %v362_v63 = vld [vmem:[#allocation5 + $0x558] sm:$0xff] }
 0x24a   : > { %v8015_v45 = vadd.f32 %v8014_v6, %v8013_v12  ;;  %10087 = vmatpush3.bf16.msra.mxu1 %v13070_v19  ;;  %10097 = vmatprep.subr.bf16.mxu0 %v13394_v38  ;;  %v5014_v28 = vand.u32 4294901760, %v5013_v39  ;;  %v4836_v12 = vand.u32 4294901760, %v377_v34  ;;  %v5021_v19 = vand.u32 4294901760, %v5020_v2 }
 0x24b   : > { %10089 = vmatprep.subr.bf16.mxu1 %v13091_v5  ;;  %v13518_v21 = vsub.f32 %v359_v37, %v4782_v56  ;;  %v4839_v48 = vand.u32 4294901760, %v378_v58  ;;  %v13521_v47 = vpack.c.bf16 %v4785_v8, %v4782_v56  ;;  %v15619_v5 = vand.u32 4294901760, %v13465_v52 }
 0x24c   : > { %v13515_v6 = vadd.f32 %v8015_v45, %v2650_v44  ;;  %4648 = vmatmul.mubr.f32.vlgmr.msra.gmra.mrb[28].mxu0 %v13124_v29  ;;  %v15620_v0 = vand.u32 4294901760, %v13469_v54  ;;  %v4902_v37 = vand.u32 4294901760, %v4901_v40  ;;  %v4909_v27 = vand.u32 4294901760, %v4908_v35  ;;  %v379_v45 = vld [vmem:[#allocation5 + $0x5e0] sm:$0xff] }
 0x24d   : > { %10099 = vmatpush3.bf16.msra.mxu0 %v13412_v10  ;;  %15618 = vst [vmem:[#allocation24_spill] sm:$0xff] %v13521_v47  ;;  %v5027_v57 = vsub.f32 %v13465_v52, %v15619_v5  ;;  %4858 = vmatprep.mubr.f32.mxu0 %v4857_v24  ;;  %v15621_v31 = vand.u32 4294901760, %v13479_v15  ;;  %v15622_v2 = vand.u32 4294901760, %v13481_v42  ;;  %v380_v5 = vld [vmem:[#allocation5 + $0x5e8] sm:$0xff]  ;;  %v4788_v24 = vand.u32 4294901760, %v361_v20 }
 0x24e   : > { %v5034_v44 = vsub.f32 %v13469_v54, %v15620_v0  ;;  %10091 = vmatpush3.bf16.msra.mxu1 %v13150_v50  ;;  %10101 = vmatprep.subr.bf16.mxu0 %v13414_v14  ;;  %v13538_v0 = vsub.f32 %v360_v22, %v4785_v8  ;;  %v4791_v50 = vand.u32 4294901760, %v362_v63  ;;  %v15126_v14 = vand.u32 4294901760, %v13492_v30 }
 0x24f   : > { %v4915_v39 = vsub.f32 %v13479_v15, %v15621_v31  ;;  %v4922_v56 = vsub.f32 %v13481_v42, %v15622_v2  ;;  %10093 = vmatprep.subr.bf16.mxu1 %v13176_v36  ;;  %v13541_v40 = vpack.c.bf16 %v5021_v19, %v5014_v28  ;;  %v13543_v35 = vpack.c.bf16 %v4839_v48, %v4836_v12 }
 0x250   : > { %v13545_v10 = vsub.f32 %v377_v34, %v4836_v12  ;;  %v13547_v31 = vsub.f32 %v378_v58, %v4839_v48  ;;  %v5028_v2 = vand.u32 4294901760, %v5027_v57  ;;  %v5035_v42 = vand.u32 4294901760, %v5034_v44  ;;  %v363_v34 = vld [vmem:[#allocation5 + $0x560] sm:$0xff]  ;;  %v364_v12 = vld [vmem:[#allocation5 + $0x568] sm:$0xff] }
 0x251   : > { %15623 = vst [vmem:[#allocation22_spill] sm:$0xff] %v13543_v35  ;;  %10103 = vmatpush3.bf16.msra.mxu0 %v13416_v62  ;;  %v4842_v15 = vand.u32 4294901760, %v379_v45  ;;  %v4845_v36 = vand.u32 4294901760, %v380_v5  ;;  %v13552_v22 = vpack.c.bf16 %v4909_v27, %v4902_v37  ;;  %v4916_v8 = vand.u32 4294901760, %v4915_v39  ;;  %v13569_v27 = vld [vmem:[#allocation5 + $0x5f0] sm:$0xff] }
 0x252   : > { %15624 = vst [vmem:[#allocation14_spill] sm:$0xff] %v13547_v31  ;;  %10095 = vmatpush3.bf16.msra.mxu1 %v13200_v25  ;;  %10105 = vmatprep.subr.bf16.mxu0 %v13421_v9  ;;  %v4923_v28 = vand.u32 4294901760, %v4922_v56  ;;  %v15127_v19 = vand.u32 4294901760, %v13513_v55  ;;  %v13556_v48 = vpack.c.bf16 %v4791_v50, %v4788_v24  ;;  %v13558_v58 = vsub.f32 %v361_v20, %v4788_v24 }
 0x253   : > { %10129 = vmatprep.subr.bf16.mxu1 %v13440_v17  ;;  %v13563_v25 = vsub.f32 %v13492_v30, %v15126_v14  ;;  %v13566_v44 = vsub.f32 %v362_v63, %v4791_v50  ;;  %v13571_v17 = vld [vmem:[#allocation5 + $0x5f8] sm:$0xff]  ;;  %v15134_v20 = vand.u32 4294901760, %v13545_v10  ;;  %v10140_v56 = vpack.c.bf16 %v5035_v42, %v5028_v2  ;;  %v185_v50 = vld [vmem:[%s11021_s29 + $0x50] sm:$0xff] }
 0x254   : > { %v13577_v24 = vpack.c.bf16 %v4845_v36, %v4842_v15  ;;  %v13579_v14 = vsub.f32 %v379_v45, %v4842_v15  ;;  %v4794_v63 = vand.u32 4294901760, %v363_v34  ;;  %v10142_v37 = vpack.c.bf16 %v4923_v28, %v4916_v8  ;;  %v13596_v8 = vld [vmem:[#allocation5 + $0x570] sm:$0xff] }
 0x255   : > { %15625 = vst [vmem:[#allocation18_spill] sm:$0xff] %v13566_v44  ;;  %4752 = vmatmul.mubr.f32.vlgmr.msra.gmra.mrb[28].mxu1 %v13124_v29  ;;  %10107 = vmatpush3.bf16.msra.mxu0 %v13442_v51  ;;  %v13584_v57 = vsub.f32 %v380_v5, %v4845_v36  ;;  %v5048_v29 = vsub.f32 %v13513_v55, %v15127_v19  ;;  %v4797_v39 = vand.u32 4294901760, %v364_v12  ;;  %v5042_v42 = vand.u32 4294901760, %v13563_v25  ;;  %v13598_v5 = vld [vmem:[#allocation5 + $0x578] sm:$0xff] }
 0x256   : > { %15626 = vst [vmem:[#allocation11_spill] sm:$0xff] %v13579_v14  ;;  %10131 = vmatpush3.bf16.msra.mxu1 %v13461_v13  ;;  %10109 = vmatprep.subr.bf16.mxu0 %v13463_v60  ;;  %v15627_v15 = vand.u32 4294901760, %v13518_v21  ;;  %v4848_v13 = vand.u32 4294901760, %v13569_v27  ;;  %v4851_v2 = vand.u32 4294901760, %v13571_v17  ;;  %v15628_v36 = vand.u32 4294901760, %v13538_v0 }
 0x257   : > { %10133 = vmatprep.subr.bf16.mxu1 %v13485_v32  ;;  %5094 = vmatprep.mubr.f32.mxu1 %v13399_v11  ;;  %v5055_v28 = vsub.f32 %v13545_v10, %v15134_v20  ;;  %v15629_v25 = vand.u32 4294901760, %v13547_v31  ;;  %v13610_v19 = vand.u32 4294901760, %v185_v50  ;;  %v13613_v60 = vsub.f32 %v363_v34, %v4794_v63 }
 0x258   : > { %v4929_v45 = vsub.f32 %v13518_v21, %v15627_v15  ;;  %v4936_v32 = vsub.f32 %v13538_v0, %v15628_v36  ;;  %v5049_v20 = vand.u32 4294901760, %v5048_v29  ;;  %v13620_v9 = vsub.f32 %v364_v12, %v4797_v39 }
 0x259   : > { %v5062_v15 = vsub.f32 %v13547_v31, %v15629_v25  ;;  %10111 = vmatpush3.bf16.msra.mxu0 %v13471_v41  ;;  %v4800_v25 = vand.u32 4294901760, %v13596_v8  ;;  %v4803_v31 = vand.u32 4294901760, %v13598_v5  ;;  %v13626_v11 = vsub.f32 %v13569_v27, %v4848_v13 }
 0x25a   : > { %10135 = vmatpush3.bf16.msra.mxu1 %v13511_v53  ;;  %10113 = vmatprep.subr.bf16.mxu0 %v13487_v7  ;;  %v4930_v34 = vand.u32 4294901760, %v4929_v45  ;;  %v13629_v51 = vsub.f32 %v13571_v17, %v4851_v2  ;;  %v4937_v36 = vand.u32 4294901760, %v4936_v32  ;;  %v5056_v7 = vand.u32 4294901760, %v5055_v28 }
 0x25b   : > { %10137 = vmatprep.subr.bf16.mxu1 %v13541_v40  ;;  %v5063_v29 = vand.u32 4294901760, %v5062_v15  ;;  %v13633_v12 = vsub.f32 %v185_v50, %v13610_v19  ;;  %v13636_v41 = vpack.c.bf16 %v4797_v39, %v4794_v63  ;;  %v15630_v40 = vand.u32 4294901760, %v13558_v58 }
 0x25c   : > { %v15631_v45 = vand.u32 4294901760, %v13566_v44  ;;  %v15632_v53 = vand.u32 4294901760, %v13579_v14  ;;  %v13650_v50 = vsub.f32 %v13596_v8, %v4800_v25  ;;  %v13653_v39 = vsub.f32 %v13598_v5, %v4803_v31 }
 0x25d   : > { %10115 = vmatpush3.bf16.msra.mxu0 %v13521_v47  ;;  %v4943_v27 = vsub.f32 %v13558_v58, %v15630_v40  ;;  %v15154_v28 = vand.u32 4294901760, %v13620_v9  ;;  %v10144_v40 = vpack.c.bf16 %v5049_v20, %v5042_v42  ;;  %v10146_v47 = vpack.c.bf16 %v4937_v36, %v4930_v34 }
 0x25e   : > { %v4950_v17 = vsub.f32 %v13566_v44, %v15631_v45  ;;  %v5069_v32 = vsub.f32 %v13579_v14, %v15632_v53  ;;  %10139 = vmatpush3.bf16.msra.mxu1 %v13552_v22  ;;  %10117 = vmatprep.subr.bf16.mxu0 %v13543_v35  ;;  %v15633_v45 = vand.u32 4294901760, %v13584_v57  ;;  %v15153_v22 = vand.u32 4294901760, %v13626_v11 }
 0x25f   : > { %v8048_v15 = vpop.f32.mrb[16].mxu0  ;;  %10141 = vmatprep.subr.bf16.mxu1 %v10140_v56  ;;  %v13662_v14 = vpack.c.bf16 %v4851_v2, %v4848_v13  ;;  %v10148_v5 = vpack.c.bf16 %v5063_v29, %v5056_v7  ;;  %v15155_v63 = vand.u32 4294901760, %v13633_v12  ;;  %v4944_v56 = vand.u32 4294901760, %v4943_v27 }
 0x260   : > { %v5076_v53 = vsub.f32 %v13584_v57, %v15633_v45  ;;  %v8049_v8 = vpop.f32.mrb[17].mxu0  ;;  %v4951_v20 = vand.u32 4294901760, %v4950_v17  ;;  %v5070_v42 = vand.u32 4294901760, %v5069_v32  ;;  %v15634_v45 = vand.u32 4294901760, %v13613_v60 }
 0x261   : > { %v8050_v44 = vadd.f32 %v8049_v8, %v8048_v15  ;;  %10119 = vmatpush3.bf16.msra.mxu0 %v13556_v48  ;;  %v4964_v13 = vsub.f32 %v13620_v9, %v15154_v28  ;;  %v15151_v7 = vand.u32 4294901760, %v13650_v50  ;;  %v15152_v2 = vand.u32 4294901760, %v13653_v39 }
 0x262   : > { %10143 = vmatpush3.bf16.msra.mxu1 %v10142_v37  ;;  %10121 = vmatprep.subr.bf16.mxu0 %v13577_v24  ;;  %v4957_v35 = vsub.f32 %v13613_v60, %v15634_v45  ;;  %v5077_v34 = vand.u32 4294901760, %v5076_v53  ;;  %v5083_v37 = vsub.f32 %v13626_v11, %v15153_v22  ;;  %v15635_v29 = vand.u32 4294901760, %v13629_v51 }
 0x263   : > { %v2926_v36 = vadd.f32 %v8050_v44, %v13515_v6  ;;  %10145 = vmatprep.subr.bf16.mxu1 %v10144_v40  ;;  %v4862_v17 = vsub.f32 %v13633_v12, %v15155_v63  ;;  %v13686_v32 = vpack.c.bf16 %v4803_v31, %v4800_v25  ;;  %v10150_v15 = vpack.c.bf16 %v4951_v20, %v4944_v56 }
 0x264   : > { %v5090_v27 = vsub.f32 %v13629_v51, %v15635_v29  ;;  %v10160_v6 = vpack.c.bf16 %v13299_v43, %v13295_v61  ;;  %v4958_v44 = vand.u32 4294901760, %v4957_v35  ;;  %v4965_v40 = vand.u32 4294901760, %v4964_v13 }
 0x265   : > { %10123 = vmatpush3.bf16.msra.mxu0 %v13636_v41  ;;  %v4971_v53 = vsub.f32 %v13650_v50, %v15151_v7  ;;  %v4978_v8 = vsub.f32 %v13653_v39, %v15152_v2  ;;  %v10152_v31 = vpack.c.bf16 %v5077_v34, %v5070_v42  ;;  %v5084_v25 = vand.u32 4294901760, %v5083_v37 }
 0x266   : > { %10147 = vmatpush3.bf16.msra.mxu1 %v10146_v47  ;;  %10125 = vmatprep.subr.bf16.mxu0 %v13662_v14  ;;  %v5091_v56 = vand.u32 4294901760, %v5090_v27  ;;  %v4863_v45 = vand.u32 4294901760, %v4862_v17  ;;  %v10162_v47 = vpack.c.bf16 %v13335_v26, %v13323_v16  ;;  %v10164_v35 = vpack.c.bf16 %v13358_v49, %v13355_v4 }
 0x267   : > { %10149 = vmatprep.subr.bf16.mxu1 %v10148_v5  ;;  %v10154_v7 = vpack.c.bf16 %v4965_v40, %v4958_v44  ;;  %v4972_v2 = vand.u32 4294901760, %v4971_v53  ;;  %v4979_v5 = vand.u32 4294901760, %v4978_v8  ;;  %v10166_v37 = vpack.c.bf16 %v13402_v33, %v13397_v3  ;;  %v15638_v44 = vld [vmem:[#allocation25_spill] sm:$0xff]  ;;  %v15639_v53 = vld [vmem:[#allocation15_spill] sm:$0xff] }
 0x268   : > { %v8083_v20 = vpop.f32.mrb[16].mxu1  ;;  %v10156_v42 = vpack.c.bf16 %v5091_v56, %v5084_v25  ;;  %v10168_v17 = vpack.c.bf16 %v13425_v18, %v13423_v1  ;;  %v10176_v40 = vpack.c.bf16 %v13513_v55, %v13492_v30  ;;  %v15640_v8 = vand.u32 4294901760, %v13428_v23  ;;  %v15641_v25 = vld [vmem:[#allocation14_spill] sm:$0xff] }
 0x269   : > { %v8084_v29 = vpop.f32.mrb[17].mxu1  ;;  %10127 = vmatpush3.bf16.msra.mxu0 %v13686_v32  ;;  %v10158_v27 = vpack.c.bf16 %v4979_v5, %v4972_v2  ;;  %v15637_v2 = vld [vmem:[#allocation13_spill] sm:$0xff]  ;;  %v10180_v56 = vpack.c.bf16 %v15641_v25, %v13545_v10  ;;  %v15646_v5 = vld [vmem:[#allocation16_spill] sm:$0xff]  ;;  %v15654_v22 = vand.u32 4294901760, %v13335_v26  ;;  %v15657_v26 = vand.u32 4294901760, %v13397_v3 }
 0x26a   : > { %v8085_v13 = vadd.f32 %v8084_v29, %v8083_v20  ;;  %10151 = vmatpush3.bf16.msra.mxu1 %v10150_v15  ;;  %10161 = vmatprep.subr.bf16.mxu0 %v10160_v6  ;;  %v10170_v15 = vpack.c.bf16 %v13446_v59, %v13444_v46  ;;  %v15642_v20 = vld [vmem:[#allocation17_spill] sm:$0xff] }
 0x26b   : > { %10153 = vmatprep.subr.bf16.mxu1 %v10152_v31  ;;  %v10178_v31 = vpack.c.bf16 %v13538_v0, %v13518_v21 }
 0x26c   : > { %v3030_v34 = vadd.f32 %v8085_v13, %v2926_v36  ;;  %4864 = vmatmul.mubr.f32.vlgmr.msra.gmra.mrb[30].mxu0 %v4863_v45  ;;  %v10172_v36 = vpack.c.bf16 %v13469_v54, %v13465_v52  ;;  %v15643_v45 = vld [vmem:[#allocation18_spill] sm:$0xff] }
 0x26d   : > { %10163 = vmatpush3.bf16.msra.mxu0 %v10162_v47  ;;  %5231 = vmatprep.mubr.f32.mxu0 %v13428_v23  ;;  %v10182_v29 = vpack.c.bf16 %v15643_v45, %v13558_v58  ;;  %v15644_v47 = vld [vmem:[#allocation12_spill] sm:$0xff]  ;;  %v15645_v23 = vld [vmem:[#allocation11_spill] sm:$0xff] }
 0x26e   : > { %10155 = vmatpush3.bf16.msra.mxu1 %v10154_v7  ;;  %10165 = vmatprep.subr.bf16.mxu0 %v10164_v35  ;;  %v15636_v7 = vld [vmem:[#allocation21_spill] sm:$0xff]  ;;  %v10184_v35 = vpack.c.bf16 %v13584_v57, %v15645_v23 }
 0x26f   : > { %10157 = vmatprep.subr.bf16.mxu1 %v10156_v42  ;;  %v10174_v6 = vpack.c.bf16 %v15637_v2, %v15636_v7 }
 0x271   : > { %10167 = vmatpush3.bf16.msra.mxu0 %v10166_v37 }
 0x272   : > { %10159 = vmatpush3.bf16.msra.mxu1 %v10158_v27  ;;  %10169 = vmatprep.subr.bf16.mxu0 %v10168_v17  ;;  %v10186_v27 = vpack.c.bf16 %v13620_v9, %v13613_v60  ;;  %v15647_v17 = vld [vmem:[#allocation23_spill] sm:$0xff] }
 0x273   : > { %10193 = vmatprep.subr.bf16.mxu1 %v13394_v38 }
 0x275   : > { %5096 = vmatmul.mubr.f32.vlgmr.msra.gmra.mrb[30].mxu1 %v13610_v19  ;;  %10171 = vmatpush3.bf16.msra.mxu0 %v10170_v15  ;;  %v10188_v15 = vpack.c.bf16 %v13629_v51, %v13626_v11 }
 0x276   : > { %10195 = vmatpush3.bf16.msra.mxu1 %v15638_v44  ;;  %10173 = vmatprep.subr.bf16.mxu0 %v10172_v36 }
 0x277   : > { %10197 = vmatprep.subr.bf16.mxu1 %v15639_v53  ;;  %5338 = vmatprep.mubr.f32.mxu1 %v15640_v8  ;;  %v15649_v8 = vld [vmem:[#allocation24_spill] sm:$0xff] }
 0x279   : > { %10175 = vmatpush3.bf16.msra.mxu0 %v10174_v6  ;;  %v15648_v6 = vld [vmem:[#allocation19_spill] sm:$0xff] }
 0x27a   : > { %10199 = vmatpush3.bf16.msra.mxu1 %v13416_v62  ;;  %10177 = vmatprep.subr.bf16.mxu0 %v10176_v40  ;;  %v10190_v40 = vpack.c.bf16 %v13653_v39, %v13650_v50 }
 0x27b   : > { %10201 = vmatprep.subr.bf16.mxu1 %v15642_v20 }
 0x27d   : > { %10179 = vmatpush3.bf16.msra.mxu0 %v10178_v31  ;;  %v15650_v31 = vand.u32 4294901760, %v13295_v61  ;;  %v15655_v61 = vand.u32 4294901760, %v13355_v4  ;;  %v15658_v4 = vand.u32 4294901760, %v13402_v33 }
 0x27e   : > { %10203 = vmatpush3.bf16.msra.mxu1 %v15644_v47  ;;  %10181 = vmatprep.subr.bf16.mxu0 %v10180_v56  ;;  %v15651_v56 = vand.u32 4294901760, %v13299_v43  ;;  %v15656_v43 = vand.u32 4294901760, %v13358_v49  ;;  %v15659_v49 = vld [vmem:[#allocation20_spill] sm:$0xff] }
 0x27f   : > { %v8118_v13 = vpop.f32.mrb[18].mxu0  ;;  %10205 = vmatprep.subr.bf16.mxu1 %v15646_v5 }
 0x280   : > { %v8119_v42 = vpop.f32.mrb[19].mxu0 }
 0x281   : > { %v8120_v37 = vadd.f32 %v8119_v42, %v8118_v13  ;;  %10183 = vmatpush3.bf16.msra.mxu0 %v10182_v29  ;;  %v10224_v29 = vpack.c.bf16 %v15651_v56, %v15650_v31  ;;  %v15652_v13 = vld [vmem:[#allocation22_spill] sm:$0xff]  ;;  %v10228_v31 = vpack.c.bf16 %v15656_v43, %v15655_v61  ;;  %v15665_v43 = vand.u32 4294901760, %v13469_v54 }
 0x282   : > { %10207 = vmatpush3.bf16.msra.mxu1 %v15647_v17  ;;  %10185 = vmatprep.subr.bf16.mxu0 %v10184_v35  ;;  %v13747_v35 = vld [vmem:[#allocation5 + $0x680] sm:$0xff]  ;;  %v15666_v54 = vand.u32 4294901760, %v15636_v7  ;;  %v15672_v7 = vand.u32 4294901760, %v13538_v0 }
 0x283   : > { %v3142_v36 = vadd.f32 %v8120_v37, %v3030_v34  ;;  %10209 = vmatprep.subr.bf16.mxu1 %v15648_v6  ;;  %v13749_v34 = vld [vmem:[#allocation5 + $0x688] sm:$0xff]  ;;  %v5668_v56 = vand.u32 4294901760, %v13747_v35 }
 0x285   : > { %10187 = vmatpush3.bf16.msra.mxu0 %v10186_v27  ;;  %v15653_v27 = vand.u32 4294901760, %v13323_v16  ;;  %v13766_v16 = vld [vmem:[#allocation5 + $0x600] sm:$0xff] }
 0x286   : > { %10211 = vmatpush3.bf16.msra.mxu1 %v15649_v8  ;;  %10189 = vmatprep.subr.bf16.mxu0 %v10188_v15  ;;  %v15156_v33 = vand.u32 4294901760, %v13766_v16 }
 0x287   : > { %10213 = vmatprep.subr.bf16.mxu1 %v15652_v13  ;;  %v10226_v28 = vpack.c.bf16 %v15654_v22, %v15653_v27  ;;  %v10230_v22 = vpack.c.bf16 %v15658_v4, %v15657_v26  ;;  %v13781_v27 = vsub.f32 %v13747_v35, %v5668_v56 }
 0x288   : > { %v8153_v42 = vpop.f32.mrb[18].mxu1 }
 0x289   : > { %v8154_v37 = vpop.f32.mrb[19].mxu1  ;;  %10191 = vmatpush3.bf16.msra.mxu0 %v10190_v40  ;;  %v5671_v40 = vand.u32 4294901760, %v13749_v34 }
 0x28a   : > { %v8155_v15 = vadd.f32 %v8154_v37, %v8153_v42  ;;  %10215 = vmatpush3.bf16.msra.mxu1 %v13556_v48  ;;  %10225 = vmatprep.subr.bf16.mxu0 %v10224_v29  ;;  %v13773_v29 = vld [vmem:[#allocation5 + $0x608] sm:$0xff]  ;;  %v15661_v42 = vand.u32 4294901760, %v13425_v18  ;;  %v15663_v18 = vand.u32 4294901760, %v13446_v59  ;;  %v386_v59 = vld [vmem:[#allocation5 + $0x618] sm:$0xff] }
 0x28b   : > { %10217 = vmatprep.subr.bf16.mxu1 %v13577_v24  ;;  %v13785_v3 = vsub.f32 %v13749_v34, %v5671_v40  ;;  %v5623_v61 = vand.u32 4294901760, %v13773_v29  ;;  %v15664_v34 = vand.u32 4294901760, %v13465_v52 }
 0x28c   : > { %v13763_v63 = vadd.f32 %v8155_v15, %v3142_v36  ;;  %5234 = vmatmul.mubr.f32.vlgmr.msra.gmra.mrb[32].mxu0 %v13633_v12  ;;  %v15660_v36 = vand.u32 4294901760, %v13423_v1  ;;  %v13790_v15 = vld [vmem:[#allocation5 + $0x698] sm:$0xff]  ;;  %v15662_v1 = vand.u32 4294901760, %v13444_v46  ;;  %v13809_v46 = vsub.f32 %v13766_v16, %v15156_v33 }
 0x28d   : > { %10227 = vmatpush3.bf16.msra.mxu0 %v10226_v28  ;;  %5508 = vmatprep.mubr.f32.mxu0 %v15659_v49  ;;  %v13788_v28 = vld [vmem:[#allocation5 + $0x690] sm:$0xff]  ;;  %v5677_v4 = vand.u32 4294901760, %v13790_v15  ;;  %v15671_v33 = vand.u32 4294901760, %v13518_v21 }
 0x28e   : > { %10219 = vmatpush3.bf16.msra.mxu1 %v13636_v41  ;;  %10229 = vmatprep.subr.bf16.mxu0 %v10228_v31  ;;  %v10232_v37 = vpack.c.bf16 %v15661_v42, %v15660_v36  ;;  %v10234_v35 = vpack.c.bf16 %v15663_v18, %v15662_v1  ;;  %v10236_v31 = vpack.c.bf16 %v15665_v43, %v15664_v34  ;;  %v5674_v26 = vand.u32 4294901760, %v13788_v28  ;;  %v385_v36 = vld [vmem:[#allocation5 + $0x610] sm:$0xff] }
 0x28f   : > { %10221 = vmatprep.subr.bf16.mxu1 %v13662_v14  ;;  %v15667_v42 = vand.u32 4294901760, %v15637_v2  ;;  %v15668_v1 = vand.u32 4294901760, %v13492_v30  ;;  %v15669_v18 = vand.u32 4294901760, %v13513_v55  ;;  %v15670_v43 = vand.u32 4294901760, %v13633_v12  ;;  %v403_v12 = vld [vmem:[#allocation5 + $0x6a0] sm:$0xff] }
 0x290   : > { %v10242_v52 = vpack.c.bf16 %v15672_v7, %v15671_v33  ;;  %v15673_v2 = vand.u32 4294901760, %v13545_v10  ;;  %v15674_v30 = vand.u32 4294901760, %v15641_v25  ;;  %v15675_v55 = vand.u32 4294901760, %v13558_v58  ;;  %v404_v25 = vld [vmem:[#allocation5 + $0x6a8] sm:$0xff] }
 0x291   : > { %10231 = vmatpush3.bf16.msra.mxu0 %v10230_v22  ;;  %v15161_v22 = vand.u32 4294901760, %v13781_v27  ;;  %v10240_v34 = vpack.c.bf16 %v15669_v18, %v15668_v1  ;;  %v5626_v1 = vand.u32 4294901760, %v385_v36  ;;  %v13841_v21 = vsub.f32 %v13788_v28, %v5674_v26 }
 0x292   : > { %10223 = vmatpush3.bf16.msra.mxu1 %v13686_v32  ;;  %10233 = vmatprep.subr.bf16.mxu0 %v10232_v37  ;;  %v10238_v37 = vpack.c.bf16 %v15667_v42, %v15666_v54  ;;  %v10244_v54 = vpack.c.bf16 %v15674_v30, %v15673_v2  ;;  %v15676_v42 = vand.u32 4294901760, %v15643_v45  ;;  %v13844_v0 = vsub.f32 %v13790_v15, %v5677_v4  ;;  %v188_v45 = vld [vmem:[%s11021_s29 + $0x68] sm:$0xff] }
 0x293   : > { %10257 = vmatprep.subr.bf16.mxu1 %v13394_v38  ;;  %v13821_v38 = vsub.f32 %v13773_v29, %v5623_v61  ;;  %v5629_v10 = vand.u32 4294901760, %v386_v59  ;;  %v5847_v58 = vsub.f32 %v13781_v27, %v15161_v22  ;;  %v15677_v33 = vand.u32 4294901760, %v15645_v23 }
 0x294   : > { %v13837_v29 = vpack.c.bf16 %v15676_v42, %v15675_v55  ;;  %v15679_v28 = vand.u32 4294901760, %v13613_v60  ;;  %v15680_v15 = vand.u32 4294901760, %v13620_v9  ;;  %v15681_v18 = vand.u32 4294901760, %v13785_v3  ;;  %v388_v55 = vld [vmem:[#allocation5 + $0x628] sm:$0xff] }
 0x295   : > { %5342 = vmatmul.mubr.f32.vlgmr.msra.gmra.mrb[32].mxu1 %v15670_v43  ;;  %10235 = vmatpush3.bf16.msra.mxu0 %v10234_v35  ;;  %v15682_v23 = vand.u32 4294901760, %v13626_v11  ;;  %v15684_v60 = vand.u32 4294901760, %v13650_v50  ;;  %v15685_v9 = vand.u32 4294901760, %v13653_v39  ;;  %v13880_v30 = vpack.c.bf16 %v5671_v40, %v5668_v56 }
 0x296   : > { %10259 = vmatpush3.bf16.msra.mxu1 %v15638_v44  ;;  %10237 = vmatprep.subr.bf16.mxu0 %v10236_v31  ;;  %v15678_v44 = vand.u32 4294901760, %v13584_v57  ;;  %v13861_v31 = vpack.c.bf16 %v15680_v15, %v15679_v28  ;;  %v5854_v43 = vsub.f32 %v13785_v3, %v15681_v18  ;;  %v15683_v57 = vand.u32 4294901760, %v13629_v51 }
 0x297   : > { %10261 = vmatprep.subr.bf16.mxu1 %v15639_v53  ;;  %5612 = vmatprep.mubr.f32.mxu1 %v15659_v49  ;;  %v15160_v53 = vand.u32 4294901760, %v13809_v46  ;;  %v13878_v2 = vpack.c.bf16 %v15685_v9, %v15684_v60  ;;  %v387_v49 = vld [vmem:[#allocation5 + $0x620] sm:$0xff]  ;;  %v15159_v42 = vand.u32 4294901760, %v13821_v38  ;;  %v5680_v11 = vand.u32 4294901760, %v403_v12  ;;  %v406_v60 = vld [vmem:[#allocation5 + $0x6b8] sm:$0xff] }
 0x298   : > { %v13855_v35 = vpack.c.bf16 %v15678_v44, %v15677_v33  ;;  %v13872_v7 = vpack.c.bf16 %v15683_v57, %v15682_v23  ;;  %v13883_v33 = vsub.f32 %v385_v36, %v5626_v1  ;;  %v5683_v44 = vand.u32 4294901760, %v404_v25  ;;  %v405_v57 = vld [vmem:[#allocation5 + $0x6b0] sm:$0xff] }
 0x299   : > { %10239 = vmatpush3.bf16.msra.mxu0 %v10238_v37  ;;  %v13885_v51 = vand.u32 4294901760, %v188_v45  ;;  %v13888_v50 = vsub.f32 %v386_v59, %v5629_v10  ;;  %v5848_v39 = vand.u32 4294901760, %v5847_v58  ;;  %v15158_v56 = vand.u32 4294901760, %v13841_v21 }
 0x29a   : > { %10263 = vmatpush3.bf16.msra.mxu1 %v13416_v62  ;;  %10241 = vmatprep.subr.bf16.mxu0 %v10240_v34  ;;  %v15157_v40 = vand.u32 4294901760, %v13844_v0  ;;  %v5855_v28 = vand.u32 4294901760, %v5854_v43  ;;  %v5632_v37 = vand.u32 4294901760, %v387_v49  ;;  %v5635_v36 = vand.u32 4294901760, %v388_v55 }
 0x29b   : > { %15686 = vst [vmem:[#allocation21_spill] sm:$0xff] %v13885_v51  ;;  %10265 = vmatprep.subr.bf16.mxu1 %v15642_v20  ;;  %v5735_v15 = vsub.f32 %v13809_v46, %v15160_v53  ;;  %v15687_v18 = vand.u32 4294901760, %v13766_v16  ;;  %v13900_v59 = vpack.c.bf16 %v5677_v4, %v5674_v26  ;;  %v13902_v34 = vpack.c.bf16 %v5629_v10, %v5626_v1  ;;  %v389_v4 = vld [vmem:[#allocation5 + $0x630] sm:$0xff] }
 0x29c   : > { %v5742_v58 = vsub.f32 %v13821_v38, %v15159_v42  ;;  %v13907_v20 = vpack.c.bf16 %v5683_v44, %v5680_v11  ;;  %v13909_v43 = vsub.f32 %v403_v12, %v5680_v11  ;;  %v13911_v23 = vsub.f32 %v404_v25, %v5683_v44  ;;  %v408_v42 = vld [vmem:[#allocation5 + $0x6c8] sm:$0xff] }
 0x29d   : > { %v13898_v62 = vpack.c.bf16 %v5623_v61, %v15687_v18  ;;  %15689 = vst [vmem:[#allocation25_spill] sm:$0xff] %v13900_v59  ;;  %10243 = vmatpush3.bf16.msra.mxu0 %v10242_v52  ;;  %v13914_v16 = vsub.f32 %v188_v45, %v13885_v51  ;;  %v5861_v61 = vsub.f32 %v13841_v21, %v15158_v56  ;;  %v390_v52 = vld [vmem:[#allocation5 + $0x638] sm:$0xff]  ;;  %v15163_v1 = vand.u32 4294901760, %v13883_v33  ;;  %v407_v56 = vld [vmem:[#allocation5 + $0x6c0] sm:$0xff] }
 0x29e   : > { %15690 = vst [vmem:[#allocation15_spill] sm:$0xff] %v13907_v20  ;;  %10267 = vmatpush3.bf16.msra.mxu1 %v15644_v47  ;;  %10245 = vmatprep.subr.bf16.mxu0 %v10244_v54  ;;  %v5868_v26 = vsub.f32 %v13844_v0, %v15157_v40  ;;  %v15162_v10 = vand.u32 4294901760, %v13888_v50  ;;  %v13926_v25 = vpack.c.bf16 %v5855_v28, %v5848_v39  ;;  %v5736_v45 = vand.u32 4294901760, %v5735_v15 }
 0x29f   : > { %15688 = vst [vmem:[#allocation13_spill] sm:$0xff] %v13898_v62  ;;  %v8188_v12 = vpop.f32.mrb[20].mxu0  ;;  %10269 = vmatprep.subr.bf16.mxu1 %v15646_v5  ;;  %v13928_v47 = vpack.c.bf16 %v5635_v36, %v5632_v37  ;;  %v13930_v54 = vsub.f32 %v387_v49, %v5632_v37  ;;  %v13932_v11 = vsub.f32 %v388_v55, %v5635_v36  ;;  %v5743_v44 = vand.u32 4294901760, %v5742_v58 }
 0x2a0   : > { %v8189_v9 = vpop.f32.mrb[21].mxu0  ;;  %v5686_v18 = vand.u32 4294901760, %v405_v57  ;;  %v5689_v40 = vand.u32 4294901760, %v406_v60  ;;  %v5638_v22 = vand.u32 4294901760, %v389_v4  ;;  %v5641_v5 = vand.u32 4294901760, %v390_v52 }
 0x2a1   : > { %15691 = vst [vmem:[#allocation14_spill] sm:$0xff] %v13928_v47  ;;  %v8190_v53 = vadd.f32 %v8189_v9, %v8188_v12  ;;  %10247 = vmatpush3.bf16.msra.mxu0 %v13837_v29  ;;  %v15167_v39 = vand.u32 4294901760, %v13914_v16  ;;  %v5862_v49 = vand.u32 4294901760, %v5861_v61  ;;  %v5869_v28 = vand.u32 4294901760, %v5868_v26 }
 0x2a2   : > { %10271 = vmatpush3.bf16.msra.mxu1 %v15647_v17  ;;  %10249 = vmatprep.subr.bf16.mxu0 %v13855_v35  ;;  %v5749_v55 = vsub.f32 %v13883_v33, %v15163_v1  ;;  %v5756_v37 = vsub.f32 %v13888_v50, %v15162_v10  ;;  %v5692_v36 = vand.u32 4294901760, %v407_v56  ;;  %v5695_v15 = vand.u32 4294901760, %v408_v42 }
 0x2a3   : > { %v3512_v29 = vadd.f32 %v8190_v53, %v13763_v63  ;;  %10273 = vmatprep.subr.bf16.mxu1 %v15648_v6  ;;  %v15165_v17 = vand.u32 4294901760, %v13909_v43  ;;  %v13947_v58 = vpack.c.bf16 %v5743_v44, %v5736_v45  ;;  %v13949_v35 = vpack.c.bf16 %v5689_v40, %v5686_v18  ;;  %v391_v63 = vld [vmem:[#allocation5 + $0x640] sm:$0xff]  ;;  %v392_v6 = vld [vmem:[#allocation5 + $0x648] sm:$0xff] }
 0x2a4   : > { %v13951_v61 = vsub.f32 %v405_v57, %v5686_v18  ;;  %v15164_v26 = vand.u32 4294901760, %v13911_v23  ;;  %v13955_v12 = vsub.f32 %v406_v60, %v5689_v40  ;;  %v13957_v9 = vpack.c.bf16 %v5641_v5, %v5638_v22 }
 0x2a5   : > { %15692 = vst [vmem:[#allocation17_spill] sm:$0xff] %v13949_v35  ;;  %10251 = vmatpush3.bf16.msra.mxu0 %v13861_v31  ;;  %v15166_v53 = vand.u32 4294901760, %v13930_v54  ;;  %v5718_v45 = vsub.f32 %v13914_v16, %v15167_v39  ;;  %v13965_v57 = vsub.f32 %v389_v4, %v5638_v22  ;;  %v13967_v44 = vsub.f32 %v390_v52, %v5641_v5  ;;  %v409_v5 = vld [vmem:[#allocation5 + $0x6d0] sm:$0xff] }
 0x2a6   : > { %15693 = vst [vmem:[#allocation18_spill] sm:$0xff] %v13957_v9  ;;  %10275 = vmatpush3.bf16.msra.mxu1 %v15649_v8  ;;  %10253 = vmatprep.subr.bf16.mxu0 %v13872_v7  ;;  %v5750_v31 = vand.u32 4294901760, %v5749_v55  ;;  %v15168_v40 = vand.u32 4294901760, %v13932_v11  ;;  %v13971_v60 = vpack.c.bf16 %v5869_v28, %v5862_v49  ;;  %v5757_v18 = vand.u32 4294901760, %v5756_v37  ;;  %v410_v28 = vld [vmem:[#allocation5 + $0x6d8] sm:$0xff]  ;;  %v393_v55 = vld [vmem:[#allocation5 + $0x650] sm:$0xff] }
 0x2a7   : > { %15694 = vst [vmem:[#allocation12_spill] sm:$0xff] %v13965_v57  ;;  %15695 = vst [vmem:[#allocation11_spill] sm:$0xff] %v13967_v44  ;;  %10277 = vmatprep.subr.bf16.mxu1 %v15652_v13  ;;  %v13973_v10 = vpack.c.bf16 %v5695_v15, %v5692_v36  ;;  %v5875_v8 = vsub.f32 %v13909_v43, %v15165_v17  ;;  %v13978_v7 = vsub.f32 %v407_v56, %v5692_v36 }
 0x2a8   : > { %v8223_v1 = vpop.f32.mrb[20].mxu1  ;;  %v5882_v22 = vsub.f32 %v13911_v23, %v15164_v26  ;;  %v5644_v4 = vand.u32 4294901760, %v391_v63  ;;  %v5647_v52 = vand.u32 4294901760, %v392_v6  ;;  %v5763_v49 = vsub.f32 %v13930_v54, %v15166_v53 }
 0x2a9   : > { %15696 = vst [vmem:[#allocation16_spill] sm:$0xff] %v13973_v10  ;;  %v8224_v13 = vpop.f32.mrb[21].mxu1  ;;  %10255 = vmatpush3.bf16.msra.mxu0 %v13878_v2  ;;  %v5719_v37 = vand.u32 4294901760, %v5718_v45  ;;  %v5770_v26 = vsub.f32 %v13932_v11, %v15168_v40  ;;  %v13997_v53 = vpack.c.bf16 %v5757_v18, %v5750_v31  ;;  %v13999_v39 = vsub.f32 %v408_v42, %v5695_v15  ;;  %v394_v2 = vld [vmem:[#allocation5 + $0x658] sm:$0xff] }
 0x2aa   : > { %v8225_v36 = vadd.f32 %v8224_v13, %v8223_v1  ;;  %10279 = vmatpush3.bf16.msra.mxu1 %v13556_v48  ;;  %10289 = vmatprep.subr.bf16.mxu0 %v13880_v30  ;;  %v5876_v45 = vand.u32 4294901760, %v5875_v8  ;;  %v5698_v1 = vand.u32 4294901760, %v409_v5  ;;  %v5883_v48 = vand.u32 4294901760, %v5882_v22 }
 0x2ab   : > { %10281 = vmatprep.subr.bf16.mxu1 %v13577_v24  ;;  %v14004_v56 = vsub.f32 %v391_v63, %v5644_v4  ;;  %v5701_v40 = vand.u32 4294901760, %v410_v28  ;;  %v14007_v17 = vpack.c.bf16 %v5647_v52, %v5644_v4  ;;  %v15698_v24 = vand.u32 4294901760, %v13951_v61 }
 0x2ac   : > { %v14001_v13 = vadd.f32 %v8225_v36, %v3512_v29  ;;  %5510 = vmatmul.mubr.f32.vlgmr.msra.gmra.mrb[34].mxu0 %v13610_v19  ;;  %v15699_v15 = vand.u32 4294901760, %v13955_v12  ;;  %v5764_v63 = vand.u32 4294901760, %v5763_v49  ;;  %v5771_v31 = vand.u32 4294901760, %v5770_v26  ;;  %v411_v36 = vld [vmem:[#allocation5 + $0x6e0] sm:$0xff] }
 0x2ad   : > { %10291 = vmatpush3.bf16.msra.mxu0 %v13898_v62  ;;  %15697 = vst [vmem:[#allocation23_spill] sm:$0xff] %v14007_v17  ;;  %v5889_v42 = vsub.f32 %v13951_v61, %v15698_v24  ;;  %5720 = vmatprep.mubr.f32.mxu0 %v5719_v37  ;;  %v15700_v18 = vand.u32 4294901760, %v13965_v57  ;;  %v15701_v22 = vand.u32 4294901760, %v13967_v44  ;;  %v412_v24 = vld [vmem:[#allocation5 + $0x6e8] sm:$0xff]  ;;  %v5650_v37 = vand.u32 4294901760, %v393_v55 }
 0x2ae   : > { %v5896_v29 = vsub.f32 %v13955_v12, %v15699_v15  ;;  %10283 = vmatpush3.bf16.msra.mxu1 %v13636_v41  ;;  %10293 = vmatprep.subr.bf16.mxu0 %v13900_v59  ;;  %v14024_v15 = vsub.f32 %v392_v6, %v5647_v52  ;;  %v5653_v41 = vand.u32 4294901760, %v394_v2  ;;  %v15177_v59 = vand.u32 4294901760, %v13978_v7 }
 0x2af   : > { %v5777_v8 = vsub.f32 %v13965_v57, %v15700_v18  ;;  %v5784_v4 = vsub.f32 %v13967_v44, %v15701_v22  ;;  %10285 = vmatprep.subr.bf16.mxu1 %v13662_v14  ;;  %v14027_v49 = vpack.c.bf16 %v5883_v48, %v5876_v45  ;;  %v14029_v26 = vpack.c.bf16 %v5701_v40, %v5698_v1 }
 0x2b0   : > { %v14031_v62 = vsub.f32 %v409_v5, %v5698_v1  ;;  %v14033_v18 = vsub.f32 %v410_v28, %v5701_v40  ;;  %v5890_v22 = vand.u32 4294901760, %v5889_v42  ;;  %v5897_v44 = vand.u32 4294901760, %v5896_v29  ;;  %v395_v5 = vld [vmem:[#allocation5 + $0x660] sm:$0xff]  ;;  %v396_v1 = vld [vmem:[#allocation5 + $0x668] sm:$0xff] }
 0x2b1   : > { %15702 = vst [vmem:[#allocation19_spill] sm:$0xff] %v14029_v26  ;;  %10295 = vmatpush3.bf16.msra.mxu0 %v13902_v34  ;;  %v5704_v57 = vand.u32 4294901760, %v411_v36  ;;  %v5707_v14 = vand.u32 4294901760, %v412_v24  ;;  %v14038_v6 = vpack.c.bf16 %v5771_v31, %v5764_v63  ;;  %v5778_v52 = vand.u32 4294901760, %v5777_v8  ;;  %v14055_v31 = vld [vmem:[#allocation5 + $0x6f0] sm:$0xff] }
 0x2b2   : > { %15703 = vst [vmem:[#allocation24_spill] sm:$0xff] %v14033_v18  ;;  %10287 = vmatpush3.bf16.msra.mxu1 %v13686_v32  ;;  %10297 = vmatprep.subr.bf16.mxu0 %v13907_v20  ;;  %v5785_v45 = vand.u32 4294901760, %v5784_v4  ;;  %v15178_v48 = vand.u32 4294901760, %v13999_v39  ;;  %v14042_v40 = vpack.c.bf16 %v5653_v41, %v5650_v37  ;;  %v14044_v28 = vsub.f32 %v393_v55, %v5650_v37 }
 0x2b3   : > { %10321 = vmatprep.subr.bf16.mxu1 %v13926_v25  ;;  %v14049_v32 = vsub.f32 %v13978_v7, %v15177_v59  ;;  %v14052_v29 = vsub.f32 %v394_v2, %v5653_v41  ;;  %v14057_v25 = vld [vmem:[#allocation5 + $0x6f8] sm:$0xff]  ;;  %v15185_v55 = vand.u32 4294901760, %v14031_v62  ;;  %v10332_v4 = vpack.c.bf16 %v5897_v44, %v5890_v22  ;;  %v187_v41 = vld [vmem:[%s11021_s29 + $0x60] sm:$0xff] }
 0x2b4   : > { %v14063_v37 = vpack.c.bf16 %v5707_v14, %v5704_v57  ;;  %v14065_v59 = vsub.f32 %v411_v36, %v5704_v57  ;;  %v5656_v2 = vand.u32 4294901760, %v395_v5  ;;  %v10334_v63 = vpack.c.bf16 %v5785_v45, %v5778_v52  ;;  %v14082_v52 = vld [vmem:[#allocation5 + $0x670] sm:$0xff] }
 0x2b5   : > { %15704 = vst [vmem:[#allocation22_spill] sm:$0xff] %v14052_v29  ;;  %5614 = vmatmul.mubr.f32.vlgmr.msra.gmra.mrb[34].mxu1 %v13610_v19  ;;  %10299 = vmatpush3.bf16.msra.mxu0 %v13928_v47  ;;  %v14070_v42 = vsub.f32 %v412_v24, %v5707_v14  ;;  %v5910_v19 = vsub.f32 %v13999_v39, %v15178_v48  ;;  %v5659_v8 = vand.u32 4294901760, %v396_v1  ;;  %v5904_v44 = vand.u32 4294901760, %v14049_v32  ;;  %v14084_v24 = vld [vmem:[#allocation5 + $0x678] sm:$0xff] }
 0x2b6   : > { %15705 = vst [vmem:[#allocation20_spill] sm:$0xff] %v14065_v59  ;;  %10323 = vmatpush3.bf16.msra.mxu1 %v13947_v58  ;;  %10301 = vmatprep.subr.bf16.mxu0 %v13949_v35  ;;  %v15706_v57 = vand.u32 4294901760, %v14004_v56  ;;  %v5710_v58 = vand.u32 4294901760, %v14055_v31  ;;  %v5713_v22 = vand.u32 4294901760, %v14057_v25  ;;  %v15707_v14 = vand.u32 4294901760, %v14024_v15 }
 0x2b7   : > { %10325 = vmatprep.subr.bf16.mxu1 %v13971_v60  ;;  %5956 = vmatprep.mubr.f32.mxu1 %v13885_v51  ;;  %v5917_v45 = vsub.f32 %v14031_v62, %v15185_v55  ;;  %v15708_v32 = vand.u32 4294901760, %v14033_v18  ;;  %v14096_v48 = vand.u32 4294901760, %v187_v41  ;;  %v14099_v35 = vsub.f32 %v395_v5, %v5656_v2 }
 0x2b8   : > { %v5791_v36 = vsub.f32 %v14004_v56, %v15706_v57  ;;  %v5798_v60 = vsub.f32 %v14024_v15, %v15707_v14  ;;  %v5911_v55 = vand.u32 4294901760, %v5910_v19  ;;  %v14106_v20 = vsub.f32 %v396_v1, %v5659_v8 }
 0x2b9   : > { %v5924_v57 = vsub.f32 %v14033_v18, %v15708_v32  ;;  %10303 = vmatpush3.bf16.msra.mxu0 %v13957_v9  ;;  %v5662_v32 = vand.u32 4294901760, %v14082_v52  ;;  %v5665_v18 = vand.u32 4294901760, %v14084_v24  ;;  %v14112_v51 = vsub.f32 %v14055_v31, %v5710_v58 }
 0x2ba   : > { %10327 = vmatpush3.bf16.msra.mxu1 %v13997_v53  ;;  %10305 = vmatprep.subr.bf16.mxu0 %v13973_v10  ;;  %v5792_v5 = vand.u32 4294901760, %v5791_v36  ;;  %v14115_v47 = vsub.f32 %v14057_v25, %v5713_v22  ;;  %v5799_v14 = vand.u32 4294901760, %v5798_v60  ;;  %v5918_v10 = vand.u32 4294901760, %v5917_v45 }
 0x2bb   : > { %10329 = vmatprep.subr.bf16.mxu1 %v14027_v49  ;;  %v5925_v19 = vand.u32 4294901760, %v5924_v57  ;;  %v14119_v1 = vsub.f32 %v187_v41, %v14096_v48  ;;  %v14122_v9 = vpack.c.bf16 %v5659_v8, %v5656_v2  ;;  %v15709_v49 = vand.u32 4294901760, %v14044_v28 }
 0x2bc   : > { %v15710_v36 = vand.u32 4294901760, %v14052_v29  ;;  %v15711_v53 = vand.u32 4294901760, %v14065_v59  ;;  %v14136_v41 = vsub.f32 %v14082_v52, %v5662_v32  ;;  %v14139_v8 = vsub.f32 %v14084_v24, %v5665_v18 }
 0x2bd   : > { %10307 = vmatpush3.bf16.msra.mxu0 %v14007_v17  ;;  %v5805_v31 = vsub.f32 %v14044_v28, %v15709_v49  ;;  %v15205_v45 = vand.u32 4294901760, %v14106_v20  ;;  %v10336_v49 = vpack.c.bf16 %v5911_v55, %v5904_v44  ;;  %v10338_v17 = vpack.c.bf16 %v5799_v14, %v5792_v5 }
 0x2be   : > { %v5812_v25 = vsub.f32 %v14052_v29, %v15710_v36  ;;  %v5931_v60 = vsub.f32 %v14065_v59, %v15711_v53  ;;  %10331 = vmatpush3.bf16.msra.mxu1 %v14038_v6  ;;  %10309 = vmatprep.subr.bf16.mxu0 %v14029_v26  ;;  %v15712_v36 = vand.u32 4294901760, %v14070_v42  ;;  %v15204_v6 = vand.u32 4294901760, %v14112_v51 }
 0x2bf   : > { %v8258_v57 = vpop.f32.mrb[22].mxu0  ;;  %10333 = vmatprep.subr.bf16.mxu1 %v10332_v4  ;;  %v14148_v59 = vpack.c.bf16 %v5713_v22, %v5710_v58  ;;  %v10340_v24 = vpack.c.bf16 %v5925_v19, %v5918_v10  ;;  %v15206_v2 = vand.u32 4294901760, %v14119_v1  ;;  %v5806_v4 = vand.u32 4294901760, %v5805_v31 }
 0x2c0   : > { %v5938_v53 = vsub.f32 %v14070_v42, %v15712_v36  ;;  %v8259_v52 = vpop.f32.mrb[23].mxu0  ;;  %v5813_v55 = vand.u32 4294901760, %v5812_v25  ;;  %v5932_v44 = vand.u32 4294901760, %v5931_v60  ;;  %v15713_v36 = vand.u32 4294901760, %v14099_v35 }
 0x2c1   : > { %v8260_v29 = vadd.f32 %v8259_v52, %v8258_v57  ;;  %10311 = vmatpush3.bf16.msra.mxu0 %v14042_v40  ;;  %v5826_v58 = vsub.f32 %v14106_v20, %v15205_v45  ;;  %v15202_v10 = vand.u32 4294901760, %v14136_v41  ;;  %v15203_v22 = vand.u32 4294901760, %v14139_v8 }
 0x2c2   : > { %10335 = vmatpush3.bf16.msra.mxu1 %v10334_v63  ;;  %10313 = vmatprep.subr.bf16.mxu0 %v14063_v37  ;;  %v5819_v26 = vsub.f32 %v14099_v35, %v15713_v36  ;;  %v5939_v5 = vand.u32 4294901760, %v5938_v53  ;;  %v5945_v63 = vsub.f32 %v14112_v51, %v15204_v6  ;;  %v15714_v19 = vand.u32 4294901760, %v14115_v47 }
 0x2c3   : > { %v3788_v14 = vadd.f32 %v8260_v29, %v14001_v13  ;;  %10337 = vmatprep.subr.bf16.mxu1 %v10336_v49  ;;  %v5724_v25 = vsub.f32 %v14119_v1, %v15206_v2  ;;  %v14172_v60 = vpack.c.bf16 %v5665_v18, %v5662_v32  ;;  %v10342_v57 = vpack.c.bf16 %v5813_v55, %v5806_v4 }
 0x2c4   : > { %v5952_v31 = vsub.f32 %v14115_v47, %v15714_v19  ;;  %v10352_v13 = vpack.c.bf16 %v13785_v3, %v13781_v27  ;;  %v5820_v29 = vand.u32 4294901760, %v5819_v26  ;;  %v5827_v49 = vand.u32 4294901760, %v5826_v58 }
 0x2c5   : > { %10315 = vmatpush3.bf16.msra.mxu0 %v14122_v9  ;;  %v5833_v53 = vsub.f32 %v14136_v41, %v15202_v10  ;;  %v5840_v52 = vsub.f32 %v14139_v8, %v15203_v22  ;;  %v10344_v18 = vpack.c.bf16 %v5939_v5, %v5932_v44  ;;  %v5946_v32 = vand.u32 4294901760, %v5945_v63 }
 0x2c6   : > { %10339 = vmatpush3.bf16.msra.mxu1 %v10338_v17  ;;  %10317 = vmatprep.subr.bf16.mxu0 %v14148_v59  ;;  %v5953_v4 = vand.u32 4294901760, %v5952_v31  ;;  %v5725_v36 = vand.u32 4294901760, %v5724_v25  ;;  %v10354_v17 = vpack.c.bf16 %v13821_v38, %v13809_v46  ;;  %v10356_v26 = vpack.c.bf16 %v13844_v0, %v13841_v21 }
 0x2c7   : > { %10341 = vmatprep.subr.bf16.mxu1 %v10340_v24  ;;  %v10346_v10 = vpack.c.bf16 %v5827_v49, %v5820_v29  ;;  %v5834_v22 = vand.u32 4294901760, %v5833_v53  ;;  %v5841_v24 = vand.u32 4294901760, %v5840_v52  ;;  %v10358_v63 = vpack.c.bf16 %v13888_v50, %v13883_v33  ;;  %v15717_v29 = vld [vmem:[#allocation13_spill] sm:$0xff] }
 0x2c8   : > { %v8293_v55 = vpop.f32.mrb[22].mxu1  ;;  %v10348_v44 = vpack.c.bf16 %v5953_v4, %v5946_v32  ;;  %v10360_v25 = vpack.c.bf16 %v13911_v23, %v13909_v43  ;;  %v10368_v49 = vpack.c.bf16 %v13999_v39, %v13978_v7  ;;  %v15718_v53 = vld [vmem:[#allocation25_spill] sm:$0xff]  ;;  %v15719_v52 = vand.u32 4294901760, %v13914_v16  ;;  %v15720_v32 = vld [vmem:[#allocation24_spill] sm:$0xff] }
 0x2c9   : > { %v8294_v19 = vpop.f32.mrb[23].mxu1  ;;  %10319 = vmatpush3.bf16.msra.mxu0 %v14172_v60  ;;  %v10350_v31 = vpack.c.bf16 %v5841_v24, %v5834_v22  ;;  %v15716_v22 = vld [vmem:[#allocation11_spill] sm:$0xff]  ;;  %v10372_v4 = vpack.c.bf16 %v15720_v32, %v14031_v62  ;;  %v15725_v24 = vld [vmem:[#allocation17_spill] sm:$0xff]  ;;  %v15733_v6 = vand.u32 4294901760, %v13821_v38  ;;  %v15736_v38 = vand.u32 4294901760, %v13883_v33 }
 0x2ca   : > { %v8295_v58 = vadd.f32 %v8294_v19, %v8293_v55  ;;  %10343 = vmatpush3.bf16.msra.mxu1 %v10342_v57  ;;  %10353 = vmatprep.subr.bf16.mxu0 %v10352_v13  ;;  %v10362_v57 = vpack.c.bf16 %v13932_v11, %v13930_v54  ;;  %v15721_v55 = vld [vmem:[#allocation15_spill] sm:$0xff] }
 0x2cb   : > { %10345 = vmatprep.subr.bf16.mxu1 %v10344_v18  ;;  %v10370_v18 = vpack.c.bf16 %v14024_v15, %v14004_v56 }
 0x2cc   : > { %v3892_v5 = vadd.f32 %v8295_v58, %v3788_v14  ;;  %5726 = vmatmul.mubr.f32.vlgmr.msra.gmra.mrb[36].mxu0 %v5725_v36  ;;  %v10364_v14 = vpack.c.bf16 %v13955_v12, %v13951_v61  ;;  %v15722_v36 = vld [vmem:[#allocation22_spill] sm:$0xff] }
 0x2cd   : > { %10355 = vmatpush3.bf16.msra.mxu0 %v10354_v17  ;;  %6093 = vmatprep.mubr.f32.mxu0 %v13914_v16  ;;  %v10374_v19 = vpack.c.bf16 %v15722_v36, %v14044_v28  ;;  %v15723_v17 = vld [vmem:[#allocation14_spill] sm:$0xff]  ;;  %v15724_v16 = vld [vmem:[#allocation20_spill] sm:$0xff] }
 0x2ce   : > { %10347 = vmatpush3.bf16.msra.mxu1 %v10346_v10  ;;  %10357 = vmatprep.subr.bf16.mxu0 %v10356_v26  ;;  %v15715_v10 = vld [vmem:[#allocation12_spill] sm:$0xff]  ;;  %v10376_v26 = vpack.c.bf16 %v14070_v42, %v15724_v16 }
 0x2cf   : > { %10349 = vmatprep.subr.bf16.mxu1 %v10348_v44  ;;  %v10366_v13 = vpack.c.bf16 %v15716_v22, %v15715_v10 }
 0x2d1   : > { %10359 = vmatpush3.bf16.msra.mxu0 %v10358_v63 }
 0x2d2   : > { %10351 = vmatpush3.bf16.msra.mxu1 %v10350_v31  ;;  %10361 = vmatprep.subr.bf16.mxu0 %v10360_v25  ;;  %v10378_v31 = vpack.c.bf16 %v14106_v20, %v14099_v35  ;;  %v15726_v25 = vld [vmem:[#allocation18_spill] sm:$0xff] }
 0x2d3   : > { %10385 = vmatprep.subr.bf16.mxu1 %v13880_v30 }
 0x2d5   : > { %5958 = vmatmul.mubr.f32.vlgmr.msra.gmra.mrb[36].mxu1 %v14096_v48  ;;  %10363 = vmatpush3.bf16.msra.mxu0 %v10362_v57  ;;  %v10380_v57 = vpack.c.bf16 %v14115_v47, %v14112_v51 }
 0x2d6   : > { %10387 = vmatpush3.bf16.msra.mxu1 %v15717_v29  ;;  %10365 = vmatprep.subr.bf16.mxu0 %v10364_v14 }
 0x2d7   : > { %10389 = vmatprep.subr.bf16.mxu1 %v15718_v53  ;;  %6200 = vmatprep.mubr.f32.mxu1 %v15719_v52  ;;  %v15728_v52 = vld [vmem:[#allocation23_spill] sm:$0xff] }
 0x2d9   : > { %10367 = vmatpush3.bf16.msra.mxu0 %v10366_v13  ;;  %v15727_v13 = vld [vmem:[#allocation16_spill] sm:$0xff] }
 0x2da   : > { %10391 = vmatpush3.bf16.msra.mxu1 %v13902_v34  ;;  %10369 = vmatprep.subr.bf16.mxu0 %v10368_v49  ;;  %v10382_v49 = vpack.c.bf16 %v14139_v8, %v14136_v41 }
 0x2db   : > { %10393 = vmatprep.subr.bf16.mxu1 %v15721_v55 }
 0x2dd   : > { %10371 = vmatpush3.bf16.msra.mxu0 %v10370_v18  ;;  %v15729_v18 = vand.u32 4294901760, %v13781_v27  ;;  %v15734_v27 = vand.u32 4294901760, %v13841_v21  ;;  %v15737_v21 = vand.u32 4294901760, %v13888_v50 }
 0x2de   : > { %10395 = vmatpush3.bf16.msra.mxu1 %v15723_v17  ;;  %10373 = vmatprep.subr.bf16.mxu0 %v10372_v4  ;;  %v15730_v4 = vand.u32 4294901760, %v13785_v3  ;;  %v15735_v3 = vand.u32 4294901760, %v13844_v0  ;;  %v15738_v0 = vld [vmem:[#allocation21_spill] sm:$0xff] }
 0x2df   : > { %v8328_v58 = vpop.f32.mrb[24].mxu0  ;;  %10397 = vmatprep.subr.bf16.mxu1 %v15725_v24 }
 0x2e0   : > { %v8329_v44 = vpop.f32.mrb[25].mxu0 }
 0x2e1   : > { %v8330_v63 = vadd.f32 %v8329_v44, %v8328_v58  ;;  %10375 = vmatpush3.bf16.msra.mxu0 %v10374_v19  ;;  %v10416_v19 = vpack.c.bf16 %v15730_v4, %v15729_v18  ;;  %v15731_v58 = vld [vmem:[#allocation19_spill] sm:$0xff]  ;;  %v10420_v18 = vpack.c.bf16 %v15735_v3, %v15734_v27  ;;  %v15744_v3 = vand.u32 4294901760, %v13955_v12 }
 0x2e2   : > { %10399 = vmatpush3.bf16.msra.mxu1 %v15726_v25  ;;  %10377 = vmatprep.subr.bf16.mxu0 %v10376_v26  ;;  %v14233_v26 = vld [vmem:[#allocation5 + $0x780] sm:$0xff]  ;;  %v15745_v12 = vand.u32 4294901760, %v15715_v10  ;;  %v15751_v10 = vand.u32 4294901760, %v14024_v15 }
 0x2e3   : > { %v4004_v14 = vadd.f32 %v8330_v63, %v3892_v5  ;;  %10401 = vmatprep.subr.bf16.mxu1 %v15727_v13  ;;  %v14235_v5 = vld [vmem:[#allocation5 + $0x788] sm:$0xff]  ;;  %v6530_v4 = vand.u32 4294901760, %v14233_v26 }
 0x2e5   : > { %10379 = vmatpush3.bf16.msra.mxu0 %v10378_v31  ;;  %v15732_v31 = vand.u32 4294901760, %v13809_v46  ;;  %v14252_v46 = vld [vmem:[#allocation5 + $0x700] sm:$0xff] }
 0x2e6   : > { %10403 = vmatpush3.bf16.msra.mxu1 %v15728_v52  ;;  %10381 = vmatprep.subr.bf16.mxu0 %v10380_v57  ;;  %v15207_v50 = vand.u32 4294901760, %v14252_v46 }
 0x2e7   : > { %10405 = vmatprep.subr.bf16.mxu1 %v15731_v58  ;;  %v10418_v45 = vpack.c.bf16 %v15733_v6, %v15732_v31  ;;  %v10422_v6 = vpack.c.bf16 %v15737_v21, %v15736_v38  ;;  %v14267_v31 = vsub.f32 %v14233_v26, %v6530_v4 }
 0x2e8   : > { %v8363_v44 = vpop.f32.mrb[24].mxu1 }
 0x2e9   : > { %v8364_v63 = vpop.f32.mrb[25].mxu1  ;;  %10383 = vmatpush3.bf16.msra.mxu0 %v10382_v49  ;;  %v6533_v49 = vand.u32 4294901760, %v14235_v5 }
 0x2ea   : > { %v8365_v57 = vadd.f32 %v8364_v63, %v8363_v44  ;;  %10407 = vmatpush3.bf16.msra.mxu1 %v14042_v40  ;;  %10417 = vmatprep.subr.bf16.mxu0 %v10416_v19  ;;  %v14259_v19 = vld [vmem:[#allocation5 + $0x708] sm:$0xff]  ;;  %v15740_v44 = vand.u32 4294901760, %v13911_v23  ;;  %v15742_v23 = vand.u32 4294901760, %v13932_v11  ;;  %v418_v11 = vld [vmem:[#allocation5 + $0x718] sm:$0xff] }
 0x2eb   : > { %10409 = vmatprep.subr.bf16.mxu1 %v14063_v37  ;;  %v14271_v33 = vsub.f32 %v14235_v5, %v6533_v49  ;;  %v6485_v27 = vand.u32 4294901760, %v14259_v19  ;;  %v15743_v5 = vand.u32 4294901760, %v13951_v61 }
 0x2ec   : > { %v14249_v2 = vadd.f32 %v8365_v57, %v4004_v14  ;;  %6096 = vmatmul.mubr.f32.vlgmr.msra.gmra.mrb[38].mxu0 %v14119_v1  ;;  %v15739_v14 = vand.u32 4294901760, %v13909_v43  ;;  %v14276_v57 = vld [vmem:[#allocation5 + $0x798] sm:$0xff]  ;;  %v15741_v43 = vand.u32 4294901760, %v13930_v54  ;;  %v14295_v54 = vsub.f32 %v14252_v46, %v15207_v50 }
 0x2ed   : > { %10419 = vmatpush3.bf16.msra.mxu0 %v10418_v45  ;;  %6370 = vmatprep.mubr.f32.mxu0 %v15738_v0  ;;  %v14274_v45 = vld [vmem:[#allocation5 + $0x790] sm:$0xff]  ;;  %v6539_v21 = vand.u32 4294901760, %v14276_v57  ;;  %v15750_v50 = vand.u32 4294901760, %v14004_v56 }
 0x2ee   : > { %10411 = vmatpush3.bf16.msra.mxu1 %v14122_v9  ;;  %10421 = vmatprep.subr.bf16.mxu0 %v10420_v18  ;;  %v10424_v63 = vpack.c.bf16 %v15740_v44, %v15739_v14  ;;  %v10426_v26 = vpack.c.bf16 %v15742_v23, %v15741_v43  ;;  %v10428_v18 = vpack.c.bf16 %v15744_v3, %v15743_v5  ;;  %v6536_v38 = vand.u32 4294901760, %v14274_v45  ;;  %v417_v14 = vld [vmem:[#allocation5 + $0x710] sm:$0xff] }
 0x2ef   : > { %10413 = vmatprep.subr.bf16.mxu1 %v14148_v59  ;;  %v15746_v44 = vand.u32 4294901760, %v15716_v22  ;;  %v15747_v43 = vand.u32 4294901760, %v13978_v7  ;;  %v15748_v23 = vand.u32 4294901760, %v13999_v39  ;;  %v15749_v3 = vand.u32 4294901760, %v14119_v1  ;;  %v435_v1 = vld [vmem:[#allocation5 + $0x7a0] sm:$0xff] }
 0x2f0   : > { %v10434_v61 = vpack.c.bf16 %v15751_v10, %v15750_v50  ;;  %v15752_v22 = vand.u32 4294901760, %v14031_v62  ;;  %v15753_v7 = vand.u32 4294901760, %v15720_v32  ;;  %v15754_v39 = vand.u32 4294901760, %v14044_v28  ;;  %v436_v32 = vld [vmem:[#allocation5 + $0x7a8] sm:$0xff] }
 0x2f1   : > { %10423 = vmatpush3.bf16.msra.mxu0 %v10422_v6  ;;  %v15212_v6 = vand.u32 4294901760, %v14267_v31  ;;  %v10432_v5 = vpack.c.bf16 %v15748_v23, %v15747_v43  ;;  %v6488_v43 = vand.u32 4294901760, %v417_v14  ;;  %v14327_v56 = vsub.f32 %v14274_v45, %v6536_v38 }
 0x2f2   : > { %10415 = vmatpush3.bf16.msra.mxu1 %v14172_v60  ;;  %10425 = vmatprep.subr.bf16.mxu0 %v10424_v63  ;;  %v10430_v63 = vpack.c.bf16 %v15746_v44, %v15745_v12  ;;  %v10436_v12 = vpack.c.bf16 %v15753_v7, %v15752_v22  ;;  %v15755_v44 = vand.u32 4294901760, %v15722_v36  ;;  %v14330_v15 = vsub.f32 %v14276_v57, %v6539_v21  ;;  %v190_v36 = vld [vmem:[%s11021_s29 + $0x78] sm:$0xff] }
 0x2f3   : > { %10449 = vmatprep.subr.bf16.mxu1 %v13880_v30  ;;  %v14307_v30 = vsub.f32 %v14259_v19, %v6485_v27  ;;  %v6491_v62 = vand.u32 4294901760, %v418_v11  ;;  %v6709_v28 = vsub.f32 %v14267_v31, %v15212_v6  ;;  %v15756_v50 = vand.u32 4294901760, %v15724_v16 }
 0x2f4   : > { %v14323_v19 = vpack.c.bf16 %v15755_v44, %v15754_v39  ;;  %v15758_v45 = vand.u32 4294901760, %v14099_v35  ;;  %v15759_v57 = vand.u32 4294901760, %v14106_v20  ;;  %v15760_v23 = vand.u32 4294901760, %v14271_v33  ;;  %v420_v39 = vld [vmem:[#allocation5 + $0x728] sm:$0xff] }
 0x2f5   : > { %6204 = vmatmul.mubr.f32.vlgmr.msra.gmra.mrb[38].mxu1 %v15749_v3  ;;  %10427 = vmatpush3.bf16.msra.mxu0 %v10426_v26  ;;  %v15761_v16 = vand.u32 4294901760, %v14112_v51  ;;  %v15763_v35 = vand.u32 4294901760, %v14136_v41  ;;  %v15764_v20 = vand.u32 4294901760, %v14139_v8  ;;  %v14366_v7 = vpack.c.bf16 %v6533_v49, %v6530_v4 }
 0x2f6   : > { %10451 = vmatpush3.bf16.msra.mxu1 %v15717_v29  ;;  %10429 = vmatprep.subr.bf16.mxu0 %v10428_v18  ;;  %v15757_v29 = vand.u32 4294901760, %v14070_v42  ;;  %v14347_v18 = vpack.c.bf16 %v15759_v57, %v15758_v45  ;;  %v6716_v3 = vsub.f32 %v14271_v33, %v15760_v23  ;;  %v15762_v42 = vand.u32 4294901760, %v14115_v47 }
 0x2f7   : > { %10453 = vmatprep.subr.bf16.mxu1 %v15718_v53  ;;  %6474 = vmatprep.mubr.f32.mxu1 %v15738_v0  ;;  %v15211_v53 = vand.u32 4294901760, %v14295_v54  ;;  %v14364_v22 = vpack.c.bf16 %v15764_v20, %v15763_v35  ;;  %v419_v0 = vld [vmem:[#allocation5 + $0x720] sm:$0xff]  ;;  %v15210_v44 = vand.u32 4294901760, %v14307_v30  ;;  %v6542_v51 = vand.u32 4294901760, %v435_v1  ;;  %v438_v35 = vld [vmem:[#allocation5 + $0x7b8] sm:$0xff] }
 0x2f8   : > { %v14341_v26 = vpack.c.bf16 %v15757_v29, %v15756_v50  ;;  %v14358_v10 = vpack.c.bf16 %v15762_v42, %v15761_v16  ;;  %v14369_v50 = vsub.f32 %v417_v14, %v6488_v43  ;;  %v6545_v29 = vand.u32 4294901760, %v436_v32  ;;  %v437_v42 = vld [vmem:[#allocation5 + $0x7b0] sm:$0xff] }
 0x2f9   : > { %10431 = vmatpush3.bf16.msra.mxu0 %v10430_v63  ;;  %v14371_v47 = vand.u32 4294901760, %v190_v36  ;;  %v14374_v41 = vsub.f32 %v418_v11, %v6491_v62  ;;  %v6710_v8 = vand.u32 4294901760, %v6709_v28  ;;  %v15209_v4 = vand.u32 4294901760, %v14327_v56 }
 0x2fa   : > { %10455 = vmatpush3.bf16.msra.mxu1 %v13902_v34  ;;  %10433 = vmatprep.subr.bf16.mxu0 %v10432_v5  ;;  %v15208_v49 = vand.u32 4294901760, %v14330_v15  ;;  %v6717_v45 = vand.u32 4294901760, %v6716_v3  ;;  %v6494_v63 = vand.u32 4294901760, %v419_v0  ;;  %v6497_v14 = vand.u32 4294901760, %v420_v39 }
 0x2fb   : > { %15765 = vst [vmem:[#allocation12_spill] sm:$0xff] %v14371_v47  ;;  %10457 = vmatprep.subr.bf16.mxu1 %v15721_v55  ;;  %v6597_v57 = vsub.f32 %v14295_v54, %v15211_v53  ;;  %v15766_v23 = vand.u32 4294901760, %v14252_v46  ;;  %v14386_v11 = vpack.c.bf16 %v6539_v21, %v6536_v38  ;;  %v14388_v5 = vpack.c.bf16 %v6491_v62, %v6488_v43  ;;  %v421_v21 = vld [vmem:[#allocation5 + $0x730] sm:$0xff] }
 0x2fc   : > { %v6604_v28 = vsub.f32 %v14307_v30, %v15210_v44  ;;  %v14393_v55 = vpack.c.bf16 %v6545_v29, %v6542_v51  ;;  %v14395_v3 = vsub.f32 %v435_v1, %v6542_v51  ;;  %v14397_v16 = vsub.f32 %v436_v32, %v6545_v29  ;;  %v440_v44 = vld [vmem:[#allocation5 + $0x7c8] sm:$0xff] }
 0x2fd   : > { %v14384_v34 = vpack.c.bf16 %v6485_v27, %v15766_v23  ;;  %15768 = vst [vmem:[#allocation13_spill] sm:$0xff] %v14386_v11  ;;  %10435 = vmatpush3.bf16.msra.mxu0 %v10434_v61  ;;  %v14400_v46 = vsub.f32 %v190_v36, %v14371_v47  ;;  %v6723_v27 = vsub.f32 %v14327_v56, %v15209_v4  ;;  %v422_v61 = vld [vmem:[#allocation5 + $0x738] sm:$0xff]  ;;  %v15214_v43 = vand.u32 4294901760, %v14369_v50  ;;  %v439_v4 = vld [vmem:[#allocation5 + $0x7c0] sm:$0xff] }
 0x2fe   : > { %15769 = vst [vmem:[#allocation25_spill] sm:$0xff] %v14393_v55  ;;  %10459 = vmatpush3.bf16.msra.mxu1 %v15723_v17  ;;  %10437 = vmatprep.subr.bf16.mxu0 %v10436_v12  ;;  %v6730_v38 = vsub.f32 %v14330_v15, %v15208_v49  ;;  %v15213_v62 = vand.u32 4294901760, %v14374_v41  ;;  %v14412_v32 = vpack.c.bf16 %v6717_v45, %v6710_v8  ;;  %v6598_v36 = vand.u32 4294901760, %v6597_v57 }
 0x2ff   : > { %15767 = vst [vmem:[#allocation11_spill] sm:$0xff] %v14384_v34  ;;  %v8398_v1 = vpop.f32.mrb[26].mxu0  ;;  %10461 = vmatprep.subr.bf16.mxu1 %v15725_v24  ;;  %v14414_v17 = vpack.c.bf16 %v6497_v14, %v6494_v63  ;;  %v14416_v12 = vsub.f32 %v419_v0, %v6494_v63  ;;  %v14418_v51 = vsub.f32 %v420_v39, %v6497_v14  ;;  %v6605_v29 = vand.u32 4294901760, %v6604_v28 }
 0x300   : > { %v8399_v20 = vpop.f32.mrb[27].mxu0  ;;  %v6548_v23 = vand.u32 4294901760, %v437_v42  ;;  %v6551_v49 = vand.u32 4294901760, %v438_v35  ;;  %v6500_v6 = vand.u32 4294901760, %v421_v21  ;;  %v6503_v24 = vand.u32 4294901760, %v422_v61 }
 0x301   : > { %15770 = vst [vmem:[#allocation24_spill] sm:$0xff] %v14414_v17  ;;  %v8400_v53 = vadd.f32 %v8399_v20, %v8398_v1  ;;  %10439 = vmatpush3.bf16.msra.mxu0 %v14323_v19  ;;  %v15218_v8 = vand.u32 4294901760, %v14400_v46  ;;  %v6724_v0 = vand.u32 4294901760, %v6723_v27  ;;  %v6731_v45 = vand.u32 4294901760, %v6730_v38 }
 0x302   : > { %10463 = vmatpush3.bf16.msra.mxu1 %v15726_v25  ;;  %10441 = vmatprep.subr.bf16.mxu0 %v14341_v26  ;;  %v6611_v39 = vsub.f32 %v14369_v50, %v15214_v43  ;;  %v6618_v63 = vsub.f32 %v14374_v41, %v15213_v62  ;;  %v6554_v14 = vand.u32 4294901760, %v439_v4  ;;  %v6557_v57 = vand.u32 4294901760, %v440_v44 }
 0x303   : > { %v4374_v19 = vadd.f32 %v8400_v53, %v14249_v2  ;;  %10465 = vmatprep.subr.bf16.mxu1 %v15727_v13  ;;  %v15216_v25 = vand.u32 4294901760, %v14395_v3  ;;  %v14433_v28 = vpack.c.bf16 %v6605_v29, %v6598_v36  ;;  %v14435_v26 = vpack.c.bf16 %v6551_v49, %v6548_v23  ;;  %v423_v2 = vld [vmem:[#allocation5 + $0x740] sm:$0xff]  ;;  %v424_v13 = vld [vmem:[#allocation5 + $0x748] sm:$0xff] }
 0x304   : > { %v14437_v27 = vsub.f32 %v437_v42, %v6548_v23  ;;  %v15215_v38 = vand.u32 4294901760, %v14397_v16  ;;  %v14441_v1 = vsub.f32 %v438_v35, %v6551_v49  ;;  %v14443_v20 = vpack.c.bf16 %v6503_v24, %v6500_v6 }
 0x305   : > { %15771 = vst [vmem:[#allocation15_spill] sm:$0xff] %v14435_v26  ;;  %10443 = vmatpush3.bf16.msra.mxu0 %v14347_v18  ;;  %v15217_v53 = vand.u32 4294901760, %v14416_v12  ;;  %v6580_v36 = vsub.f32 %v14400_v46, %v15218_v8  ;;  %v14451_v42 = vsub.f32 %v421_v21, %v6500_v6  ;;  %v14453_v29 = vsub.f32 %v422_v61, %v6503_v24  ;;  %v441_v24 = vld [vmem:[#allocation5 + $0x7d0] sm:$0xff] }
 0x306   : > { %15772 = vst [vmem:[#allocation22_spill] sm:$0xff] %v14443_v20  ;;  %10467 = vmatpush3.bf16.msra.mxu1 %v15728_v52  ;;  %10445 = vmatprep.subr.bf16.mxu0 %v14358_v10  ;;  %v6612_v18 = vand.u32 4294901760, %v6611_v39  ;;  %v15219_v49 = vand.u32 4294901760, %v14418_v51  ;;  %v14457_v35 = vpack.c.bf16 %v6731_v45, %v6724_v0  ;;  %v6619_v23 = vand.u32 4294901760, %v6618_v63  ;;  %v442_v45 = vld [vmem:[#allocation5 + $0x7d8] sm:$0xff]  ;;  %v425_v39 = vld [vmem:[#allocation5 + $0x750] sm:$0xff] }
 0x307   : > { %15773 = vst [vmem:[#allocation14_spill] sm:$0xff] %v14451_v42  ;;  %15774 = vst [vmem:[#allocation20_spill] sm:$0xff] %v14453_v29  ;;  %10469 = vmatprep.subr.bf16.mxu1 %v15731_v58  ;;  %v14459_v62 = vpack.c.bf16 %v6557_v57, %v6554_v14  ;;  %v6737_v52 = vsub.f32 %v14395_v3, %v15216_v25  ;;  %v14464_v10 = vsub.f32 %v439_v4, %v6554_v14 }
 0x308   : > { %v8433_v43 = vpop.f32.mrb[26].mxu1  ;;  %v6744_v6 = vsub.f32 %v14397_v16, %v15215_v38  ;;  %v6506_v21 = vand.u32 4294901760, %v423_v2  ;;  %v6509_v61 = vand.u32 4294901760, %v424_v13  ;;  %v6625_v0 = vsub.f32 %v14416_v12, %v15217_v53 }
 0x309   : > { %15775 = vst [vmem:[#allocation17_spill] sm:$0xff] %v14459_v62  ;;  %v8434_v58 = vpop.f32.mrb[27].mxu1  ;;  %10447 = vmatpush3.bf16.msra.mxu0 %v14364_v22  ;;  %v6581_v63 = vand.u32 4294901760, %v6580_v36  ;;  %v6632_v38 = vsub.f32 %v14418_v51, %v15219_v49  ;;  %v14483_v53 = vpack.c.bf16 %v6619_v23, %v6612_v18  ;;  %v14485_v8 = vsub.f32 %v440_v44, %v6557_v57  ;;  %v426_v22 = vld [vmem:[#allocation5 + $0x758] sm:$0xff] }
 0x30a   : > { %v8435_v14 = vadd.f32 %v8434_v58, %v8433_v43  ;;  %10471 = vmatpush3.bf16.msra.mxu1 %v14042_v40  ;;  %10481 = vmatprep.subr.bf16.mxu0 %v14366_v7  ;;  %v6738_v36 = vand.u32 4294901760, %v6737_v52  ;;  %v6560_v43 = vand.u32 4294901760, %v441_v24  ;;  %v6745_v40 = vand.u32 4294901760, %v6744_v6 }
 0x30b   : > { %10473 = vmatprep.subr.bf16.mxu1 %v14063_v37  ;;  %v14490_v4 = vsub.f32 %v423_v2, %v6506_v21  ;;  %v6563_v49 = vand.u32 4294901760, %v442_v45  ;;  %v14493_v25 = vpack.c.bf16 %v6509_v61, %v6506_v21  ;;  %v15777_v37 = vand.u32 4294901760, %v14437_v27 }
 0x30c   : > { %v14487_v58 = vadd.f32 %v8435_v14, %v4374_v19  ;;  %6372 = vmatmul.mubr.f32.vlgmr.msra.gmra.mrb[40].mxu0 %v14096_v48  ;;  %v15778_v57 = vand.u32 4294901760, %v14441_v1  ;;  %v6626_v2 = vand.u32 4294901760, %v6625_v0  ;;  %v6633_v18 = vand.u32 4294901760, %v6632_v38  ;;  %v443_v14 = vld [vmem:[#allocation5 + $0x7e0] sm:$0xff] }
 0x30d   : > { %10483 = vmatpush3.bf16.msra.mxu0 %v14384_v34  ;;  %15776 = vst [vmem:[#allocation18_spill] sm:$0xff] %v14493_v25  ;;  %v6751_v44 = vsub.f32 %v14437_v27, %v15777_v37  ;;  %6582 = vmatprep.mubr.f32.mxu0 %v6581_v63  ;;  %v15779_v23 = vand.u32 4294901760, %v14451_v42  ;;  %v15780_v6 = vand.u32 4294901760, %v14453_v29  ;;  %v444_v37 = vld [vmem:[#allocation5 + $0x7e8] sm:$0xff]  ;;  %v6512_v63 = vand.u32 4294901760, %v425_v39 }
 0x30e   : > { %v6758_v19 = vsub.f32 %v14441_v1, %v15778_v57  ;;  %10475 = vmatpush3.bf16.msra.mxu1 %v14122_v9  ;;  %10485 = vmatprep.subr.bf16.mxu0 %v14386_v11  ;;  %v14510_v57 = vsub.f32 %v424_v13, %v6509_v61  ;;  %v6515_v9 = vand.u32 4294901760, %v426_v22  ;;  %v15228_v11 = vand.u32 4294901760, %v14464_v10 }
 0x30f   : > { %v6639_v52 = vsub.f32 %v14451_v42, %v15779_v23  ;;  %v6646_v21 = vsub.f32 %v14453_v29, %v15780_v6  ;;  %10477 = vmatprep.subr.bf16.mxu1 %v14148_v59  ;;  %v14513_v0 = vpack.c.bf16 %v6745_v40, %v6738_v36  ;;  %v14515_v38 = vpack.c.bf16 %v6563_v49, %v6560_v43 }
 0x310   : > { %v14517_v34 = vsub.f32 %v441_v24, %v6560_v43  ;;  %v14519_v23 = vsub.f32 %v442_v45, %v6563_v49  ;;  %v6752_v6 = vand.u32 4294901760, %v6751_v44  ;;  %v6759_v29 = vand.u32 4294901760, %v6758_v19  ;;  %v427_v24 = vld [vmem:[#allocation5 + $0x760] sm:$0xff]  ;;  %v428_v43 = vld [vmem:[#allocation5 + $0x768] sm:$0xff] }
 0x311   : > { %15781 = vst [vmem:[#allocation16_spill] sm:$0xff] %v14515_v38  ;;  %10487 = vmatpush3.bf16.msra.mxu0 %v14388_v5  ;;  %v6566_v42 = vand.u32 4294901760, %v443_v14  ;;  %v6569_v59 = vand.u32 4294901760, %v444_v37  ;;  %v14524_v13 = vpack.c.bf16 %v6633_v18, %v6626_v2  ;;  %v6640_v61 = vand.u32 4294901760, %v6639_v52  ;;  %v14541_v18 = vld [vmem:[#allocation5 + $0x7f0] sm:$0xff] }
 0x312   : > { %15782 = vst [vmem:[#allocation23_spill] sm:$0xff] %v14519_v23  ;;  %10479 = vmatpush3.bf16.msra.mxu1 %v14172_v60  ;;  %10489 = vmatprep.subr.bf16.mxu0 %v14393_v55  ;;  %v6647_v36 = vand.u32 4294901760, %v6646_v21  ;;  %v15229_v40 = vand.u32 4294901760, %v14485_v8  ;;  %v14528_v49 = vpack.c.bf16 %v6515_v9, %v6512_v63  ;;  %v14530_v45 = vsub.f32 %v425_v39, %v6512_v63 }
 0x313   : > { %10513 = vmatprep.subr.bf16.mxu1 %v14412_v32  ;;  %v14535_v60 = vsub.f32 %v14464_v10, %v15228_v11  ;;  %v14538_v19 = vsub.f32 %v426_v22, %v6515_v9  ;;  %v14543_v32 = vld [vmem:[#allocation5 + $0x7f8] sm:$0xff]  ;;  %v15236_v39 = vand.u32 4294901760, %v14517_v34  ;;  %v10524_v21 = vpack.c.bf16 %v6759_v29, %v6752_v6  ;;  %v189_v9 = vld [vmem:[%s11021_s29 + $0x70] sm:$0xff] }
 0x314   : > { %v14549_v63 = vpack.c.bf16 %v6569_v59, %v6566_v42  ;;  %v14551_v11 = vsub.f32 %v443_v14, %v6566_v42  ;;  %v6518_v22 = vand.u32 4294901760, %v427_v24  ;;  %v10526_v2 = vpack.c.bf16 %v6647_v36, %v6640_v61  ;;  %v14568_v61 = vld [vmem:[#allocation5 + $0x770] sm:$0xff] }
 0x315   : > { %15783 = vst [vmem:[#allocation19_spill] sm:$0xff] %v14538_v19  ;;  %6476 = vmatmul.mubr.f32.vlgmr.msra.gmra.mrb[40].mxu1 %v14096_v48  ;;  %10491 = vmatpush3.bf16.msra.mxu0 %v14414_v17  ;;  %v14556_v44 = vsub.f32 %v444_v37, %v6569_v59  ;;  %v6772_v48 = vsub.f32 %v14485_v8, %v15229_v40  ;;  %v6521_v52 = vand.u32 4294901760, %v428_v43  ;;  %v6766_v29 = vand.u32 4294901760, %v14535_v60  ;;  %v14570_v37 = vld [vmem:[#allocation5 + $0x778] sm:$0xff] }
 0x316   : > { %15784 = vst [vmem:[#allocation21_spill] sm:$0xff] %v14551_v11  ;;  %10515 = vmatpush3.bf16.msra.mxu1 %v14433_v28  ;;  %10493 = vmatprep.subr.bf16.mxu0 %v14435_v26  ;;  %v15785_v42 = vand.u32 4294901760, %v14490_v4  ;;  %v6572_v28 = vand.u32 4294901760, %v14541_v18  ;;  %v6575_v6 = vand.u32 4294901760, %v14543_v32  ;;  %v15786_v59 = vand.u32 4294901760, %v14510_v57 }
 0x317   : > { %10517 = vmatprep.subr.bf16.mxu1 %v14457_v35  ;;  %6818 = vmatprep.mubr.f32.mxu1 %v14371_v47  ;;  %v6779_v36 = vsub.f32 %v14517_v34, %v15236_v39  ;;  %v15787_v60 = vand.u32 4294901760, %v14519_v23  ;;  %v14582_v40 = vand.u32 4294901760, %v189_v9  ;;  %v14585_v26 = vsub.f32 %v427_v24, %v6518_v22 }
 0x318   : > { %v6653_v14 = vsub.f32 %v14490_v4, %v15785_v42  ;;  %v6660_v35 = vsub.f32 %v14510_v57, %v15786_v59  ;;  %v6773_v39 = vand.u32 4294901760, %v6772_v48  ;;  %v14592_v55 = vsub.f32 %v428_v43, %v6521_v52 }
 0x319   : > { %v6786_v42 = vsub.f32 %v14519_v23, %v15787_v60  ;;  %10495 = vmatpush3.bf16.msra.mxu0 %v14443_v20  ;;  %v6524_v60 = vand.u32 4294901760, %v14568_v61  ;;  %v6527_v23 = vand.u32 4294901760, %v14570_v37  ;;  %v14598_v47 = vsub.f32 %v14541_v18, %v6572_v28 }
 0x31a   : > { %10519 = vmatpush3.bf16.msra.mxu1 %v14483_v53  ;;  %10497 = vmatprep.subr.bf16.mxu0 %v14459_v62  ;;  %v6654_v24 = vand.u32 4294901760, %v6653_v14  ;;  %v14601_v17 = vsub.f32 %v14543_v32, %v6575_v6  ;;  %v6661_v59 = vand.u32 4294901760, %v6660_v35  ;;  %v6780_v62 = vand.u32 4294901760, %v6779_v36 }
 0x31b   : > { %10521 = vmatprep.subr.bf16.mxu1 %v14513_v0  ;;  %v6787_v48 = vand.u32 4294901760, %v6786_v42  ;;  %v14605_v43 = vsub.f32 %v189_v9, %v14582_v40  ;;  %v14608_v20 = vpack.c.bf16 %v6521_v52, %v6518_v22  ;;  %v15788_v0 = vand.u32 4294901760, %v14530_v45 }
 0x31c   : > { %v15789_v14 = vand.u32 4294901760, %v14538_v19  ;;  %v15790_v53 = vand.u32 4294901760, %v14551_v11  ;;  %v14622_v9 = vsub.f32 %v14568_v61, %v6524_v60  ;;  %v14625_v52 = vsub.f32 %v14570_v37, %v6527_v23 }
 0x31d   : > { %10499 = vmatpush3.bf16.msra.mxu0 %v14493_v25  ;;  %v6667_v18 = vsub.f32 %v14530_v45, %v15788_v0  ;;  %v6687_v36 = vand.u32 4294901760, %v14592_v55  ;;  %v10528_v0 = vpack.c.bf16 %v6773_v39, %v6766_v29  ;;  %v10530_v25 = vpack.c.bf16 %v6661_v59, %v6654_v24 }
 0x31e   : > { %v6674_v32 = vsub.f32 %v14538_v19, %v15789_v14  ;;  %v6793_v35 = vsub.f32 %v14551_v11, %v15790_v53  ;;  %10523 = vmatpush3.bf16.msra.mxu1 %v14524_v13  ;;  %10501 = vmatprep.subr.bf16.mxu0 %v14515_v38  ;;  %v15791_v14 = vand.u32 4294901760, %v14556_v44  ;;  %v15255_v13 = vand.u32 4294901760, %v14598_v47 }
 0x31f   : > { %v8468_v42 = vpop.f32.mrb[28].mxu0  ;;  %10525 = vmatprep.subr.bf16.mxu1 %v10524_v21  ;;  %v14634_v11 = vpack.c.bf16 %v6575_v6, %v6572_v28  ;;  %v10532_v37 = vpack.c.bf16 %v6787_v48, %v6780_v62  ;;  %v6585_v22 = vand.u32 4294901760, %v14605_v43  ;;  %v6668_v21 = vand.u32 4294901760, %v6667_v18 }
 0x320   : > { %v6800_v53 = vsub.f32 %v14556_v44, %v15791_v14  ;;  %v8469_v61 = vpop.f32.mrb[29].mxu0  ;;  %v6675_v39 = vand.u32 4294901760, %v6674_v32  ;;  %v6794_v29 = vand.u32 4294901760, %v6793_v35  ;;  %v15792_v14 = vand.u32 4294901760, %v14585_v26 }
 0x321   : > { %v8470_v19 = vadd.f32 %v8469_v61, %v8468_v42  ;;  %10503 = vmatpush3.bf16.msra.mxu0 %v14528_v49  ;;  %v6688_v28 = vsub.f32 %v14592_v55, %v6687_v36  ;;  %v15253_v62 = vand.u32 4294901760, %v14622_v9  ;;  %v15254_v6 = vand.u32 4294901760, %v14625_v52 }
 0x322   : > { %10527 = vmatpush3.bf16.msra.mxu1 %v10526_v2  ;;  %10505 = vmatprep.subr.bf16.mxu0 %v14549_v63  ;;  %v6681_v38 = vsub.f32 %v14585_v26, %v15792_v14  ;;  %v6801_v24 = vand.u32 4294901760, %v6800_v53  ;;  %v6807_v2 = vsub.f32 %v14598_v47, %v15255_v13  ;;  %v15793_v48 = vand.u32 4294901760, %v14601_v17 }
 0x323   : > { %v4650_v59 = vadd.f32 %v8470_v19, %v14487_v58  ;;  %10529 = vmatprep.subr.bf16.mxu1 %v10528_v0  ;;  %v6586_v32 = vsub.f32 %v14605_v43, %v6585_v22  ;;  %v14658_v35 = vpack.c.bf16 %v6527_v23, %v6524_v60  ;;  %v10534_v42 = vpack.c.bf16 %v6675_v39, %v6668_v21 }
 0x324   : > { %v6814_v18 = vsub.f32 %v14601_v17, %v15793_v48  ;;  %v10544_v58 = vpack.c.bf16 %v14271_v33, %v14267_v31  ;;  %v6682_v19 = vand.u32 4294901760, %v6681_v38  ;;  %v6689_v0 = vand.u32 4294901760, %v6688_v28 }
 0x325   : > { %10507 = vmatpush3.bf16.msra.mxu0 %v14608_v20  ;;  %v6695_v53 = vsub.f32 %v14622_v9, %v15253_v62  ;;  %v6702_v61 = vsub.f32 %v14625_v52, %v15254_v6  ;;  %v10536_v23 = vpack.c.bf16 %v6801_v24, %v6794_v29  ;;  %v6808_v60 = vand.u32 4294901760, %v6807_v2 }
 0x326   : > { %10531 = vmatpush3.bf16.msra.mxu1 %v10530_v25  ;;  %10509 = vmatprep.subr.bf16.mxu0 %v14634_v11  ;;  %v6815_v21 = vand.u32 4294901760, %v6814_v18  ;;  %v6587_v14 = vand.u32 4294901760, %v6586_v32  ;;  %v10546_v25 = vpack.c.bf16 %v14307_v30, %v14295_v54  ;;  %v10548_v38 = vpack.c.bf16 %v14330_v15, %v14327_v56 }
 0x327   : > { %10533 = vmatprep.subr.bf16.mxu1 %v10532_v37  ;;  %v10538_v62 = vpack.c.bf16 %v6689_v0, %v6682_v19  ;;  %v6696_v6 = vand.u32 4294901760, %v6695_v53  ;;  %v6703_v37 = vand.u32 4294901760, %v6702_v61  ;;  %v10550_v2 = vpack.c.bf16 %v14374_v41, %v14369_v50  ;;  %v15796_v19 = vld [vmem:[#allocation11_spill] sm:$0xff]  ;;  %v15797_v53 = vld [vmem:[#allocation13_spill] sm:$0xff] }
 0x328   : > { %v8503_v39 = vpop.f32.mrb[28].mxu1  ;;  %v10540_v29 = vpack.c.bf16 %v6815_v21, %v6808_v60  ;;  %v10552_v32 = vpack.c.bf16 %v14397_v16, %v14395_v3  ;;  %v10560_v0 = vpack.c.bf16 %v14485_v8, %v14464_v10  ;;  %v15798_v61 = vand.u32 4294901760, %v14400_v46  ;;  %v15799_v60 = vld [vmem:[#allocation23_spill] sm:$0xff] }
 0x329   : > { %v8504_v48 = vpop.f32.mrb[29].mxu1  ;;  %10511 = vmatpush3.bf16.msra.mxu0 %v14658_v35  ;;  %v10542_v18 = vpack.c.bf16 %v6703_v37, %v6696_v6  ;;  %v15795_v6 = vld [vmem:[#allocation20_spill] sm:$0xff]  ;;  %v10564_v21 = vpack.c.bf16 %v15799_v60, %v14517_v34  ;;  %v15804_v37 = vld [vmem:[#allocation15_spill] sm:$0xff] }
 0x32a   : > { %v8505_v28 = vadd.f32 %v8504_v48, %v8503_v39  ;;  %10535 = vmatpush3.bf16.msra.mxu1 %v10534_v42  ;;  %10545 = vmatprep.subr.bf16.mxu0 %v10544_v58  ;;  %v10554_v42 = vpack.c.bf16 %v14418_v51, %v14416_v12  ;;  %v15800_v39 = vld [vmem:[#allocation25_spill] sm:$0xff] }
 0x32b   : > { %10537 = vmatprep.subr.bf16.mxu1 %v10536_v23  ;;  %v10562_v23 = vpack.c.bf16 %v14510_v57, %v14490_v4 }
 0x32c   : > { %v4754_v24 = vadd.f32 %v8505_v28, %v4650_v59  ;;  %6588 = vmatmul.mubr.f32.vlgmr.msra.gmra.mrb[42].mxu0 %v6587_v14  ;;  %v10556_v59 = vpack.c.bf16 %v14441_v1, %v14437_v27  ;;  %v15801_v14 = vld [vmem:[#allocation19_spill] sm:$0xff] }
 0x32d   : > { %10547 = vmatpush3.bf16.msra.mxu0 %v10546_v25  ;;  %6955 = vmatprep.mubr.f32.mxu0 %v14400_v46  ;;  %v10566_v48 = vpack.c.bf16 %v15801_v14, %v14530_v45  ;;  %v15802_v25 = vld [vmem:[#allocation24_spill] sm:$0xff]  ;;  %v15803_v46 = vld [vmem:[#allocation21_spill] sm:$0xff] }
 0x32e   : > { %10539 = vmatpush3.bf16.msra.mxu1 %v10538_v62  ;;  %10549 = vmatprep.subr.bf16.mxu0 %v10548_v38  ;;  %v15794_v62 = vld [vmem:[#allocation14_spill] sm:$0xff]  ;;  %v10568_v38 = vpack.c.bf16 %v14556_v44, %v15803_v46 }
 0x32f   : > { %10541 = vmatprep.subr.bf16.mxu1 %v10540_v29  ;;  %v10558_v58 = vpack.c.bf16 %v15795_v6, %v15794_v62 }
 0x331   : > { %10551 = vmatpush3.bf16.msra.mxu0 %v10550_v2 }
 0x332   : > { %10543 = vmatpush3.bf16.msra.mxu1 %v10542_v18  ;;  %10553 = vmatprep.subr.bf16.mxu0 %v10552_v32  ;;  %v10570_v18 = vpack.c.bf16 %v14592_v55, %v14585_v26  ;;  %v15805_v32 = vld [vmem:[#allocation22_spill] sm:$0xff] }
 0x333   : > { %10577 = vmatprep.subr.bf16.mxu1 %v14366_v7 }
 0x335   : > { %6820 = vmatmul.mubr.f32.vlgmr.msra.gmra.mrb[42].mxu1 %v14582_v40  ;;  %10555 = vmatpush3.bf16.msra.mxu0 %v10554_v42  ;;  %v10572_v42 = vpack.c.bf16 %v14601_v17, %v14598_v47 }
 0x336   : > { %10579 = vmatpush3.bf16.msra.mxu1 %v15796_v19  ;;  %10557 = vmatprep.subr.bf16.mxu0 %v10556_v59 }
 0x337   : > { %10581 = vmatprep.subr.bf16.mxu1 %v15797_v53  ;;  %7062 = vmatprep.mubr.f32.mxu1 %v15798_v61  ;;  %v15807_v61 = vld [vmem:[#allocation18_spill] sm:$0xff] }
 0x339   : > { %10559 = vmatpush3.bf16.msra.mxu0 %v10558_v58  ;;  %v15806_v58 = vld [vmem:[#allocation17_spill] sm:$0xff] }
 0x33a   : > { %10583 = vmatpush3.bf16.msra.mxu1 %v14388_v5  ;;  %10561 = vmatprep.subr.bf16.mxu0 %v10560_v0  ;;  %v10574_v0 = vpack.c.bf16 %v14625_v52, %v14622_v9 }
 0x33b   : > { %10585 = vmatprep.subr.bf16.mxu1 %v15800_v39 }
 0x33d   : > { %10563 = vmatpush3.bf16.msra.mxu0 %v10562_v23  ;;  %v15808_v23 = vand.u32 4294901760, %v14267_v31  ;;  %v15814_v31 = vand.u32 4294901760, %v14330_v15  ;;  %v15819_v15 = vand.u32 4294901760, %v14397_v16  ;;  %v15825_v16 = vand.u32 4294901760, %v15795_v6 }
 0x33e   : > { %10587 = vmatpush3.bf16.msra.mxu1 %v15802_v25  ;;  %10565 = vmatprep.subr.bf16.mxu0 %v10564_v21  ;;  %v15809_v21 = vand.u32 4294901760, %v14271_v33 }
 0x33f   : > { %v8538_v28 = vpop.f32.mrb[30].mxu0  ;;  %10589 = vmatprep.subr.bf16.mxu1 %v15804_v37 }
 0x340   : > { %v8539_v29 = vpop.f32.mrb[31].mxu0 }
 0x341   : > { %v8540_v2 = vadd.f32 %v8539_v29, %v8538_v28  ;;  %10567 = vmatpush3.bf16.msra.mxu0 %v10566_v48  ;;  %v10608_v48 = vpack.c.bf16 %v15809_v21, %v15808_v23  ;;  %v15810_v28 = vld [vmem:[#allocation16_spill] sm:$0xff] }
 0x342   : > { %10591 = vmatpush3.bf16.msra.mxu1 %v15805_v32  ;;  %10569 = vmatprep.subr.bf16.mxu0 %v10568_v38  ;;  %v15817_v21 = vld [vmem:[#allocation12_spill] sm:$0xff] }
 0x343   : > { %v4866_v59 = vadd.f32 %v8540_v2, %v4754_v24  ;;  %10593 = vmatprep.subr.bf16.mxu1 %v15806_v58  ;;  %v15811_v24 = vand.u32 4294901760, %v14295_v54  ;;  %v15812_v2 = vand.u32 4294901760, %v14307_v30  ;;  %v15815_v54 = vand.u32 4294901760, %v14369_v50 }
 0x344   : > { %v15816_v30 = vand.u32 4294901760, %v14374_v41  ;;  %v15821_v50 = vand.u32 4294901760, %v14418_v51  ;;  %v15822_v41 = vand.u32 4294901760, %v14437_v27  ;;  %v15826_v51 = vand.u32 4294901760, %v14464_v10 }
 0x345   : > { %10571 = vmatpush3.bf16.msra.mxu0 %v10570_v18  ;;  %v10610_v18 = vpack.c.bf16 %v15812_v2, %v15811_v24  ;;  %v15827_v27 = vand.u32 4294901760, %v14485_v8  ;;  %v15831_v10 = vand.u32 4294901760, %v15799_v60  ;;  %v15832_v8 = vand.u32 4294901760, %v14530_v45 }
 0x346   : > { %10595 = vmatpush3.bf16.msra.mxu1 %v15807_v61  ;;  %10573 = vmatprep.subr.bf16.mxu0 %v10572_v42  ;;  %v15813_v42 = vand.u32 4294901760, %v14327_v56  ;;  %v15818_v56 = vand.u32 4294901760, %v14395_v3  ;;  %v15824_v3 = vand.u32 4294901760, %v15794_v62  ;;  %v15830_v62 = vand.u32 4294901760, %v14517_v34 }
 0x347   : > { %10597 = vmatprep.subr.bf16.mxu1 %v15810_v28  ;;  %v15840_v2 = vand.u32 4294901760, %v14625_v52 }
 0x348   : > { %v8573_v38 = vpop.f32.mrb[30].mxu1  ;;  %v10612_v33 = vpack.c.bf16 %v15814_v31, %v15813_v42  ;;  %v10628_v6 = vpack.c.bf16 %v15831_v10, %v15830_v62 }
 0x349   : > { %v8574_v29 = vpop.f32.mrb[31].mxu1  ;;  %10575 = vmatpush3.bf16.msra.mxu0 %v10574_v0  ;;  %v10614_v0 = vpack.c.bf16 %v15816_v30, %v15815_v54 }
 0x34a   : > { %v8575_v13 = vadd.f32 %v8574_v29, %v8573_v38  ;;  %10599 = vmatpush3.bf16.msra.mxu1 %v14528_v49  ;;  %10609 = vmatprep.subr.bf16.mxu0 %v10608_v48  ;;  %v10616_v48 = vpack.c.bf16 %v15819_v15, %v15818_v56  ;;  %v15823_v38 = vand.u32 4294901760, %v14441_v1  ;;  %v10624_v1 = vpack.c.bf16 %v15827_v27, %v15826_v51 }
 0x34b   : > { %10601 = vmatprep.subr.bf16.mxu1 %v14549_v63 }
 0x34c   : > { %v5098_v23 = vadd.f32 %v8575_v13, %v4866_v59  ;;  %6958 = vmatmul.mubr.f32.vlgmr.msra.gmra.mrb[44].mxu0 %v14605_v43  ;;  %v15820_v13 = vand.u32 4294901760, %v14416_v12  ;;  %v10620_v29 = vpack.c.bf16 %v15823_v38, %v15822_v41  ;;  %v10622_v12 = vpack.c.bf16 %v15825_v16, %v15824_v3 }
 0x34d   : > { %10611 = vmatpush3.bf16.msra.mxu0 %v10610_v18  ;;  %7232 = vmatprep.mubr.f32.mxu0 %v15817_v21  ;;  %v15829_v43 = vand.u32 4294901760, %v14510_v57 }
 0x34e   : > { %10603 = vmatpush3.bf16.msra.mxu1 %v14608_v20  ;;  %10613 = vmatprep.subr.bf16.mxu0 %v10612_v33  ;;  %v10618_v59 = vpack.c.bf16 %v15821_v50, %v15820_v13 }
 0x34f   : > { %10605 = vmatprep.subr.bf16.mxu1 %v14634_v11 }
 0x351   : > { %10615 = vmatpush3.bf16.msra.mxu0 %v10614_v0 }
 0x352   : > { %10607 = vmatpush3.bf16.msra.mxu1 %v14658_v35  ;;  %10617 = vmatprep.subr.bf16.mxu0 %v10616_v48 }
 0x353   : > { %10641 = vmatprep.subr.bf16.mxu1 %v14366_v7  ;;  %v15828_v7 = vand.u32 4294901760, %v14490_v4  ;;  %v15834_v4 = vand.u32 4294901760, %v15803_v46 }
 0x355   : > { %7066 = vmatmul.mubr.f32.vlgmr.msra.gmra.mrb[44].mxu1 %v6585_v22  ;;  %10619 = vmatpush3.bf16.msra.mxu0 %v10618_v59  ;;  %v10626_v22 = vpack.c.bf16 %v15829_v43, %v15828_v7 }
 0x356   : > { %10643 = vmatpush3.bf16.msra.mxu1 %v15796_v19  ;;  %10621 = vmatprep.subr.bf16.mxu0 %v10620_v29  ;;  %v15833_v19 = vand.u32 4294901760, %v15801_v14  ;;  %v15837_v14 = vand.u32 4294901760, %v14598_v47 }
 0x357   : > { %10645 = vmatprep.subr.bf16.mxu1 %v15797_v53  ;;  %7336 = vmatprep.mubr.f32.mxu1 %v15817_v21 }
 0x358   : > { %v10630_v53 = vpack.c.bf16 %v15833_v19, %v15832_v8 }
 0x359   : > { %10623 = vmatpush3.bf16.msra.mxu0 %v10622_v12 }
 0x35a   : > { %10647 = vmatpush3.bf16.msra.mxu1 %v14388_v5  ;;  %10625 = vmatprep.subr.bf16.mxu0 %v10624_v1  ;;  %v15835_v5 = vand.u32 4294901760, %v14556_v44 }
 0x35b   : > { %10649 = vmatprep.subr.bf16.mxu1 %v15800_v39  ;;  %v15836_v39 = vand.u32 4294901760, %v14585_v26 }
 0x35c   : > { %v10632_v57 = vpack.c.bf16 %v15835_v5, %v15834_v4 }
 0x35d   : > { %10627 = vmatpush3.bf16.msra.mxu0 %v10626_v22  ;;  %v10634_v45 = vpack.c.bf16 %v6687_v36, %v15836_v39 }
 0x35e   : > { %10651 = vmatpush3.bf16.msra.mxu1 %v15802_v25  ;;  %10629 = vmatprep.subr.bf16.mxu0 %v10628_v6  ;;  %v15838_v25 = vand.u32 4294901760, %v14601_v17 }
 0x35f   : > { %v8608_v34 = vpop.f32.mrb[32].mxu0  ;;  %10653 = vmatprep.subr.bf16.mxu1 %v15804_v37  ;;  %v15839_v37 = vand.u32 4294901760, %v14622_v9 }
 0x360   : > { %v8609_v60 = vpop.f32.mrb[33].mxu0  ;;  %v10636_v44 = vpack.c.bf16 %v15838_v25, %v15837_v14 }
 0x361   : > { %v8610_v24 = vadd.f32 %v8609_v60, %v8608_v34  ;;  %10631 = vmatpush3.bf16.msra.mxu0 %v10630_v53  ;;  %v10638_v26 = vpack.c.bf16 %v15840_v2, %v15839_v37 }
 0x362   : > { %10655 = vmatpush3.bf16.msra.mxu1 %v15805_v32  ;;  %10633 = vmatprep.subr.bf16.mxu0 %v10632_v57 }
 0x363   : > { %v5236_v46 = vadd.f32 %v8610_v24, %v5098_v23  ;;  %10657 = vmatprep.subr.bf16.mxu1 %v15806_v58 }
 0x365   : > { %10635 = vmatpush3.bf16.msra.mxu0 %v10634_v45 }
 0x366   : > { %10659 = vmatpush3.bf16.msra.mxu1 %v15807_v61  ;;  %10637 = vmatprep.subr.bf16.mxu0 %v10636_v44 }
 0x367   : > { %10661 = vmatprep.subr.bf16.mxu1 %v15810_v28 }
 0x368   : > { %v8643_v55 = vpop.f32.mrb[32].mxu1 }
 0x369   : > { %v8644_v36 = vpop.f32.mrb[33].mxu1  ;;  %10639 = vmatpush3.bf16.msra.mxu0 %v10638_v26 }
 0x36a   : > { %v8645_v47 = vadd.f32 %v8644_v36, %v8643_v55  ;;  %10663 = vmatpush3.bf16.msra.mxu1 %v14528_v49 }
 0x36b   : > { %10665 = vmatprep.subr.bf16.mxu1 %v14549_v63 }
 0x36c   : > { %v5344_v17 = vadd.f32 %v8645_v47, %v5236_v46  ;;  %7234 = vmatmul.mubr.f32.vlgmr.msra.gmra.mrb[46].mxu0 %v14582_v40 }
 0x36e   : > { %10667 = vmatpush3.bf16.msra.mxu1 %v14608_v20 }
 0x36f   : > { %10669 = vmatprep.subr.bf16.mxu1 %v14634_v11 }
 0x372   : > { %10671 = vmatpush3.bf16.msra.mxu1 %v14658_v35 }
 0x375   : > { %7338 = vmatmul.mubr.f32.vlgmr.msra.gmra.mrb[46].mxu1 %v14582_v40 }
 0x37f   : > { %v8678_v9 = vpop.f32.mrb[34].mxu0 }
 0x380   : > { %v8679_v52 = vpop.f32.mrb[35].mxu0 }
 0x381   : > { %v8680_v32 = vadd.f32 %v8679_v52, %v8678_v9 }
 0x383   : > { %v5512_v58 = vadd.f32 %v8680_v32, %v5344_v17 }
 0x388   : > { %v8713_v61 = vpop.f32.mrb[34].mxu1 }
 0x389   : > { %v8714_v28 = vpop.f32.mrb[35].mxu1 }
 0x38a   : > { %v8715_v49 = vadd.f32 %v8714_v28, %v8713_v61 }
 0x38c   : > { %v5616_v18 = vadd.f32 %v8715_v49, %v5512_v58 }
 0x39f   : > { %v8748_v63 = vpop.f32.mrb[36].mxu0 }
 0x3a0   : > { %v8749_v42 = vpop.f32.mrb[37].mxu0 }
 0x3a1   : > { %v8750_v31 = vadd.f32 %v8749_v42, %v8748_v63 }
 0x3a3   : > { %v5728_v33 = vadd.f32 %v8750_v31, %v5616_v18 }
 0x3a8   : > { %v8783_v23 = vpop.f32.mrb[36].mxu1 }
 0x3a9   : > { %v8784_v20 = vpop.f32.mrb[37].mxu1 }
 0x3aa   : > { %v8785_v54 = vadd.f32 %v8784_v20, %v8783_v23 }
 0x3ac   : > { %v5960_v11 = vadd.f32 %v8785_v54, %v5728_v33 }
 0x3bf   : > { %v8818_v30 = vpop.f32.mrb[38].mxu0 }
 0x3c0   : > { %v8819_v35 = vpop.f32.mrb[39].mxu0 }
 0x3c1   : > { %v8820_v0 = vadd.f32 %v8819_v35, %v8818_v30 }
 0x3c3   : > { %v6098_v40 = vadd.f32 %v8820_v0, %v5960_v11 }
 0x3c8   : > { %v8853_v21 = vpop.f32.mrb[38].mxu1 }
 0x3c9   : > { %v8854_v56 = vpop.f32.mrb[39].mxu1 }
 0x3ca   : > { %v8855_v15 = vadd.f32 %v8854_v56, %v8853_v21 }
 0x3cc   : > { %v6206_v48 = vadd.f32 %v8855_v15, %v6098_v40 }
 0x3df   : > { %v8888_v13 = vpop.f32.mrb[40].mxu0 }
 0x3e0   : > { %v8889_v50 = vpop.f32.mrb[41].mxu0 }
 0x3e1   : > { %v8890_v59 = vadd.f32 %v8889_v50, %v8888_v13 }
 0x3e3   : > { %v6374_v41 = vadd.f32 %v8890_v59, %v6206_v48 }
 0x3e8   : > { %v8923_v38 = vpop.f32.mrb[40].mxu1 }
 0x3e9   : > { %v8924_v29 = vpop.f32.mrb[41].mxu1 }
 0x3ea   : > { %v8925_v3 = vadd.f32 %v8924_v29, %v8923_v38 }
 0x3ec   : > { %v6478_v16 = vadd.f32 %v8925_v3, %v6374_v41 }
 0x3ff   : > { %v8958_v12 = vpop.f32.mrb[42].mxu0 }
 0x400   : > { %v8959_v51 = vpop.f32.mrb[43].mxu0 }
 0x401   : > { %v8960_v27 = vadd.f32 %v8959_v51, %v8958_v12 }
 0x403   : > { %v6590_v1 = vadd.f32 %v8960_v27, %v6478_v16 }
 0x408   : > { %v8993_v7 = vpop.f32.mrb[42].mxu1 }
 0x409   : > { %v8994_v43 = vpop.f32.mrb[43].mxu1 }
 0x40a   : > { %v8995_v22 = vadd.f32 %v8994_v43, %v8993_v7 }
 0x40c   : > { %v6822_v62 = vadd.f32 %v8995_v22, %v6590_v1 }
 0x41f   : > { %v9028_v10 = vpop.f32.mrb[44].mxu0 }
 0x420   : > { %v9029_v6 = vpop.f32.mrb[45].mxu0 }
 0x421   : > { %v9030_v8 = vadd.f32 %v9029_v6, %v9028_v10 }
 0x423   : > { %v6960_v19 = vadd.f32 %v9030_v8, %v6822_v62 }
 0x428   : > { %v9063_v53 = vpop.f32.mrb[44].mxu1 }
 0x429   : > { %v9064_v4 = vpop.f32.mrb[45].mxu1 }
 0x42a   : > { %v9065_v5 = vadd.f32 %v9064_v4, %v9063_v53 }
 0x42c   : > { %v7068_v57 = vadd.f32 %v9065_v5, %v6960_v19 }
 0x43f   : > { %v9098_v34 = vpop.f32.mrb[46].mxu0 }
 0x440   : > { %v9099_v60 = vpop.f32.mrb[47].mxu0 }
 0x441   : > { %v9100_v24 = vadd.f32 %v9099_v60, %v9098_v34 }
 0x443   : > { %v7236_v39 = vadd.f32 %v9100_v24, %v7068_v57 }
 0x448   : > { %v9133_v45 = vpop.f32.mrb[46].mxu1 }
 0x449   : > { %v9134_v14 = vpop.f32.mrb[47].mxu1 }
 0x44a   : > { %v9135_v25 = vadd.f32 %v9134_v14, %v9133_v45 }
 0x44c   : > { %v7340_v44 = vadd.f32 %v9135_v25, %v7236_v39 }
 0x44e   : > { %v7343_v46 = vmul.f32 0.0625, %v7340_v44 }
 0x450   : > { %v7344_v37 = vmax.f32 %v7343_v46, 0.0 }
 0x452   : > { %7345 = vst [vmem:[%s174_s27] sm:$0xff] %v7344_v37 }
 0x453   : > { %10802 = shalt.err (!%p10799_p7)
}
 0x454   : > { %s10803_s7 = scalar_lea.hbm %s14812_s30, 128  ;;  %s10807_s25 = scalar_lea.hbm %s14858_s2, 256 }
 0x455   : > { %p10804_p9 = scmp.ne.s32.totalorder %s14812_s30, %s10803_s7  ;;  %p10808_p0 = scmp.lt.u32.totalorder %s14812_s30, %s14858_s2 }
 0x456   : > { %p10809_p11 = scmp.lt.u32.totalorder %s10807_s25, %s10803_s7  ;;  %p10811_p4 = scmp.lt.u32.totalorder %s10803_s7, %s14812_s30 }
 0x457   : > { %p10805_p2 = pnand %p10804_p9, %p10972_p12 }
 0x458   : > { %p10810_p1 = por %p10809_p11, %p10808_p0 }
 0x459   : > { %p10806_p5 = pneg %p10805_p2 }
 0x45a   : > { %p10812_p6 = por %p10811_p4, %p10810_p1 }
 0x45c   : > { %p10813_p8 = pnand %p10812_p6, %p10806_p5 }
 0x45e   : > { %10816 = shalt.err (!%p10813_p8)
}
 0x45f   : > { %10678 = dma.vmem_to_hbm [thread:$0]  (%p10972_p12), %s14814_s22, 128, %s14812_s30, %s7347_s3  }
 0x460 PF: > { %s7372_s19 = sand.u32 1, %s10847_s9   ;;  %p15841_p10 = scmp.ne.s32.totalorder %s15257_s16, 0 }
 0x461   : > { %p15842_p13 = scmp.ge.s32.totalorder %s10859_s12, 2  ;;  %s7373_s29 = scalar_lea.sflag [#allocation4], %s7372_s19 }
 0x463   : > { %p10689_p3 = pnand %p15842_p13, %p15841_p10 }
 0x465   : > { %10842 = dma.done.wait (!%p10689_p3), %s7373_s29, 128  }
 0x466   : > { %10844 = vsyncadd (!%p10689_p3), %s7373_s29, 4294967168  ;;  %p16_p7 = scmp.ge.s32.totalorder %s10937_s21, 4   ;;  %s15843_s9 = smov %s10851_s10 }
 0x467   : > { %s15844_s10 = smov %s10855_s11  ;;  %s15845_s11 = smov %s10968_s8 }
 0x468   : > { %s15846_s12 = smov %s10937_s21  ;;  %18 = sbr.rel (!%p16_p7) target bundleno = 6 (0x6), region = 77 }
 0x46f   :  { %7378 = vsyncpa [#allocation3], 1 }
 0x470   :  { %7380 = vsyncpa [#allocation3 + $0x1], 1 }
 0x471   :  { %7381 = vsyncpa [#allocation6], 1 }
 0x472   :  { %7382 = vsyncpa [#allocation4], 1 }
 0x473   :  { %7384 = vsyncpa [#allocation4 + $0x1], 1 }

</bundles_post_ra>
